<compile_context>
chip_gen: v6e
topology: v6e:2x2x1
jax: 0.10.0
libtpu: 0.0.40
codegen_flags: <defaults>
</compile_context>

<pallas_src>
import functools

import jax
import jax.numpy as jnp
from jax.experimental import pallas as pl
from jax.experimental.pallas import tpu as pltpu

MU_ACTS = ("leaky_relu", "leaky_relu", "leaky_relu", "sigmoid")
N_ACTS = ("leaky_relu", "leaky_relu", "leaky_relu", "tanh")
B_ACTS = ("leaky_relu", "leaky_relu", "leaky_relu", "sigmoid")

N_LAYERS = 12  # 4 (MU) + 4 (N) + 4 (B)


# ----------------------------- activations ---------------------------------
def _apply_act(y, act):
    if act == "leaky_relu":
        return jnp.where(y > 0, y, 0.01 * y)       # PyTorch default slope 0.01
    if act == "sigmoid":
        return jax.nn.sigmoid(y)
    if act == "tanh":
        return jnp.tanh(y)
    return y


# ----------------------------- fused Pallas kernel --------------------------
def fused_forward_kernel(*args, n_train, layer_meta):
    # args = (x_all, xc_all, infl, idf, packed_vec, bparam[SMEM],
    #         w_hbm_0..w_hbm_11,            # memory_space=ANY (HBM)
    #         out,
    #         wbuf_0..wbuf_11, dma_sems)    # scratch
    n_w = len(layer_meta)
    x_ref, xc_ref, infl_ref, idf_ref, vec_ref, bp_ref = args[:6]
    w_hbm = args[6:6 + n_w]
    o_ref = args[6 + n_w]
    wbufs = args[7 + n_w:7 + 2 * n_w]
    sems = args[7 + 2 * n_w]

    n = n_train

    # Kick off EVERY weight DMA immediately; each wait sits right before the
    # layer's matmul, so HBM streaming of layer i+1.. overlaps compute of layer i.
    copies = [pltpu.make_async_copy(w_hbm[i], wbufs[i], sems.at[i])
              for i in range(n_w)]
    for c in copies:
        c.start()

    infl = infl_ref[...]                                  # (N, N)
    idf = idf_ref[...]                                    # (N, N) ones - eye
    para = jnp.maximum(bp_ref[0, 0], 0.0)                 # scalar clamp(B, 0)

    def run_mlp(x, layer_ids, acts):
        for li, act in zip(layer_ids, acts):
            quant, b_off, s_off, fan_out = layer_meta[li]
            copies[li].wait()                             # just-in-time wait
            w = wbufs[li][...]
            bias = vec_ref[:, b_off:b_off + fan_out]      # (1, fan_out) f32
            if quant:
                # int8 weights hold exact integers in bf16; apply the per-column
                # scale to the f32 accumulator (VPU), keep the MXU in bf16.
                scale = vec_ref[:, s_off:s_off + fan_out]
                y = jnp.dot(x.astype(jnp.bfloat16), w.astype(jnp.bfloat16),
                            preferred_element_type=jnp.float32)
                y = y * scale + bias
            else:
                y = jnp.dot(x.astype(jnp.bfloat16), w,
                            preferred_element_type=jnp.float32) + bias
            x = _apply_act(y, act)
        return x

    # ---- MU MLP, one pass over the stacked [X ; X_Train] block -------------
    mu_all = run_mlp(x_ref[...], range(0, 4), MU_ACTS)    # (2N, 1)

    # ---- cosine similarity: one rsqrt-normalize + one NT matmul ------------
    xc = xc_ref[...]                                      # (2N, Ccat) f32
    inv_norm = jax.lax.rsqrt(jnp.sum(xc * xc, axis=1, keepdims=True))
    xcn = (xc * inv_norm).astype(jnp.bfloat16)            # (2N, Ccat)
    cos_all = jax.lax.dot_general(                        # (2N, N) = [cos; cos_train]
        xcn, xcn[n:, :],
        dimension_numbers=(((1,), (1,)), ((), ())),       # A @ B^T, no transpose op
        preferred_element_type=jnp.float32)

    # ---- N MLP, one pass over the stacked [cos ; cos_train] ----------------
    nraw_all = run_mlp(cos_all, range(4, 8), N_ACTS)      # (2N, N)
    factor = infl * idf
    w_all = nraw_all * cos_all
    nterm_b = jnp.sum(w_all[:n, :] * factor, axis=1, keepdims=True)   # (N, 1)
    nterm_t = jnp.sum(w_all[n:, :] * factor, axis=1, keepdims=True)   # (N, 1)

    mun = mu_all[n:, :] + nterm_t                         # (N, 1) = MU_train + N_train

    # ---- B MLP (batch cos only) and BTerm contraction (all f32) ------------
    cos_b = cos_all[:n, :]
    braw = run_mlp(cos_b, range(8, 12), B_ACTS)           # (N, N)
    v = braw * infl * cos_b * para                        # (N, N) f32
    bterm = jnp.dot(v, mun, preferred_element_type=jnp.float32)       # (N, 1) f32

    o_ref[...] = mu_all[:n, :] + nterm_b + bterm          # (N, 1)


# ----------------------------- wrapper ---------------------------------------
def _pad128(x):
    return (x + 127) // 128 * 128


def _pack_layer_vectors(layers):
    """Concatenate all biases (and dequant scales) into one lane-padded buffer."""
    chunks, meta, off = [], [], 0
    for layer in layers:
        fan_out = layer["b"].shape[1]
        slot = _pad128(fan_out)
        b_off = off
        chunks.append(jnp.pad(layer["b"], ((0, 0), (0, slot - fan_out))))
        off += slot
        s_off = -1
        if layer["quant"]:
            s_off = off
            chunks.append(jnp.pad(layer["scale"], ((0, 0), (0, slot - fan_out))))
            off += slot
        meta.append((bool(layer["quant"]), b_off, s_off, fan_out))
    return jnp.concatenate(chunks, axis=1), tuple(meta)


def model_forward(params, X, S, X_Train, cat_idx, infl_train, idf_train):
    del S  # batch == N path: the precomputed training-set influence tensor is
    #        used, exactly as the PyTorch module does for this case.
    # TODO(synk): the batch < N branch needs the external, undefined
    # InfluenceFactor() function and host-side Business-ID comparisons from the
    # original repo; not implemented.
    n = X_Train.shape[0]
    assert X.shape[0] == n, "only the batch == training-set-size path is implemented"

    x_all = jnp.concatenate([X, X_Train], axis=0)          # (2N, C)
    xc_all = x_all[:, cat_idx:]                            # hoisted unaligned slice
    bparam = params["B_param"].reshape(1, 1)

    layers = list(params["mu"]) + list(params["n"]) + list(params["b"])
    assert len(layers) == N_LAYERS
    packed_vec, layer_meta = _pack_layer_vectors(layers)
    weights = [l["w"] for l in layers]

    scratch_shapes = [pltpu.VMEM(w.shape, w.dtype) for w in weights]
    scratch_shapes.append(pltpu.SemaphoreType.DMA((len(weights),)))

    vmem_spec = pl.BlockSpec(memory_space=pltpu.MemorySpace.VMEM)
    smem_spec = pl.BlockSpec(memory_space=pltpu.MemorySpace.SMEM)
    any_spec = pl.BlockSpec(memory_space=pl.ANY)

    kernel = functools.partial(fused_forward_kernel, n_train=n,
                               layer_meta=layer_meta)
    return pl.pallas_call(
        kernel,
        out_shape=jax.ShapeDtypeStruct((n, 1), jnp.float32),
        in_specs=[vmem_spec] * 5 + [smem_spec] + [any_spec] * len(weights),
        out_specs=vmem_spec,
        scratch_shapes=scratch_shapes,
        compiler_params=pltpu.CompilerParams(vmem_limit_bytes=32 * 1024 * 1024),
    )(x_all, xc_all, infl_train, idf_train, packed_vec, bparam, *weights)


# ----------------------------- pure-JAX reference ---------------------------
def ref_forward(params, X, S, X_Train, cat_idx, infl_train, idf_train):
    del S

    def dense(x, layer):
        if layer["quant"]:
            y = jnp.dot(x.astype(jnp.bfloat16), layer["w"].astype(jnp.bfloat16),
                        preferred_element_type=jnp.float32)
            y = y * layer["scale"] + layer["b"]
        else:
            y = jnp.dot(x.astype(jnp.bfloat16), layer["w"],
                        preferred_element_type=jnp.float32) + layer["b"]
        return _apply_act(y, layer["act"])

    def rmlp(x, layers):
        for l in layers:
            x = dense(x, l)
        return x

    def rcos(a, b):
        an = (a * jax.lax.rsqrt(jnp.sum(a * a, axis=1, keepdims=True))
              ).astype(jnp.bfloat16)
        bn = (b * jax.lax.rsqrt(jnp.sum(b * b, axis=1, keepdims=True))
              ).astype(jnp.bfloat16)
        return jnp.dot(an, bn.T, preferred_element_type=jnp.float32)

    factor = infl_train * idf_train
    para = jnp.maximum(params["B_param"], 0.0).reshape(1, 1)

    mu = rmlp(X, params["mu"])
    cos = rcos(X[:, cat_idx:], X_Train[:, cat_idx:])
    nterm = jnp.sum(rmlp(cos, params["n"]) * cos * factor, axis=1, keepdims=True)
    braw = rmlp(cos, params["b"]) * infl_train * cos * para

    mu_t = rmlp(X_Train, params["mu"])
    cos_t = rcos(X_Train[:, cat_idx:], X_Train[:, cat_idx:])
    n_t = jnp.sum(rmlp(cos_t, params["n"]) * cos_t * factor, axis=1, keepdims=True)
    bterm = jnp.dot(braw, mu_t + n_t, preferred_element_type=jnp.float32)
    return mu + nterm + bterm


# ----------------------------- parameter init -------------------------------
def init_linear(key, fan_in, fan_out):
    k1, k2 = jax.random.split(key)
    bound = float(fan_in) ** -0.5
    w = jax.random.uniform(k1, (fan_in, fan_out), jnp.float32, -bound, bound)
    b = jax.random.uniform(k2, (1, fan_out), jnp.float32, -bound, bound)
    # The big (fan_in>=256, fan_out>=256) layers are stored int8 + per-column
    # scale (bandwidth); the small first/last layers stay bf16; biases f32.
    if fan_in >= 256 and fan_out >= 256:
        scale = jnp.max(jnp.abs(w), axis=0, keepdims=True) / 127.0
        w_q = jnp.clip(jnp.round(w / scale), -127.0, 127.0).astype(jnp.int8)
        return {"w": w_q, "scale": scale, "b": b, "quant": True}
    return {"w": w.astype(jnp.bfloat16), "scale": None, "b": b, "quant": False}


def init_mlp(key, dims, acts):
    layers = []
    for i, (din, dout, act) in enumerate(zip(dims[:-1], dims[1:], acts)):
        layer = init_linear(jax.random.fold_in(key, i), din, dout)
        layer["act"] = act
        layers.append(layer)
    return layers


# ----------------------------- main ------------------------------------------
if __name__ == "__main__":
    key = jax.random.PRNGKey(0)
    N = 8          # num_of_observations_in_training_set (and batch size)
    C = 16         # num_of_covariates
    cat_idx = 8    # index_of_categorial_features
    S_DIM = 2

    k_xtr, k_x, k_s, k_infl, k_mu, k_n, k_b, k_bp = jax.random.split(key, 8)

    X_Train = jax.random.normal(k_xtr, (N, C), jnp.float32)
    X = jax.random.normal(k_x, (N, C), jnp.float32)                 # batch == N
    S = jax.random.normal(k_s, (N, S_DIM), jnp.float32)             # unused (B==N path)
    infl_train = jax.random.uniform(k_infl, (N, N), jnp.float32)    # precomputed tensor
    idf_train = jnp.ones((N, N), jnp.float32) - jnp.eye(N, dtype=jnp.float32)

    params = {
        "mu": init_mlp(k_mu, [C, 512, 512, 256, 1], list(MU_ACTS)),
        "n": init_mlp(k_n, [N, 512, 512, 512, N], list(N_ACTS)),
        "b": init_mlp(k_b, [N, 512, 512, 512, N], list(B_ACTS)),
        "B_param": jax.random.uniform(k_bp, (1,), jnp.float32),      # torch.rand(1)
    }

    out = model_forward(params, X, S, X_Train, cat_idx, infl_train, idf_train)
    out = jax.block_until_ready(out)

    ref = ref_forward(params, X, S, X_Train, cat_idx, infl_train, idf_train)
    assert out.shape == (N, 1)
    assert jnp.allclose(out, ref, rtol=5e-3, atol=5e-3), (out, ref)

    print("KERNEL_OK")
</pallas_src>

<mosaic_0001>
module attributes {stable_mosaic.version = 11 : i64} {
  func.func @fused_forward_kernel(%arg0: memref<16x16xf32, #tpu.memory_space<vmem>>, %arg1: memref<16x8xf32, #tpu.memory_space<vmem>>, %arg2: memref<8x8xf32, #tpu.memory_space<vmem>>, %arg3: memref<8x8xf32, #tpu.memory_space<vmem>>, %arg4: memref<1x7552xf32, #tpu.memory_space<vmem>>, %arg5: memref<1x1xf32, #tpu.memory_space<smem>>, %arg6: memref<16x512xbf16, #tpu.memory_space<any>>, %arg7: memref<512x512xi8, #tpu.memory_space<any>>, %arg8: memref<512x256xi8, #tpu.memory_space<any>>, %arg9: memref<256x1xbf16, #tpu.memory_space<any>>, %arg10: memref<8x512xbf16, #tpu.memory_space<any>>, %arg11: memref<512x512xi8, #tpu.memory_space<any>>, %arg12: memref<512x512xi8, #tpu.memory_space<any>>, %arg13: memref<512x8xbf16, #tpu.memory_space<any>>, %arg14: memref<8x512xbf16, #tpu.memory_space<any>>, %arg15: memref<512x512xi8, #tpu.memory_space<any>>, %arg16: memref<512x512xi8, #tpu.memory_space<any>>, %arg17: memref<512x8xbf16, #tpu.memory_space<any>>, %arg18: memref<8x1xf32, #tpu.memory_space<vmem>>, %arg19: memref<16x512xbf16, #tpu.memory_space<vmem>>, %arg20: memref<512x512xi8, #tpu.memory_space<vmem>>, %arg21: memref<512x256xi8, #tpu.memory_space<vmem>>, %arg22: memref<256x1xbf16, #tpu.memory_space<vmem>>, %arg23: memref<8x512xbf16, #tpu.memory_space<vmem>>, %arg24: memref<512x512xi8, #tpu.memory_space<vmem>>, %arg25: memref<512x512xi8, #tpu.memory_space<vmem>>, %arg26: memref<512x8xbf16, #tpu.memory_space<vmem>>, %arg27: memref<8x512xbf16, #tpu.memory_space<vmem>>, %arg28: memref<512x512xi8, #tpu.memory_space<vmem>>, %arg29: memref<512x512xi8, #tpu.memory_space<vmem>>, %arg30: memref<512x8xbf16, #tpu.memory_space<vmem>>, %arg31: memref<12x!tpu.dma_semaphore, #tpu.memory_space<semaphore_mem>>) attributes {dimension_semantics = [], scalar_prefetch = 0 : i64, scratch_operands = 13 : i64, tpu.core_type = #tpu.core_type<tc>} {
    %c0_i32 = arith.constant 0 : i32
    %0 = tpu.memref_slice %arg31[%c0_i32] : memref<12x!tpu.dma_semaphore, #tpu.memory_space<semaphore_mem>> -> memref<1x!tpu.dma_semaphore, #tpu.memory_space<semaphore_mem>>
    %1 = tpu.memref_squeeze %0 : memref<1x!tpu.dma_semaphore, #tpu.memory_space<semaphore_mem>> -> memref<!tpu.dma_semaphore, #tpu.memory_space<semaphore_mem>>
    tpu.enqueue_dma source(%arg6 : memref<16x512xbf16, #tpu.memory_space<any>>) target(%arg19 : memref<16x512xbf16, #tpu.memory_space<vmem>>) target_semaphore(%1 : memref<!tpu.dma_semaphore, #tpu.memory_space<semaphore_mem>>)
    %c1_i32 = arith.constant 1 : i32
    %2 = tpu.memref_slice %arg31[%c1_i32] : memref<12x!tpu.dma_semaphore, #tpu.memory_space<semaphore_mem>> -> memref<1x!tpu.dma_semaphore, #tpu.memory_space<semaphore_mem>>
    %3 = tpu.memref_squeeze %2 : memref<1x!tpu.dma_semaphore, #tpu.memory_space<semaphore_mem>> -> memref<!tpu.dma_semaphore, #tpu.memory_space<semaphore_mem>>
    tpu.enqueue_dma source(%arg7 : memref<512x512xi8, #tpu.memory_space<any>>) target(%arg20 : memref<512x512xi8, #tpu.memory_space<vmem>>) target_semaphore(%3 : memref<!tpu.dma_semaphore, #tpu.memory_space<semaphore_mem>>)
    %c2_i32 = arith.constant 2 : i32
    %4 = tpu.memref_slice %arg31[%c2_i32] : memref<12x!tpu.dma_semaphore, #tpu.memory_space<semaphore_mem>> -> memref<1x!tpu.dma_semaphore, #tpu.memory_space<semaphore_mem>>
    %5 = tpu.memref_squeeze %4 : memref<1x!tpu.dma_semaphore, #tpu.memory_space<semaphore_mem>> -> memref<!tpu.dma_semaphore, #tpu.memory_space<semaphore_mem>>
    tpu.enqueue_dma source(%arg8 : memref<512x256xi8, #tpu.memory_space<any>>) target(%arg21 : memref<512x256xi8, #tpu.memory_space<vmem>>) target_semaphore(%5 : memref<!tpu.dma_semaphore, #tpu.memory_space<semaphore_mem>>)
    %c3_i32 = arith.constant 3 : i32
    %6 = tpu.memref_slice %arg31[%c3_i32] : memref<12x!tpu.dma_semaphore, #tpu.memory_space<semaphore_mem>> -> memref<1x!tpu.dma_semaphore, #tpu.memory_space<semaphore_mem>>
    %7 = tpu.memref_squeeze %6 : memref<1x!tpu.dma_semaphore, #tpu.memory_space<semaphore_mem>> -> memref<!tpu.dma_semaphore, #tpu.memory_space<semaphore_mem>>
    tpu.enqueue_dma source(%arg9 : memref<256x1xbf16, #tpu.memory_space<any>>) target(%arg22 : memref<256x1xbf16, #tpu.memory_space<vmem>>) target_semaphore(%7 : memref<!tpu.dma_semaphore, #tpu.memory_space<semaphore_mem>>)
    %c4_i32 = arith.constant 4 : i32
    %8 = tpu.memref_slice %arg31[%c4_i32] : memref<12x!tpu.dma_semaphore, #tpu.memory_space<semaphore_mem>> -> memref<1x!tpu.dma_semaphore, #tpu.memory_space<semaphore_mem>>
    %9 = tpu.memref_squeeze %8 : memref<1x!tpu.dma_semaphore, #tpu.memory_space<semaphore_mem>> -> memref<!tpu.dma_semaphore, #tpu.memory_space<semaphore_mem>>
    tpu.enqueue_dma source(%arg10 : memref<8x512xbf16, #tpu.memory_space<any>>) target(%arg23 : memref<8x512xbf16, #tpu.memory_space<vmem>>) target_semaphore(%9 : memref<!tpu.dma_semaphore, #tpu.memory_space<semaphore_mem>>)
    %c5_i32 = arith.constant 5 : i32
    %10 = tpu.memref_slice %arg31[%c5_i32] : memref<12x!tpu.dma_semaphore, #tpu.memory_space<semaphore_mem>> -> memref<1x!tpu.dma_semaphore, #tpu.memory_space<semaphore_mem>>
    %11 = tpu.memref_squeeze %10 : memref<1x!tpu.dma_semaphore, #tpu.memory_space<semaphore_mem>> -> memref<!tpu.dma_semaphore, #tpu.memory_space<semaphore_mem>>
    tpu.enqueue_dma source(%arg11 : memref<512x512xi8, #tpu.memory_space<any>>) target(%arg24 : memref<512x512xi8, #tpu.memory_space<vmem>>) target_semaphore(%11 : memref<!tpu.dma_semaphore, #tpu.memory_space<semaphore_mem>>)
    %c6_i32 = arith.constant 6 : i32
    %12 = tpu.memref_slice %arg31[%c6_i32] : memref<12x!tpu.dma_semaphore, #tpu.memory_space<semaphore_mem>> -> memref<1x!tpu.dma_semaphore, #tpu.memory_space<semaphore_mem>>
    %13 = tpu.memref_squeeze %12 : memref<1x!tpu.dma_semaphore, #tpu.memory_space<semaphore_mem>> -> memref<!tpu.dma_semaphore, #tpu.memory_space<semaphore_mem>>
    tpu.enqueue_dma source(%arg12 : memref<512x512xi8, #tpu.memory_space<any>>) target(%arg25 : memref<512x512xi8, #tpu.memory_space<vmem>>) target_semaphore(%13 : memref<!tpu.dma_semaphore, #tpu.memory_space<semaphore_mem>>)
    %c7_i32 = arith.constant 7 : i32
    %14 = tpu.memref_slice %arg31[%c7_i32] : memref<12x!tpu.dma_semaphore, #tpu.memory_space<semaphore_mem>> -> memref<1x!tpu.dma_semaphore, #tpu.memory_space<semaphore_mem>>
    %15 = tpu.memref_squeeze %14 : memref<1x!tpu.dma_semaphore, #tpu.memory_space<semaphore_mem>> -> memref<!tpu.dma_semaphore, #tpu.memory_space<semaphore_mem>>
    tpu.enqueue_dma source(%arg13 : memref<512x8xbf16, #tpu.memory_space<any>>) target(%arg26 : memref<512x8xbf16, #tpu.memory_space<vmem>>) target_semaphore(%15 : memref<!tpu.dma_semaphore, #tpu.memory_space<semaphore_mem>>)
    %c8_i32 = arith.constant 8 : i32
    %16 = tpu.memref_slice %arg31[%c8_i32] : memref<12x!tpu.dma_semaphore, #tpu.memory_space<semaphore_mem>> -> memref<1x!tpu.dma_semaphore, #tpu.memory_space<semaphore_mem>>
    %17 = tpu.memref_squeeze %16 : memref<1x!tpu.dma_semaphore, #tpu.memory_space<semaphore_mem>> -> memref<!tpu.dma_semaphore, #tpu.memory_space<semaphore_mem>>
    tpu.enqueue_dma source(%arg14 : memref<8x512xbf16, #tpu.memory_space<any>>) target(%arg27 : memref<8x512xbf16, #tpu.memory_space<vmem>>) target_semaphore(%17 : memref<!tpu.dma_semaphore, #tpu.memory_space<semaphore_mem>>)
    %c9_i32 = arith.constant 9 : i32
    %18 = tpu.memref_slice %arg31[%c9_i32] : memref<12x!tpu.dma_semaphore, #tpu.memory_space<semaphore_mem>> -> memref<1x!tpu.dma_semaphore, #tpu.memory_space<semaphore_mem>>
    %19 = tpu.memref_squeeze %18 : memref<1x!tpu.dma_semaphore, #tpu.memory_space<semaphore_mem>> -> memref<!tpu.dma_semaphore, #tpu.memory_space<semaphore_mem>>
    tpu.enqueue_dma source(%arg15 : memref<512x512xi8, #tpu.memory_space<any>>) target(%arg28 : memref<512x512xi8, #tpu.memory_space<vmem>>) target_semaphore(%19 : memref<!tpu.dma_semaphore, #tpu.memory_space<semaphore_mem>>)
    %c10_i32 = arith.constant 10 : i32
    %20 = tpu.memref_slice %arg31[%c10_i32] : memref<12x!tpu.dma_semaphore, #tpu.memory_space<semaphore_mem>> -> memref<1x!tpu.dma_semaphore, #tpu.memory_space<semaphore_mem>>
    %21 = tpu.memref_squeeze %20 : memref<1x!tpu.dma_semaphore, #tpu.memory_space<semaphore_mem>> -> memref<!tpu.dma_semaphore, #tpu.memory_space<semaphore_mem>>
    tpu.enqueue_dma source(%arg16 : memref<512x512xi8, #tpu.memory_space<any>>) target(%arg29 : memref<512x512xi8, #tpu.memory_space<vmem>>) target_semaphore(%21 : memref<!tpu.dma_semaphore, #tpu.memory_space<semaphore_mem>>)
    %c11_i32 = arith.constant 11 : i32
    %22 = tpu.memref_slice %arg31[%c11_i32] : memref<12x!tpu.dma_semaphore, #tpu.memory_space<semaphore_mem>> -> memref<1x!tpu.dma_semaphore, #tpu.memory_space<semaphore_mem>>
    %23 = tpu.memref_squeeze %22 : memref<1x!tpu.dma_semaphore, #tpu.memory_space<semaphore_mem>> -> memref<!tpu.dma_semaphore, #tpu.memory_space<semaphore_mem>>
    tpu.enqueue_dma source(%arg17 : memref<512x8xbf16, #tpu.memory_space<any>>) target(%arg30 : memref<512x8xbf16, #tpu.memory_space<vmem>>) target_semaphore(%23 : memref<!tpu.dma_semaphore, #tpu.memory_space<semaphore_mem>>)
    %c0 = arith.constant 0 : index
    %c0_0 = arith.constant 0 : index
    %24 = vector.load %arg2[%c0, %c0_0] : memref<8x8xf32, #tpu.memory_space<vmem>>, vector<8x8xf32>
    %c0_1 = arith.constant 0 : index
    %c0_2 = arith.constant 0 : index
    %25 = vector.load %arg3[%c0_1, %c0_2] : memref<8x8xf32, #tpu.memory_space<vmem>>, vector<8x8xf32>
    %c0_3 = arith.constant 0 : index
    %c0_4 = arith.constant 0 : index
    %26 = memref.load %arg5[%c0_3, %c0_4] : memref<1x1xf32, #tpu.memory_space<smem>>
    %cst = arith.constant 0.000000e+00 : f32
    %27 = arith.maximumf %26, %cst : f32
    %c0_5 = arith.constant 0 : index
    %c0_6 = arith.constant 0 : index
    %28 = vector.load %arg0[%c0_5, %c0_6] : memref<16x16xf32, #tpu.memory_space<vmem>>, vector<16x16xf32>
    %c0_i32_7 = arith.constant 0 : i32
    %29 = tpu.memref_slice %arg31[%c0_i32_7] : memref<12x!tpu.dma_semaphore, #tpu.memory_space<semaphore_mem>> -> memref<1x!tpu.dma_semaphore, #tpu.memory_space<semaphore_mem>>
    %30 = tpu.memref_squeeze %29 : memref<1x!tpu.dma_semaphore, #tpu.memory_space<semaphore_mem>> -> memref<!tpu.dma_semaphore, #tpu.memory_space<semaphore_mem>>
    tpu.wait_dma2 semaphore(%30 : memref<!tpu.dma_semaphore, #tpu.memory_space<semaphore_mem>>) src(%arg6 : memref<16x512xbf16, #tpu.memory_space<any>>) dst(%arg19 : memref<16x512xbf16, #tpu.memory_space<vmem>>)
    %c0_8 = arith.constant 0 : index
    %c0_9 = arith.constant 0 : index
    %31 = vector.load %arg19[%c0_8, %c0_9] : memref<16x512xbf16, #tpu.memory_space<vmem>>, vector<16x512xbf16>
    %c0_10 = arith.constant 0 : index
    %c0_11 = arith.constant 0 : index
    %32 = vector.load %arg4[%c0_10, %c0_11] : memref<1x7552xf32, #tpu.memory_space<vmem>>, vector<1x512xf32>
    %33 = arith.truncf %28 : vector<16x16xf32> to vector<16x16xbf16>
    %cst_12 = arith.constant dense<0.000000e+00> : vector<16x512xf32>
    %34 = tpu.matmul %33, %31, %cst_12 {dimension_numbers = #tpu.dot_dimension_numbers<[1], [0], [0], [1], [0, 0, 1, 1], [], []>} : vector<16x16xbf16>, vector<16x512xbf16>, vector<16x512xf32> -> vector<16x512xf32>
    %35 = vector.broadcast %32 : vector<1x512xf32> to vector<16x512xf32>
    %36 = arith.addf %34, %35 : vector<16x512xf32>
    %cst_13 = arith.constant 0.000000e+00 : f32
    %37 = vector.broadcast %cst_13 : f32 to vector<16x512xf32>
    %38 = arith.cmpf ogt, %36, %37 : vector<16x512xf32>
    %cst_14 = arith.constant 0.00999999977 : f32
    %39 = vector.broadcast %cst_14 : f32 to vector<16x512xf32>
    %40 = arith.mulf %39, %36 : vector<16x512xf32>
    %41 = arith.select %38, %36, %40 : vector<16x512xi1>, vector<16x512xf32>
    %c1_i32_15 = arith.constant 1 : i32
    %42 = tpu.memref_slice %arg31[%c1_i32_15] : memref<12x!tpu.dma_semaphore, #tpu.memory_space<semaphore_mem>> -> memref<1x!tpu.dma_semaphore, #tpu.memory_space<semaphore_mem>>
    %43 = tpu.memref_squeeze %42 : memref<1x!tpu.dma_semaphore, #tpu.memory_space<semaphore_mem>> -> memref<!tpu.dma_semaphore, #tpu.memory_space<semaphore_mem>>
    tpu.wait_dma2 semaphore(%43 : memref<!tpu.dma_semaphore, #tpu.memory_space<semaphore_mem>>) src(%arg7 : memref<512x512xi8, #tpu.memory_space<any>>) dst(%arg20 : memref<512x512xi8, #tpu.memory_space<vmem>>)
    %c0_16 = arith.constant 0 : index
    %c0_17 = arith.constant 0 : index
    %44 = vector.load %arg20[%c0_16, %c0_17] : memref<512x512xi8, #tpu.memory_space<vmem>>, vector<512x512xi8>
    %c0_18 = arith.constant 0 : index
    %c512 = arith.constant 512 : index
    %45 = vector.load %arg4[%c0_18, %c512] : memref<1x7552xf32, #tpu.memory_space<vmem>>, vector<1x512xf32>
    %c0_19 = arith.constant 0 : index
    %c1024 = arith.constant 1024 : index
    %46 = vector.load %arg4[%c0_19, %c1024] : memref<1x7552xf32, #tpu.memory_space<vmem>>, vector<1x512xf32>
    %47 = arith.truncf %41 : vector<16x512xf32> to vector<16x512xbf16>
    %48 = arith.sitofp %44 : vector<512x512xi8> to vector<512x512xbf16>
    %cst_20 = arith.constant dense<0.000000e+00> : vector<16x512xf32>
    %49 = tpu.matmul %47, %48, %cst_20 {dimension_numbers = #tpu.dot_dimension_numbers<[1], [0], [0], [1], [0, 0, 1, 1], [], []>} : vector<16x512xbf16>, vector<512x512xbf16>, vector<16x512xf32> -> vector<16x512xf32>
    %50 = vector.broadcast %46 : vector<1x512xf32> to vector<16x512xf32>
    %51 = arith.mulf %49, %50 : vector<16x512xf32>
    %52 = vector.broadcast %45 : vector<1x512xf32> to vector<16x512xf32>
    %53 = arith.addf %51, %52 : vector<16x512xf32>
    %cst_21 = arith.constant 0.000000e+00 : f32
    %54 = vector.broadcast %cst_21 : f32 to vector<16x512xf32>
    %55 = arith.cmpf ogt, %53, %54 : vector<16x512xf32>
    %cst_22 = arith.constant 0.00999999977 : f32
    %56 = vector.broadcast %cst_22 : f32 to vector<16x512xf32>
    %57 = arith.mulf %56, %53 : vector<16x512xf32>
    %58 = arith.select %55, %53, %57 : vector<16x512xi1>, vector<16x512xf32>
    %c2_i32_23 = arith.constant 2 : i32
    %59 = tpu.memref_slice %arg31[%c2_i32_23] : memref<12x!tpu.dma_semaphore, #tpu.memory_space<semaphore_mem>> -> memref<1x!tpu.dma_semaphore, #tpu.memory_space<semaphore_mem>>
    %60 = tpu.memref_squeeze %59 : memref<1x!tpu.dma_semaphore, #tpu.memory_space<semaphore_mem>> -> memref<!tpu.dma_semaphore, #tpu.memory_space<semaphore_mem>>
    tpu.wait_dma2 semaphore(%60 : memref<!tpu.dma_semaphore, #tpu.memory_space<semaphore_mem>>) src(%arg8 : memref<512x256xi8, #tpu.memory_space<any>>) dst(%arg21 : memref<512x256xi8, #tpu.memory_space<vmem>>)
    %c0_24 = arith.constant 0 : index
    %c0_25 = arith.constant 0 : index
    %61 = vector.load %arg21[%c0_24, %c0_25] : memref<512x256xi8, #tpu.memory_space<vmem>>, vector<512x256xi8>
    %c0_26 = arith.constant 0 : index
    %c1536 = arith.constant 1536 : index
    %62 = vector.load %arg4[%c0_26, %c1536] : memref<1x7552xf32, #tpu.memory_space<vmem>>, vector<1x256xf32>
    %c0_27 = arith.constant 0 : index
    %c1792 = arith.constant 1792 : index
    %63 = vector.load %arg4[%c0_27, %c1792] : memref<1x7552xf32, #tpu.memory_space<vmem>>, vector<1x256xf32>
    %64 = arith.truncf %58 : vector<16x512xf32> to vector<16x512xbf16>
    %65 = arith.sitofp %61 : vector<512x256xi8> to vector<512x256xbf16>
    %cst_28 = arith.constant dense<0.000000e+00> : vector<16x256xf32>
    %66 = tpu.matmul %64, %65, %cst_28 {dimension_numbers = #tpu.dot_dimension_numbers<[1], [0], [0], [1], [0, 0, 1, 1], [], []>} : vector<16x512xbf16>, vector<512x256xbf16>, vector<16x256xf32> -> vector<16x256xf32>
    %67 = vector.broadcast %63 : vector<1x256xf32> to vector<16x256xf32>
    %68 = arith.mulf %66, %67 : vector<16x256xf32>
    %69 = vector.broadcast %62 : vector<1x256xf32> to vector<16x256xf32>
    %70 = arith.addf %68, %69 : vector<16x256xf32>
    %cst_29 = arith.constant 0.000000e+00 : f32
    %71 = vector.broadcast %cst_29 : f32 to vector<16x256xf32>
    %72 = arith.cmpf ogt, %70, %71 : vector<16x256xf32>
    %cst_30 = arith.constant 0.00999999977 : f32
    %73 = vector.broadcast %cst_30 : f32 to vector<16x256xf32>
    %74 = arith.mulf %73, %70 : vector<16x256xf32>
    %75 = arith.select %72, %70, %74 : vector<16x256xi1>, vector<16x256xf32>
    %c3_i32_31 = arith.constant 3 : i32
    %76 = tpu.memref_slice %arg31[%c3_i32_31] : memref<12x!tpu.dma_semaphore, #tpu.memory_space<semaphore_mem>> -> memref<1x!tpu.dma_semaphore, #tpu.memory_space<semaphore_mem>>
    %77 = tpu.memref_squeeze %76 : memref<1x!tpu.dma_semaphore, #tpu.memory_space<semaphore_mem>> -> memref<!tpu.dma_semaphore, #tpu.memory_space<semaphore_mem>>
    tpu.wait_dma2 semaphore(%77 : memref<!tpu.dma_semaphore, #tpu.memory_space<semaphore_mem>>) src(%arg9 : memref<256x1xbf16, #tpu.memory_space<any>>) dst(%arg22 : memref<256x1xbf16, #tpu.memory_space<vmem>>)
    %c0_32 = arith.constant 0 : index
    %c0_33 = arith.constant 0 : index
    %78 = vector.load %arg22[%c0_32, %c0_33] : memref<256x1xbf16, #tpu.memory_space<vmem>>, vector<256x1xbf16>
    %c0_34 = arith.constant 0 : index
    %c2048 = arith.constant 2048 : index
    %79 = vector.load %arg4[%c0_34, %c2048] : memref<1x7552xf32, #tpu.memory_space<vmem>>, vector<1x1xf32>
    %80 = arith.truncf %75 : vector<16x256xf32> to vector<16x256xbf16>
    %cst_35 = arith.constant dense<0.000000e+00> : vector<16x1xf32>
    %81 = tpu.matmul %80, %78, %cst_35 {dimension_numbers = #tpu.dot_dimension_numbers<[1], [0], [0], [1], [0, 0, 1, 1], [], []>} : vector<16x256xbf16>, vector<256x1xbf16>, vector<16x1xf32> -> vector<16x1xf32>
    %82 = vector.broadcast %79 : vector<1x1xf32> to vector<16x1xf32>
    %83 = arith.addf %81, %82 : vector<16x1xf32>
    %84 = arith.negf %83 : vector<16x1xf32>
    %85 = math.exp %84 : vector<16x1xf32>
    %cst_36 = arith.constant 1.000000e+00 : f32
    %86 = vector.broadcast %cst_36 : f32 to vector<16x1xf32>
    %87 = arith.addf %86, %85 : vector<16x1xf32>
    %88 = arith.divf %86, %87 : vector<16x1xf32>
    %c0_37 = arith.constant 0 : index
    %c0_38 = arith.constant 0 : index
    %89 = vector.load %arg1[%c0_37, %c0_38] : memref<16x8xf32, #tpu.memory_space<vmem>>, vector<16x8xf32>
    %90 = arith.mulf %89, %89 : vector<16x8xf32>
    %cst_39 = arith.constant dense<0.000000e+00> : vector<16xf32>
    %91 = vector.multi_reduction <add>, %90, %cst_39 [1] : vector<16x8xf32> to vector<16xf32>
    %92 = vector.shape_cast %91 : vector<16xf32> to vector<16x1xf32>
    %93 = math.rsqrt %92 : vector<16x1xf32>
    %94 = vector.broadcast %93 : vector<16x1xf32> to vector<16x8xf32>
    %95 = arith.mulf %89, %94 : vector<16x8xf32>
    %96 = arith.truncf %95 : vector<16x8xf32> to vector<16x8xbf16>
    %97 = vector.extract_strided_slice %96 {offsets = [8, 0], sizes = [8, 8], strides = [1, 1]} : vector<16x8xbf16> to vector<8x8xbf16>
    %cst_40 = arith.constant dense<0.000000e+00> : vector<16x8xf32>
    %98 = tpu.matmul %96, %97, %cst_40 {dimension_numbers = #tpu.dot_dimension_numbers<[1], [1], [0], [0], [0, 0, 1, 0], [], []>} : vector<16x8xbf16>, vector<8x8xbf16>, vector<16x8xf32> -> vector<16x8xf32>
    %c4_i32_41 = arith.constant 4 : i32
    %99 = tpu.memref_slice %arg31[%c4_i32_41] : memref<12x!tpu.dma_semaphore, #tpu.memory_space<semaphore_mem>> -> memref<1x!tpu.dma_semaphore, #tpu.memory_space<semaphore_mem>>
    %100 = tpu.memref_squeeze %99 : memref<1x!tpu.dma_semaphore, #tpu.memory_space<semaphore_mem>> -> memref<!tpu.dma_semaphore, #tpu.memory_space<semaphore_mem>>
    tpu.wait_dma2 semaphore(%100 : memref<!tpu.dma_semaphore, #tpu.memory_space<semaphore_mem>>) src(%arg10 : memref<8x512xbf16, #tpu.memory_space<any>>) dst(%arg23 : memref<8x512xbf16, #tpu.memory_space<vmem>>)
    %c0_42 = arith.constant 0 : index
    %c0_43 = arith.constant 0 : index
    %101 = vector.load %arg23[%c0_42, %c0_43] : memref<8x512xbf16, #tpu.memory_space<vmem>>, vector<8x512xbf16>
    %c0_44 = arith.constant 0 : index
    %c2176 = arith.constant 2176 : index
    %102 = vector.load %arg4[%c0_44, %c2176] : memref<1x7552xf32, #tpu.memory_space<vmem>>, vector<1x512xf32>
    %103 = arith.truncf %98 : vector<16x8xf32> to vector<16x8xbf16>
    %cst_45 = arith.constant dense<0.000000e+00> : vector<16x512xf32>
    %104 = tpu.matmul %103, %101, %cst_45 {dimension_numbers = #tpu.dot_dimension_numbers<[1], [0], [0], [1], [0, 0, 1, 1], [], []>} : vector<16x8xbf16>, vector<8x512xbf16>, vector<16x512xf32> -> vector<16x512xf32>
    %105 = vector.broadcast %102 : vector<1x512xf32> to vector<16x512xf32>
    %106 = arith.addf %104, %105 : vector<16x512xf32>
    %cst_46 = arith.constant 0.000000e+00 : f32
    %107 = vector.broadcast %cst_46 : f32 to vector<16x512xf32>
    %108 = arith.cmpf ogt, %106, %107 : vector<16x512xf32>
    %cst_47 = arith.constant 0.00999999977 : f32
    %109 = vector.broadcast %cst_47 : f32 to vector<16x512xf32>
    %110 = arith.mulf %109, %106 : vector<16x512xf32>
    %111 = arith.select %108, %106, %110 : vector<16x512xi1>, vector<16x512xf32>
    %c5_i32_48 = arith.constant 5 : i32
    %112 = tpu.memref_slice %arg31[%c5_i32_48] : memref<12x!tpu.dma_semaphore, #tpu.memory_space<semaphore_mem>> -> memref<1x!tpu.dma_semaphore, #tpu.memory_space<semaphore_mem>>
    %113 = tpu.memref_squeeze %112 : memref<1x!tpu.dma_semaphore, #tpu.memory_space<semaphore_mem>> -> memref<!tpu.dma_semaphore, #tpu.memory_space<semaphore_mem>>
    tpu.wait_dma2 semaphore(%113 : memref<!tpu.dma_semaphore, #tpu.memory_space<semaphore_mem>>) src(%arg11 : memref<512x512xi8, #tpu.memory_space<any>>) dst(%arg24 : memref<512x512xi8, #tpu.memory_space<vmem>>)
    %c0_49 = arith.constant 0 : index
    %c0_50 = arith.constant 0 : index
    %114 = vector.load %arg24[%c0_49, %c0_50] : memref<512x512xi8, #tpu.memory_space<vmem>>, vector<512x512xi8>
    %c0_51 = arith.constant 0 : index
    %c2688 = arith.constant 2688 : index
    %115 = vector.load %arg4[%c0_51, %c2688] : memref<1x7552xf32, #tpu.memory_space<vmem>>, vector<1x512xf32>
    %c0_52 = arith.constant 0 : index
    %c3200 = arith.constant 3200 : index
    %116 = vector.load %arg4[%c0_52, %c3200] : memref<1x7552xf32, #tpu.memory_space<vmem>>, vector<1x512xf32>
    %117 = arith.truncf %111 : vector<16x512xf32> to vector<16x512xbf16>
    %118 = arith.sitofp %114 : vector<512x512xi8> to vector<512x512xbf16>
    %cst_53 = arith.constant dense<0.000000e+00> : vector<16x512xf32>
    %119 = tpu.matmul %117, %118, %cst_53 {dimension_numbers = #tpu.dot_dimension_numbers<[1], [0], [0], [1], [0, 0, 1, 1], [], []>} : vector<16x512xbf16>, vector<512x512xbf16>, vector<16x512xf32> -> vector<16x512xf32>
    %120 = vector.broadcast %116 : vector<1x512xf32> to vector<16x512xf32>
    %121 = arith.mulf %119, %120 : vector<16x512xf32>
    %122 = vector.broadcast %115 : vector<1x512xf32> to vector<16x512xf32>
    %123 = arith.addf %121, %122 : vector<16x512xf32>
    %cst_54 = arith.constant 0.000000e+00 : f32
    %124 = vector.broadcast %cst_54 : f32 to vector<16x512xf32>
    %125 = arith.cmpf ogt, %123, %124 : vector<16x512xf32>
    %cst_55 = arith.constant 0.00999999977 : f32
    %126 = vector.broadcast %cst_55 : f32 to vector<16x512xf32>
    %127 = arith.mulf %126, %123 : vector<16x512xf32>
    %128 = arith.select %125, %123, %127 : vector<16x512xi1>, vector<16x512xf32>
    %c6_i32_56 = arith.constant 6 : i32
    %129 = tpu.memref_slice %arg31[%c6_i32_56] : memref<12x!tpu.dma_semaphore, #tpu.memory_space<semaphore_mem>> -> memref<1x!tpu.dma_semaphore, #tpu.memory_space<semaphore_mem>>
    %130 = tpu.memref_squeeze %129 : memref<1x!tpu.dma_semaphore, #tpu.memory_space<semaphore_mem>> -> memref<!tpu.dma_semaphore, #tpu.memory_space<semaphore_mem>>
    tpu.wait_dma2 semaphore(%130 : memref<!tpu.dma_semaphore, #tpu.memory_space<semaphore_mem>>) src(%arg12 : memref<512x512xi8, #tpu.memory_space<any>>) dst(%arg25 : memref<512x512xi8, #tpu.memory_space<vmem>>)
    %c0_57 = arith.constant 0 : index
    %c0_58 = arith.constant 0 : index
    %131 = vector.load %arg25[%c0_57, %c0_58] : memref<512x512xi8, #tpu.memory_space<vmem>>, vector<512x512xi8>
    %c0_59 = arith.constant 0 : index
    %c3712 = arith.constant 3712 : index
    %132 = vector.load %arg4[%c0_59, %c3712] : memref<1x7552xf32, #tpu.memory_space<vmem>>, vector<1x512xf32>
    %c0_60 = arith.constant 0 : index
    %c4224 = arith.constant 4224 : index
    %133 = vector.load %arg4[%c0_60, %c4224] : memref<1x7552xf32, #tpu.memory_space<vmem>>, vector<1x512xf32>
    %134 = arith.truncf %128 : vector<16x512xf32> to vector<16x512xbf16>
    %135 = arith.sitofp %131 : vector<512x512xi8> to vector<512x512xbf16>
    %cst_61 = arith.constant dense<0.000000e+00> : vector<16x512xf32>
    %136 = tpu.matmul %134, %135, %cst_61 {dimension_numbers = #tpu.dot_dimension_numbers<[1], [0], [0], [1], [0, 0, 1, 1], [], []>} : vector<16x512xbf16>, vector<512x512xbf16>, vector<16x512xf32> -> vector<16x512xf32>
    %137 = vector.broadcast %133 : vector<1x512xf32> to vector<16x512xf32>
    %138 = arith.mulf %136, %137 : vector<16x512xf32>
    %139 = vector.broadcast %132 : vector<1x512xf32> to vector<16x512xf32>
    %140 = arith.addf %138, %139 : vector<16x512xf32>
    %cst_62 = arith.constant 0.000000e+00 : f32
    %141 = vector.broadcast %cst_62 : f32 to vector<16x512xf32>
    %142 = arith.cmpf ogt, %140, %141 : vector<16x512xf32>
    %cst_63 = arith.constant 0.00999999977 : f32
    %143 = vector.broadcast %cst_63 : f32 to vector<16x512xf32>
    %144 = arith.mulf %143, %140 : vector<16x512xf32>
    %145 = arith.select %142, %140, %144 : vector<16x512xi1>, vector<16x512xf32>
    %c7_i32_64 = arith.constant 7 : i32
    %146 = tpu.memref_slice %arg31[%c7_i32_64] : memref<12x!tpu.dma_semaphore, #tpu.memory_space<semaphore_mem>> -> memref<1x!tpu.dma_semaphore, #tpu.memory_space<semaphore_mem>>
    %147 = tpu.memref_squeeze %146 : memref<1x!tpu.dma_semaphore, #tpu.memory_space<semaphore_mem>> -> memref<!tpu.dma_semaphore, #tpu.memory_space<semaphore_mem>>
    tpu.wait_dma2 semaphore(%147 : memref<!tpu.dma_semaphore, #tpu.memory_space<semaphore_mem>>) src(%arg13 : memref<512x8xbf16, #tpu.memory_space<any>>) dst(%arg26 : memref<512x8xbf16, #tpu.memory_space<vmem>>)
    %c0_65 = arith.constant 0 : index
    %c0_66 = arith.constant 0 : index
    %148 = vector.load %arg26[%c0_65, %c0_66] : memref<512x8xbf16, #tpu.memory_space<vmem>>, vector<512x8xbf16>
    %c0_67 = arith.constant 0 : index
    %c4736 = arith.constant 4736 : index
    %149 = vector.load %arg4[%c0_67, %c4736] : memref<1x7552xf32, #tpu.memory_space<vmem>>, vector<1x8xf32>
    %150 = arith.truncf %145 : vector<16x512xf32> to vector<16x512xbf16>
    %cst_68 = arith.constant dense<0.000000e+00> : vector<16x8xf32>
    %151 = tpu.matmul %150, %148, %cst_68 {dimension_numbers = #tpu.dot_dimension_numbers<[1], [0], [0], [1], [0, 0, 1, 1], [], []>} : vector<16x512xbf16>, vector<512x8xbf16>, vector<16x8xf32> -> vector<16x8xf32>
    %152 = vector.broadcast %149 : vector<1x8xf32> to vector<16x8xf32>
    %153 = arith.addf %151, %152 : vector<16x8xf32>
    %154 = math.tanh %153 : vector<16x8xf32>
    %155 = arith.mulf %24, %25 : vector<8x8xf32>
    %156 = arith.mulf %154, %98 : vector<16x8xf32>
    %157 = vector.extract_strided_slice %156 {offsets = [0, 0], sizes = [8, 8], strides = [1, 1]} : vector<16x8xf32> to vector<8x8xf32>
    %158 = arith.mulf %157, %155 : vector<8x8xf32>
    %cst_69 = arith.constant dense<0.000000e+00> : vector<8xf32>
    %159 = vector.multi_reduction <add>, %158, %cst_69 [1] : vector<8x8xf32> to vector<8xf32>
    %160 = vector.shape_cast %159 : vector<8xf32> to vector<8x1xf32>
    %161 = vector.extract_strided_slice %156 {offsets = [8, 0], sizes = [8, 8], strides = [1, 1]} : vector<16x8xf32> to vector<8x8xf32>
    %162 = arith.mulf %161, %155 : vector<8x8xf32>
    %cst_70 = arith.constant dense<0.000000e+00> : vector<8xf32>
    %163 = vector.multi_reduction <add>, %162, %cst_70 [1] : vector<8x8xf32> to vector<8xf32>
    %164 = vector.shape_cast %163 : vector<8xf32> to vector<8x1xf32>
    %165 = vector.extract_strided_slice %88 {offsets = [8, 0], sizes = [8, 1], strides = [1, 1]} : vector<16x1xf32> to vector<8x1xf32>
    %166 = arith.addf %165, %164 : vector<8x1xf32>
    %167 = vector.extract_strided_slice %98 {offsets = [0, 0], sizes = [8, 8], strides = [1, 1]} : vector<16x8xf32> to vector<8x8xf32>
    %c8_i32_71 = arith.constant 8 : i32
    %168 = tpu.memref_slice %arg31[%c8_i32_71] : memref<12x!tpu.dma_semaphore, #tpu.memory_space<semaphore_mem>> -> memref<1x!tpu.dma_semaphore, #tpu.memory_space<semaphore_mem>>
    %169 = tpu.memref_squeeze %168 : memref<1x!tpu.dma_semaphore, #tpu.memory_space<semaphore_mem>> -> memref<!tpu.dma_semaphore, #tpu.memory_space<semaphore_mem>>
    tpu.wait_dma2 semaphore(%169 : memref<!tpu.dma_semaphore, #tpu.memory_space<semaphore_mem>>) src(%arg14 : memref<8x512xbf16, #tpu.memory_space<any>>) dst(%arg27 : memref<8x512xbf16, #tpu.memory_space<vmem>>)
    %c0_72 = arith.constant 0 : index
    %c0_73 = arith.constant 0 : index
    %170 = vector.load %arg27[%c0_72, %c0_73] : memref<8x512xbf16, #tpu.memory_space<vmem>>, vector<8x512xbf16>
    %c0_74 = arith.constant 0 : index
    %c4864 = arith.constant 4864 : index
    %171 = vector.load %arg4[%c0_74, %c4864] : memref<1x7552xf32, #tpu.memory_space<vmem>>, vector<1x512xf32>
    %172 = arith.truncf %167 : vector<8x8xf32> to vector<8x8xbf16>
    %cst_75 = arith.constant dense<0.000000e+00> : vector<8x512xf32>
    %173 = tpu.matmul %172, %170, %cst_75 {dimension_numbers = #tpu.dot_dimension_numbers<[1], [0], [0], [1], [0, 0, 1, 1], [], []>} : vector<8x8xbf16>, vector<8x512xbf16>, vector<8x512xf32> -> vector<8x512xf32>
    %174 = vector.broadcast %171 : vector<1x512xf32> to vector<8x512xf32>
    %175 = arith.addf %173, %174 : vector<8x512xf32>
    %cst_76 = arith.constant 0.000000e+00 : f32
    %176 = vector.broadcast %cst_76 : f32 to vector<8x512xf32>
    %177 = arith.cmpf ogt, %175, %176 : vector<8x512xf32>
    %cst_77 = arith.constant 0.00999999977 : f32
    %178 = vector.broadcast %cst_77 : f32 to vector<8x512xf32>
    %179 = arith.mulf %178, %175 : vector<8x512xf32>
    %180 = arith.select %177, %175, %179 : vector<8x512xi1>, vector<8x512xf32>
    %c9_i32_78 = arith.constant 9 : i32
    %181 = tpu.memref_slice %arg31[%c9_i32_78] : memref<12x!tpu.dma_semaphore, #tpu.memory_space<semaphore_mem>> -> memref<1x!tpu.dma_semaphore, #tpu.memory_space<semaphore_mem>>
    %182 = tpu.memref_squeeze %181 : memref<1x!tpu.dma_semaphore, #tpu.memory_space<semaphore_mem>> -> memref<!tpu.dma_semaphore, #tpu.memory_space<semaphore_mem>>
    tpu.wait_dma2 semaphore(%182 : memref<!tpu.dma_semaphore, #tpu.memory_space<semaphore_mem>>) src(%arg15 : memref<512x512xi8, #tpu.memory_space<any>>) dst(%arg28 : memref<512x512xi8, #tpu.memory_space<vmem>>)
    %c0_79 = arith.constant 0 : index
    %c0_80 = arith.constant 0 : index
    %183 = vector.load %arg28[%c0_79, %c0_80] : memref<512x512xi8, #tpu.memory_space<vmem>>, vector<512x512xi8>
    %c0_81 = arith.constant 0 : index
    %c5376 = arith.constant 5376 : index
    %184 = vector.load %arg4[%c0_81, %c5376] : memref<1x7552xf32, #tpu.memory_space<vmem>>, vector<1x512xf32>
    %c0_82 = arith.constant 0 : index
    %c5888 = arith.constant 5888 : index
    %185 = vector.load %arg4[%c0_82, %c5888] : memref<1x7552xf32, #tpu.memory_space<vmem>>, vector<1x512xf32>
    %186 = arith.truncf %180 : vector<8x512xf32> to vector<8x512xbf16>
    %187 = arith.sitofp %183 : vector<512x512xi8> to vector<512x512xbf16>
    %cst_83 = arith.constant dense<0.000000e+00> : vector<8x512xf32>
    %188 = tpu.matmul %186, %187, %cst_83 {dimension_numbers = #tpu.dot_dimension_numbers<[1], [0], [0], [1], [0, 0, 1, 1], [], []>} : vector<8x512xbf16>, vector<512x512xbf16>, vector<8x512xf32> -> vector<8x512xf32>
    %189 = vector.broadcast %185 : vector<1x512xf32> to vector<8x512xf32>
    %190 = arith.mulf %188, %189 : vector<8x512xf32>
    %191 = vector.broadcast %184 : vector<1x512xf32> to vector<8x512xf32>
    %192 = arith.addf %190, %191 : vector<8x512xf32>
    %cst_84 = arith.constant 0.000000e+00 : f32
    %193 = vector.broadcast %cst_84 : f32 to vector<8x512xf32>
    %194 = arith.cmpf ogt, %192, %193 : vector<8x512xf32>
    %cst_85 = arith.constant 0.00999999977 : f32
    %195 = vector.broadcast %cst_85 : f32 to vector<8x512xf32>
    %196 = arith.mulf %195, %192 : vector<8x512xf32>
    %197 = arith.select %194, %192, %196 : vector<8x512xi1>, vector<8x512xf32>
    %c10_i32_86 = arith.constant 10 : i32
    %198 = tpu.memref_slice %arg31[%c10_i32_86] : memref<12x!tpu.dma_semaphore, #tpu.memory_space<semaphore_mem>> -> memref<1x!tpu.dma_semaphore, #tpu.memory_space<semaphore_mem>>
    %199 = tpu.memref_squeeze %198 : memref<1x!tpu.dma_semaphore, #tpu.memory_space<semaphore_mem>> -> memref<!tpu.dma_semaphore, #tpu.memory_space<semaphore_mem>>
    tpu.wait_dma2 semaphore(%199 : memref<!tpu.dma_semaphore, #tpu.memory_space<semaphore_mem>>) src(%arg16 : memref<512x512xi8, #tpu.memory_space<any>>) dst(%arg29 : memref<512x512xi8, #tpu.memory_space<vmem>>)
    %c0_87 = arith.constant 0 : index
    %c0_88 = arith.constant 0 : index
    %200 = vector.load %arg29[%c0_87, %c0_88] : memref<512x512xi8, #tpu.memory_space<vmem>>, vector<512x512xi8>
    %c0_89 = arith.constant 0 : index
    %c6400 = arith.constant 6400 : index
    %201 = vector.load %arg4[%c0_89, %c6400] : memref<1x7552xf32, #tpu.memory_space<vmem>>, vector<1x512xf32>
    %c0_90 = arith.constant 0 : index
    %c6912 = arith.constant 6912 : index
    %202 = vector.load %arg4[%c0_90, %c6912] : memref<1x7552xf32, #tpu.memory_space<vmem>>, vector<1x512xf32>
    %203 = arith.truncf %197 : vector<8x512xf32> to vector<8x512xbf16>
    %204 = arith.sitofp %200 : vector<512x512xi8> to vector<512x512xbf16>
    %cst_91 = arith.constant dense<0.000000e+00> : vector<8x512xf32>
    %205 = tpu.matmul %203, %204, %cst_91 {dimension_numbers = #tpu.dot_dimension_numbers<[1], [0], [0], [1], [0, 0, 1, 1], [], []>} : vector<8x512xbf16>, vector<512x512xbf16>, vector<8x512xf32> -> vector<8x512xf32>
    %206 = vector.broadcast %202 : vector<1x512xf32> to vector<8x512xf32>
    %207 = arith.mulf %205, %206 : vector<8x512xf32>
    %208 = vector.broadcast %201 : vector<1x512xf32> to vector<8x512xf32>
    %209 = arith.addf %207, %208 : vector<8x512xf32>
    %cst_92 = arith.constant 0.000000e+00 : f32
    %210 = vector.broadcast %cst_92 : f32 to vector<8x512xf32>
    %211 = arith.cmpf ogt, %209, %210 : vector<8x512xf32>
    %cst_93 = arith.constant 0.00999999977 : f32
    %212 = vector.broadcast %cst_93 : f32 to vector<8x512xf32>
    %213 = arith.mulf %212, %209 : vector<8x512xf32>
    %214 = arith.select %211, %209, %213 : vector<8x512xi1>, vector<8x512xf32>
    %c11_i32_94 = arith.constant 11 : i32
    %215 = tpu.memref_slice %arg31[%c11_i32_94] : memref<12x!tpu.dma_semaphore, #tpu.memory_space<semaphore_mem>> -> memref<1x!tpu.dma_semaphore, #tpu.memory_space<semaphore_mem>>
    %216 = tpu.memref_squeeze %215 : memref<1x!tpu.dma_semaphore, #tpu.memory_space<semaphore_mem>> -> memref<!tpu.dma_semaphore, #tpu.memory_space<semaphore_mem>>
    tpu.wait_dma2 semaphore(%216 : memref<!tpu.dma_semaphore, #tpu.memory_space<semaphore_mem>>) src(%arg17 : memref<512x8xbf16, #tpu.memory_space<any>>) dst(%arg30 : memref<512x8xbf16, #tpu.memory_space<vmem>>)
    %c0_95 = arith.constant 0 : index
    %c0_96 = arith.constant 0 : index
    %217 = vector.load %arg30[%c0_95, %c0_96] : memref<512x8xbf16, #tpu.memory_space<vmem>>, vector<512x8xbf16>
    %c0_97 = arith.constant 0 : index
    %c7424 = arith.constant 7424 : index
    %218 = vector.load %arg4[%c0_97, %c7424] : memref<1x7552xf32, #tpu.memory_space<vmem>>, vector<1x8xf32>
    %219 = arith.truncf %214 : vector<8x512xf32> to vector<8x512xbf16>
    %cst_98 = arith.constant dense<0.000000e+00> : vector<8x8xf32>
    %220 = tpu.matmul %219, %217, %cst_98 {dimension_numbers = #tpu.dot_dimension_numbers<[1], [0], [0], [1], [0, 0, 1, 1], [], []>} : vector<8x512xbf16>, vector<512x8xbf16>, vector<8x8xf32> -> vector<8x8xf32>
    %221 = vector.broadcast %218 : vector<1x8xf32> to vector<8x8xf32>
    %222 = arith.addf %220, %221 : vector<8x8xf32>
    %223 = arith.negf %222 : vector<8x8xf32>
    %224 = math.exp %223 : vector<8x8xf32>
    %cst_99 = arith.constant 1.000000e+00 : f32
    %225 = vector.broadcast %cst_99 : f32 to vector<8x8xf32>
    %226 = arith.addf %225, %224 : vector<8x8xf32>
    %227 = arith.divf %225, %226 : vector<8x8xf32>
    %228 = arith.mulf %227, %24 : vector<8x8xf32>
    %229 = arith.mulf %228, %167 : vector<8x8xf32>
    %230 = vector.broadcast %27 : f32 to vector<8x8xf32>
    %231 = arith.mulf %229, %230 : vector<8x8xf32>
    %cst_100 = arith.constant dense<0.000000e+00> : vector<8x1xf32>
    %232 = tpu.matmul %231, %166, %cst_100 {dimension_numbers = #tpu.dot_dimension_numbers<[1], [0], [0], [1], [0, 0, 1, 1], [], []>} : vector<8x8xf32>, vector<8x1xf32>, vector<8x1xf32> -> vector<8x1xf32>
    %233 = vector.extract_strided_slice %88 {offsets = [0, 0], sizes = [8, 1], strides = [1, 1]} : vector<16x1xf32> to vector<8x1xf32>
    %234 = arith.addf %233, %160 : vector<8x1xf32>
    %235 = arith.addf %234, %232 : vector<8x1xf32>
    %c0_101 = arith.constant 0 : index
    %c0_102 = arith.constant 0 : index
    %236 = vector.load %arg18[%c0_101, %c0_102] : memref<8x1xf32, #tpu.memory_space<vmem>>, vector<8x1xf32>
    tpu.vector_store %arg18[%c0_101, %c0_102], %235 {strides = array<i32>} : memref<8x1xf32, #tpu.memory_space<vmem>>, vector<8x1xf32>,
    return
  }
}

</mosaic_0001>

<bundles_post_ra>
// kernel: tpu_custom_call.1
= control target key start
LH: loop header
LB: loop body
LE: loop exit
PB: predicated region body
PF: predicated region fallthrough
CT: control target
= control target key end

     0   :  { %s6551_s0 = inlined_call_operand.vmem [shape: f32[16,16], index: 0, kind: input, shape index: {}]   ;;  %s6552_s1 = inlined_call_operand.vmem [shape: f32[16,8], index: 1, kind: input, shape index: {}]   ;;  %s6553_s2 = inlined_call_operand.vmem [shape: f32[8,8], index: 2, kind: input, shape index: {}]   ;;  %s6554_s3 = inlined_call_operand.vmem [shape: f32[8,8], index: 3, kind: input, shape index: {}]   ;;  %s6555_s4 = inlined_call_operand.vmem [shape: f32[1,7552], index: 4, kind: input, shape index: {}]   ;;  %s6556_s5 = inlined_call_operand.<no memory space> [shape: f32[1,1], index: 5, kind: input, shape index: {}]   ;;  %s6557_s6 = inlined_call_operand.vmem [shape: bf16[16,512], index: 6, kind: input, shape index: {}]   ;;  %s6558_s7 = inlined_call_operand.vmem [shape: s8[512,512], index: 7, kind: input, shape index: {}]   ;;  %s6559_s8 = inlined_call_operand.hbm [shape: s8[512,256], index: 8, kind: input, shape index: {}]   ;;  %s6560_s9 = inlined_call_operand.vmem [shape: bf16[256,1], index: 9, kind: input, shape index: {}]   ;;  %s6561_s10 = inlined_call_operand.vmem [shape: bf16[8,512], index: 10, kind: input, shape index: {}]   ;;  %s6562_s11 = inlined_call_operand.hbm [shape: s8[512,512], index: 11, kind: input, shape index: {}]   ;;  %s6563_s12 = inlined_call_operand.hbm [shape: s8[512,512], index: 12, kind: input, shape index: {}]   ;;  %s6564_s13 = inlined_call_operand.vmem [shape: bf16[512,8], index: 13, kind: input, shape index: {}]   ;;  %s6565_s14 = inlined_call_operand.vmem [shape: bf16[8,512], index: 14, kind: input, shape index: {}]   ;;  %s6566_s15 = inlined_call_operand.hbm [shape: s8[512,512], index: 15, kind: input, shape index: {}]   ;;  %s6567_s16 = inlined_call_operand.hbm [shape: s8[512,512], index: 16, kind: input, shape index: {}]   ;;  %s6568_s17 = inlined_call_operand.vmem [shape: bf16[512,8], index: 17, kind: input, shape index: {}]   ;;  %s6569_s18 = inlined_call_operand.vmem [shape: f32[8,1], index: 18, kind: output, shape index: {}]  }
   0x1   :  { %6614 = sst [smem:[#allocation84_spill]] %s6551_s0  ;;  %v5417_v0 = vld [vmem:[%s6557_s6] sm:$0xff]  ;;  %v5422_v1 = vld [vmem:[%s6557_s6 + $0x8] sm:$0xff]  ;;  %v5427_v2 = vld [vmem:[%s6557_s6 + $0x10] sm:$0xff] }
   0x2   :  { %6615 = sst [smem:[#allocation85_spill]] %s6552_s1  ;;  %v5432_v3 = vld [vmem:[%s6557_s6 + $0x18] sm:$0xff] }
   0x3   :  { %6616 = sst [smem:[#allocation86_spill]] %s6553_s2 }
   0x4   :  { %85 = vsyncadd [#allocation14], 512  ;;  %v5437_v4 = vld [vmem:[%s6558_s7] sm:$0xff]  ;;  %v5442_v5 = vld [vmem:[%s6558_s7 + $0x8] sm:$0xff] }
   0x5   :  { %v5447_v6 = vld [vmem:[%s6558_s7 + $0x10] sm:$0xff]  ;;  %v5452_v7 = vld [vmem:[%s6558_s7 + $0x18] sm:$0xff]  ;;  %v5457_v8 = vld [vmem:[%s6558_s7 + $0x20] sm:$0xff] }
   0x6   :  { %6617 = vst [vmem:[#allocation47_spill] sm:$0xff] %v5447_v6  ;;  %6618 = vst [vmem:[#allocation48_spill] sm:$0xff] %v5452_v7  ;;  %v5462_v9 = vld [vmem:[%s6558_s7 + $0x28] sm:$0xff]  ;;  %v5467_v10 = vld [vmem:[%s6558_s7 + $0x30] sm:$0xff] }
   0x7   :  { %6619 = vst [vmem:[#allocation49_spill] sm:$0xff] %v5467_v10  ;;  %v5472_v11 = vld [vmem:[%s6558_s7 + $0x38] sm:$0xff]  ;;  %v5477_v12 = vld [vmem:[%s6558_s7 + $0x40] sm:$0xff]  ;;  %v5482_v13 = vld [vmem:[%s6558_s7 + $0x48] sm:$0xff] }
   0x8   :  { %6620 = vst [vmem:[#allocation50_spill] sm:$0xff] %v5472_v11  ;;  %v5487_v14 = vld [vmem:[%s6558_s7 + $0x50] sm:$0xff]  ;;  %v5492_v15 = vld [vmem:[%s6558_s7 + $0x58] sm:$0xff]  ;;  %v5497_v16 = vld [vmem:[%s6558_s7 + $0x60] sm:$0xff] }
   0x9   :  { %6621 = vst [vmem:[#allocation51_spill] sm:$0xff] %v5487_v14  ;;  %v5502_v17 = vld [vmem:[%s6558_s7 + $0x68] sm:$0xff]  ;;  %v5507_v18 = vld [vmem:[%s6558_s7 + $0x70] sm:$0xff]  ;;  %v5512_v19 = vld [vmem:[%s6558_s7 + $0x78] sm:$0xff] }
   0xa   :  { %v5517_v20 = vld [vmem:[%s6558_s7 + $0x80] sm:$0xff]  ;;  %v5522_v21 = vld [vmem:[%s6558_s7 + $0x88] sm:$0xff]  ;;  %v5527_v22 = vld [vmem:[%s6558_s7 + $0x90] sm:$0xff] }
   0xb   :  { %6622 = vst [vmem:[#allocation52_spill] sm:$0xff] %v5527_v22  ;;  %v5532_v23 = vld [vmem:[%s6558_s7 + $0x98] sm:$0xff]  ;;  %v5537_v24 = vld [vmem:[%s6558_s7 + $0xa0] sm:$0xff]  ;;  %v5542_v25 = vld [vmem:[%s6558_s7 + $0xa8] sm:$0xff] }
   0xc   :  { %6623 = vst [vmem:[#allocation53_spill] sm:$0xff] %v5532_v23  ;;  %v5547_v26 = vld [vmem:[%s6558_s7 + $0xb0] sm:$0xff]  ;;  %v5552_v27 = vld [vmem:[%s6558_s7 + $0xb8] sm:$0xff]  ;;  %v5557_v28 = vld [vmem:[%s6558_s7 + $0xc0] sm:$0xff] }
   0xd   :  { %6624 = vst [vmem:[#allocation54_spill] sm:$0xff] %v5547_v26  ;;  %6625 = vst [vmem:[#allocation55_spill] sm:$0xff] %v5552_v27  ;;  %v5562_v29 = vld [vmem:[%s6558_s7 + $0xc8] sm:$0xff]  ;;  %v5567_v30 = vld [vmem:[%s6558_s7 + $0xd0] sm:$0xff] }
   0xe   :  { %6626 = vst [vmem:[#allocation56_spill] sm:$0xff] %v5567_v30  ;;  %v5572_v31 = vld [vmem:[%s6558_s7 + $0xd8] sm:$0xff]  ;;  %v5577_v32 = vld [vmem:[%s6558_s7 + $0xe0] sm:$0xff]  ;;  %v5582_v33 = vld [vmem:[%s6558_s7 + $0xe8] sm:$0xff] }
   0xf   :  { %6627 = vst [vmem:[#allocation57_spill] sm:$0xff] %v5572_v31  ;;  %v5587_v34 = vld [vmem:[%s6558_s7 + $0xf0] sm:$0xff]  ;;  %v5592_v35 = vld [vmem:[%s6558_s7 + $0xf8] sm:$0xff]  ;;  %v5597_v36 = vld [vmem:[%s6558_s7 + $0x100] sm:$0xff] }
  0x10   :  { %6628 = vst [vmem:[#allocation58_spill] sm:$0xff] %v5587_v34  ;;  %6629 = vst [vmem:[#allocation59_spill] sm:$0xff] %v5592_v35  ;;  %v5602_v37 = vld [vmem:[%s6558_s7 + $0x108] sm:$0xff]  ;;  %v5607_v38 = vld [vmem:[%s6558_s7 + $0x110] sm:$0xff] }
  0x11   :  { %6630 = vst [vmem:[#allocation60_spill] sm:$0xff] %v5607_v38  ;;  %v5612_v39 = vld [vmem:[%s6558_s7 + $0x118] sm:$0xff]  ;;  %v5617_v40 = vld [vmem:[%s6558_s7 + $0x120] sm:$0xff]  ;;  %v5622_v41 = vld [vmem:[%s6558_s7 + $0x128] sm:$0xff] }
  0x12   :  { %6631 = vst [vmem:[#allocation61_spill] sm:$0xff] %v5612_v39  ;;  %v5627_v42 = vld [vmem:[%s6558_s7 + $0x130] sm:$0xff]  ;;  %v5632_v43 = vld [vmem:[%s6558_s7 + $0x138] sm:$0xff]  ;;  %v5637_v44 = vld [vmem:[%s6558_s7 + $0x140] sm:$0xff] }
  0x13   :  { %6632 = vst [vmem:[#allocation62_spill] sm:$0xff] %v5627_v42  ;;  %6633 = vst [vmem:[#allocation63_spill] sm:$0xff] %v5632_v43  ;;  %v5642_v45 = vld [vmem:[%s6558_s7 + $0x148] sm:$0xff]  ;;  %v5647_v46 = vld [vmem:[%s6558_s7 + $0x150] sm:$0xff] }
  0x14   :  { %6634 = vst [vmem:[#allocation64_spill] sm:$0xff] %v5647_v46  ;;  %v5652_v47 = vld [vmem:[%s6558_s7 + $0x158] sm:$0xff]  ;;  %v5657_v48 = vld [vmem:[%s6558_s7 + $0x160] sm:$0xff]  ;;  %v5662_v49 = vld [vmem:[%s6558_s7 + $0x168] sm:$0xff] }
  0x15   :  { %6635 = vst [vmem:[#allocation65_spill] sm:$0xff] %v5652_v47  ;;  %v5667_v50 = vld [vmem:[%s6558_s7 + $0x170] sm:$0xff]  ;;  %v5672_v51 = vld [vmem:[%s6558_s7 + $0x178] sm:$0xff]  ;;  %v5677_v52 = vld [vmem:[%s6558_s7 + $0x180] sm:$0xff] }
  0x16   :  { %v5682_v53 = vld [vmem:[%s6558_s7 + $0x188] sm:$0xff]  ;;  %v5687_v54 = vld [vmem:[%s6558_s7 + $0x190] sm:$0xff]  ;;  %v5692_v55 = vld [vmem:[%s6558_s7 + $0x198] sm:$0xff] }
  0x17   :  { %6636 = vst [vmem:[#allocation66_spill] sm:$0xff] %v5687_v54  ;;  %6637 = vst [vmem:[#allocation67_spill] sm:$0xff] %v5692_v55  ;;  %v5697_v56 = vld [vmem:[%s6558_s7 + $0x1a0] sm:$0xff]  ;;  %v5702_v57 = vld [vmem:[%s6558_s7 + $0x1a8] sm:$0xff] }
  0x18   :  { %v5707_v58 = vld [vmem:[%s6558_s7 + $0x1b0] sm:$0xff]  ;;  %v5712_v59 = vld [vmem:[%s6558_s7 + $0x1b8] sm:$0xff]  ;;  %v5717_v60 = vld [vmem:[%s6558_s7 + $0x1c0] sm:$0xff] }
  0x19   :  { %6638 = vst [vmem:[#allocation68_spill] sm:$0xff] %v5707_v58  ;;  %6639 = vst [vmem:[#allocation69_spill] sm:$0xff] %v5712_v59  ;;  %v5722_v61 = vld [vmem:[%s6558_s7 + $0x1c8] sm:$0xff]  ;;  %v5727_v62 = vld [vmem:[%s6558_s7 + $0x1d0] sm:$0xff] }
  0x1a   :  { %6640 = vst [vmem:[#allocation70_spill] sm:$0xff] %v5727_v62  ;;  %v5732_v63 = vld [vmem:[%s6558_s7 + $0x1d8] sm:$0xff]  ;;  %v5737_v54 = vld [vmem:[%s6558_s7 + $0x1e0] sm:$0xff]  ;;  %v5742_v22 = vld [vmem:[%s6558_s7 + $0x1e8] sm:$0xff] }
  0x1b   :  { %6641 = vst [vmem:[#allocation71_spill] sm:$0xff] %v5732_v63  ;;  %v5747_v55 = vld [vmem:[%s6558_s7 + $0x1f0] sm:$0xff]  ;;  %v5752_v23 = vld [vmem:[%s6558_s7 + $0x1f8] sm:$0xff] }
  0x1c   :  { %6642 = vst [vmem:[#allocation72_spill] sm:$0xff] %v5747_v55  ;;  %6643 = vst [vmem:[#allocation73_spill] sm:$0xff] %v5752_v23 }
  0x1d   :  { %255 = vsyncadd [#allocation14 + $0x1], 8192  ;;  %v302_v58 = vld [vmem:[%s6560_s9] sm:$0xff]  ;;  %v304_v26 = vld [vmem:[%s6560_s9 + $0x8] sm:$0xff]  ;;  %s5310_s24 = smov [#allocation4]  }
  0x1e   :  { %s264_s25 = sshll.u32 %s5310_s24, 4  ;;  %303 = vst [vmem:[#allocation5] sm:$0xff] %v302_v58  ;;  %305 = vst [vmem:[#allocation5 + $0x8] sm:$0xff] %v304_v26  ;;  %v306_v59 = vld [vmem:[%s6560_s9 + $0x10] sm:$0xff]  ;;  %v308_v27 = vld [vmem:[%s6560_s9 + $0x18] sm:$0xff]  ;;  %s265_s25 = int_to_ptr.vmem [resolvable:$true] %s264_s25 }
  0x1f   :  { %v310_v62 = vld [vmem:[%s6560_s9 + $0x20] sm:$0xff]  ;;  %307 = vst [vmem:[#allocation5 + $0x10] sm:$0xff] %v306_v59  ;;  %309 = vst [vmem:[#allocation5 + $0x18] sm:$0xff] %v308_v27  ;;  %v312_v26 = vld [vmem:[%s6560_s9 + $0x28] sm:$0xff]  ;;  %s5194_s22 = scalar_lea.vmem %s265_s25, 4096  ;;  %p5199_p1 = scmp.lt.s32.totalorder %s265_s25, %s265_s25 }
  0x20   :  { %311 = vst [vmem:[#allocation5 + $0x20] sm:$0xff] %v310_v62  ;;  %v314_v58 = vld [vmem:[%s6560_s9 + $0x30] sm:$0xff]  ;;  %v316_v30 = vld [vmem:[%s6560_s9 + $0x38] sm:$0xff]  ;;  %p5195_p0 = scmp.ne.s32.totalorder %s265_s25, %s5194_s22  ;;  %p5200_p2 = scmp.lt.s32.totalorder %s5194_s22, %s5194_s22 }
  0x22   :  { %p5201_p3 = por %p5200_p2, %p5199_p1 }
  0x24   :  { %p5202_p4 = pnand %p5201_p3, %p5195_p0 }
  0x26   :  { %5205 = shalt.err (!%p5202_p4)  }
  0x27   :  { %267 = dma.hbm_to_vmem [thread:$0]  %s6559_s8, 4096, %s265_s25, [#allocation14 + $0x2]  ;;  %313 = vst [vmem:[#allocation5 + $0x28] sm:$0xff] %v312_v26  ;;  %315 = vst [vmem:[#allocation5 + $0x30] sm:$0xff] %v314_v58  ;;  %v318_v27 = vld [vmem:[%s6560_s9 + $0x40] sm:$0xff]  ;;  %v320_v59 = vld [vmem:[%s6560_s9 + $0x48] sm:$0xff] }
  0x28   :  { %317 = vst [vmem:[#allocation5 + $0x38] sm:$0xff] %v316_v30  ;;  %v322_v62 = vld [vmem:[%s6560_s9 + $0x50] sm:$0xff]  ;;  %319 = vst [vmem:[#allocation5 + $0x40] sm:$0xff] %v318_v27  ;;  %v324_v26 = vld [vmem:[%s6560_s9 + $0x58] sm:$0xff] }
  0x29   :  { %321 = vst [vmem:[#allocation5 + $0x48] sm:$0xff] %v320_v59  ;;  %323 = vst [vmem:[#allocation5 + $0x50] sm:$0xff] %v322_v62  ;;  %v326_v30 = vld [vmem:[%s6560_s9 + $0x60] sm:$0xff]  ;;  %v328_v58 = vld [vmem:[%s6560_s9 + $0x68] sm:$0xff] }
  0x2a   :  { %325 = vst [vmem:[#allocation5 + $0x58] sm:$0xff] %v324_v26  ;;  %327 = vst [vmem:[#allocation5 + $0x60] sm:$0xff] %v326_v30  ;;  %v330_v27 = vld [vmem:[%s6560_s9 + $0x70] sm:$0xff]  ;;  %v332_v59 = vld [vmem:[%s6560_s9 + $0x78] sm:$0xff] }
  0x2b   :  { %329 = vst [vmem:[#allocation5 + $0x68] sm:$0xff] %v328_v58  ;;  %331 = vst [vmem:[#allocation5 + $0x70] sm:$0xff] %v330_v27 }
  0x2c   :  { %333 = vst [vmem:[#allocation5 + $0x78] sm:$0xff] %v332_v59 }
  0x2d   :  { %341 = vsyncadd [#allocation14 + $0x3], 2048  ;;  %v5808_v62 = vld [vmem:[%s6561_s10] sm:$0xff]  ;;  %v5813_v26 = vld [vmem:[%s6561_s10 + $0x8] sm:$0xff] }
  0x2e   :  { %6644 = vst [vmem:[#allocation74_spill] sm:$0xff] %v5808_v62  ;;  %6645 = vst [vmem:[#allocation75_spill] sm:$0xff] %v5813_v26 }
  0x2f   :  { %387 = vsyncadd [#allocation14 + $0x4], 256  ;;  %v446_v30 = vld [vmem:[%s6564_s13] sm:$0xff]  ;;  %v448_v58 = vld [vmem:[%s6564_s13 + $0x8] sm:$0xff]  ;;  %s5311_s28 = smov [#allocation7]   ;;  %s5312_s8 = smov [#allocation8]  }
  0x30   :  { %s396_s29 = sshll.u32 %s5311_s28, 4  ;;  %s408_s25 = sshll.u32 %s5312_s8, 4  ;;  %447 = vst [vmem:[#allocation9] sm:$0xff] %v446_v30  ;;  %449 = vst [vmem:[#allocation9 + $0x8] sm:$0xff] %v448_v58  ;;  %v450_v27 = vld [vmem:[%s6564_s13 + $0x10] sm:$0xff]  ;;  %v452_v59 = vld [vmem:[%s6564_s13 + $0x18] sm:$0xff]  ;;  %s397_s29 = int_to_ptr.vmem [resolvable:$true] %s396_s29  ;;  %s409_s25 = int_to_ptr.vmem [resolvable:$true] %s408_s25 }
  0x31   :  { %v454_v26 = vld [vmem:[%s6564_s13 + $0x20] sm:$0xff]  ;;  %451 = vst [vmem:[#allocation9 + $0x10] sm:$0xff] %v450_v27  ;;  %453 = vst [vmem:[#allocation9 + $0x18] sm:$0xff] %v452_v59  ;;  %v456_v30 = vld [vmem:[%s6564_s13 + $0x28] sm:$0xff]  ;;  %s5214_s27 = scalar_lea.vmem %s397_s29, 8192  ;;  %p5219_p6 = scmp.lt.s32.totalorder %s397_s29, %s397_s29 }
  0x32   :  { %455 = vst [vmem:[#allocation9 + $0x20] sm:$0xff] %v454_v26  ;;  %v458_v58 = vld [vmem:[%s6564_s13 + $0x30] sm:$0xff]  ;;  %v460_v62 = vld [vmem:[%s6564_s13 + $0x38] sm:$0xff]  ;;  %p5215_p5 = scmp.ne.s32.totalorder %s397_s29, %s5214_s27  ;;  %p5220_p7 = scmp.lt.s32.totalorder %s5214_s27, %s5214_s27 }
  0x34   :  { %p5221_p8 = por %p5220_p7, %p5219_p6 }
  0x36   :  { %p5222_p9 = pnand %p5221_p8, %p5215_p5 }
  0x38   :  { %5225 = shalt.err (!%p5222_p9)  }
  0x39   :  { %399 = dma.hbm_to_vmem [thread:$0]  %s6562_s11, 8192, %s397_s29, [#allocation14 + $0x5]  ;;  %457 = vst [vmem:[#allocation9 + $0x28] sm:$0xff] %v456_v30  ;;  %459 = vst [vmem:[#allocation9 + $0x30] sm:$0xff] %v458_v58  ;;  %v462_v26 = vld [vmem:[%s6564_s13 + $0x40] sm:$0xff]  ;;  %v464_v27 = vld [vmem:[%s6564_s13 + $0x48] sm:$0xff] }
  0x3a   :  { %461 = vst [vmem:[#allocation9 + $0x38] sm:$0xff] %v460_v62  ;;  %v466_v59 = vld [vmem:[%s6564_s13 + $0x50] sm:$0xff]  ;;  %s5234_s19 = scalar_lea.vmem %s409_s25, 8192  ;;  %p5239_p11 = scmp.lt.s32.totalorder %s409_s25, %s409_s25 }
  0x3b   :  { %p5235_p10 = scmp.ne.s32.totalorder %s409_s25, %s5234_s19  ;;  %p5240_p12 = scmp.lt.s32.totalorder %s5234_s19, %s5234_s19 }
  0x3d   :  { %p5241_p13 = por %p5240_p12, %p5239_p11 }
  0x3f   :  { %p5242_p0 = pnand %p5241_p13, %p5235_p10 }
  0x41   :  { %5245 = shalt.err (!%p5242_p0)  }
  0x42   :  { %411 = dma.hbm_to_vmem [thread:$0]  %s6563_s12, 8192, %s409_s25, [#allocation14 + $0x6]  ;;  %463 = vst [vmem:[#allocation9 + $0x40] sm:$0xff] %v462_v26  ;;  %465 = vst [vmem:[#allocation9 + $0x48] sm:$0xff] %v464_v27  ;;  %v468_v62 = vld [vmem:[%s6564_s13 + $0x58] sm:$0xff]  ;;  %v470_v30 = vld [vmem:[%s6564_s13 + $0x60] sm:$0xff] }
  0x43   :  { %467 = vst [vmem:[#allocation9 + $0x50] sm:$0xff] %v466_v59  ;;  %v472_v58 = vld [vmem:[%s6564_s13 + $0x68] sm:$0xff]  ;;  %469 = vst [vmem:[#allocation9 + $0x58] sm:$0xff] %v468_v62  ;;  %v474_v26 = vld [vmem:[%s6564_s13 + $0x70] sm:$0xff] }
  0x44   :  { %471 = vst [vmem:[#allocation9 + $0x60] sm:$0xff] %v470_v30  ;;  %473 = vst [vmem:[#allocation9 + $0x68] sm:$0xff] %v472_v58  ;;  %v476_v27 = vld [vmem:[%s6564_s13 + $0x78] sm:$0xff]  ;;  %v478_v59 = vld [vmem:[%s6564_s13 + $0x80] sm:$0xff] }
  0x45   :  { %475 = vst [vmem:[#allocation9 + $0x70] sm:$0xff] %v474_v26  ;;  %477 = vst [vmem:[#allocation9 + $0x78] sm:$0xff] %v476_v27  ;;  %v480_v62 = vld [vmem:[%s6564_s13 + $0x88] sm:$0xff]  ;;  %v482_v30 = vld [vmem:[%s6564_s13 + $0x90] sm:$0xff] }
  0x46   :  { %479 = vst [vmem:[#allocation9 + $0x80] sm:$0xff] %v478_v59  ;;  %v484_v58 = vld [vmem:[%s6564_s13 + $0x98] sm:$0xff]  ;;  %481 = vst [vmem:[#allocation9 + $0x88] sm:$0xff] %v480_v62  ;;  %v486_v26 = vld [vmem:[%s6564_s13 + $0xa0] sm:$0xff] }
  0x47   :  { %483 = vst [vmem:[#allocation9 + $0x90] sm:$0xff] %v482_v30  ;;  %485 = vst [vmem:[#allocation9 + $0x98] sm:$0xff] %v484_v58  ;;  %v488_v27 = vld [vmem:[%s6564_s13 + $0xa8] sm:$0xff]  ;;  %v490_v59 = vld [vmem:[%s6564_s13 + $0xb0] sm:$0xff] }
  0x48   :  { %487 = vst [vmem:[#allocation9 + $0xa0] sm:$0xff] %v486_v26  ;;  %489 = vst [vmem:[#allocation9 + $0xa8] sm:$0xff] %v488_v27  ;;  %v492_v62 = vld [vmem:[%s6564_s13 + $0xb8] sm:$0xff]  ;;  %v494_v30 = vld [vmem:[%s6564_s13 + $0xc0] sm:$0xff] }
  0x49   :  { %491 = vst [vmem:[#allocation9 + $0xb0] sm:$0xff] %v490_v59  ;;  %v496_v58 = vld [vmem:[%s6564_s13 + $0xc8] sm:$0xff]  ;;  %493 = vst [vmem:[#allocation9 + $0xb8] sm:$0xff] %v492_v62  ;;  %v498_v26 = vld [vmem:[%s6564_s13 + $0xd0] sm:$0xff] }
  0x4a   :  { %495 = vst [vmem:[#allocation9 + $0xc0] sm:$0xff] %v494_v30  ;;  %497 = vst [vmem:[#allocation9 + $0xc8] sm:$0xff] %v496_v58  ;;  %v500_v27 = vld [vmem:[%s6564_s13 + $0xd8] sm:$0xff]  ;;  %v502_v59 = vld [vmem:[%s6564_s13 + $0xe0] sm:$0xff] }
  0x4b   :  { %499 = vst [vmem:[#allocation9 + $0xd0] sm:$0xff] %v498_v26  ;;  %501 = vst [vmem:[#allocation9 + $0xd8] sm:$0xff] %v500_v27  ;;  %v504_v62 = vld [vmem:[%s6564_s13 + $0xe8] sm:$0xff]  ;;  %v506_v30 = vld [vmem:[%s6564_s13 + $0xf0] sm:$0xff] }
  0x4c   :  { %503 = vst [vmem:[#allocation9 + $0xe0] sm:$0xff] %v502_v59  ;;  %v508_v58 = vld [vmem:[%s6564_s13 + $0xf8] sm:$0xff]  ;;  %505 = vst [vmem:[#allocation9 + $0xe8] sm:$0xff] %v504_v62 }
  0x4d   :  { %507 = vst [vmem:[#allocation9 + $0xf0] sm:$0xff] %v506_v30  ;;  %509 = vst [vmem:[#allocation9 + $0xf8] sm:$0xff] %v508_v58 }
  0x4e   :  { %517 = vsyncadd [#allocation14 + $0x7], 4096  ;;  %v5920_v26 = vld [vmem:[%s6565_s14] sm:$0xff]  ;;  %v5925_v27 = vld [vmem:[%s6565_s14 + $0x8] sm:$0xff] }
  0x4f   :  { %6646 = vst [vmem:[#allocation76_spill] sm:$0xff] %v5920_v26  ;;  %6647 = vst [vmem:[#allocation77_spill] sm:$0xff] %v5925_v27 }
  0x50   :  { %563 = vsyncadd [#allocation14 + $0x8], 256  ;;  %v622_v59 = vld [vmem:[%s6568_s17] sm:$0xff]  ;;  %v624_v62 = vld [vmem:[%s6568_s17 + $0x8] sm:$0xff]  ;;  %s5313_s23 = smov [#allocation11]   ;;  %s5314_s12 = smov [#allocation12]  }
  0x51   :  { %s572_s24 = sshll.u32 %s5313_s23, 4  ;;  %s584_s25 = sshll.u32 %s5314_s12, 4  ;;  %623 = vst [vmem:[#allocation13] sm:$0xff] %v622_v59  ;;  %625 = vst [vmem:[#allocation13 + $0x8] sm:$0xff] %v624_v62  ;;  %v626_v30 = vld [vmem:[%s6568_s17 + $0x10] sm:$0xff]  ;;  %v628_v58 = vld [vmem:[%s6568_s17 + $0x18] sm:$0xff]  ;;  %s573_s24 = int_to_ptr.vmem [resolvable:$true] %s572_s24  ;;  %s585_s25 = int_to_ptr.vmem [resolvable:$true] %s584_s25 }
  0x52   :  { %v630_v27 = vld [vmem:[%s6568_s17 + $0x20] sm:$0xff]  ;;  %627 = vst [vmem:[#allocation13 + $0x10] sm:$0xff] %v626_v30  ;;  %629 = vst [vmem:[#allocation13 + $0x18] sm:$0xff] %v628_v58  ;;  %v632_v59 = vld [vmem:[%s6568_s17 + $0x28] sm:$0xff]  ;;  %s5254_s11 = scalar_lea.vmem %s573_s24, 8192  ;;  %p5259_p2 = scmp.lt.s32.totalorder %s573_s24, %s573_s24 }
  0x53   :  { %631 = vst [vmem:[#allocation13 + $0x20] sm:$0xff] %v630_v27  ;;  %v634_v62 = vld [vmem:[%s6568_s17 + $0x30] sm:$0xff]  ;;  %v636_v26 = vld [vmem:[%s6568_s17 + $0x38] sm:$0xff]  ;;  %p5255_p1 = scmp.ne.s32.totalorder %s573_s24, %s5254_s11  ;;  %p5260_p3 = scmp.lt.s32.totalorder %s5254_s11, %s5254_s11 }
  0x55   :  { %p5261_p4 = por %p5260_p3, %p5259_p2 }
  0x57   :  { %p5262_p5 = pnand %p5261_p4, %p5255_p1 }
  0x59   :  { %5265 = shalt.err (!%p5262_p5)  }
  0x5a   :  { %575 = dma.hbm_to_vmem [thread:$0]  %s6566_s15, 8192, %s573_s24, [#allocation14 + $0x9]  ;;  %633 = vst [vmem:[#allocation13 + $0x28] sm:$0xff] %v632_v59  ;;  %635 = vst [vmem:[#allocation13 + $0x30] sm:$0xff] %v634_v62  ;;  %v638_v27 = vld [vmem:[%s6568_s17 + $0x40] sm:$0xff]  ;;  %v640_v30 = vld [vmem:[%s6568_s17 + $0x48] sm:$0xff] }
  0x5b   :  { %637 = vst [vmem:[#allocation13 + $0x38] sm:$0xff] %v636_v26  ;;  %v642_v58 = vld [vmem:[%s6568_s17 + $0x50] sm:$0xff]  ;;  %s5274_s12 = scalar_lea.vmem %s585_s25, 8192  ;;  %p5279_p7 = scmp.lt.s32.totalorder %s585_s25, %s585_s25 }
  0x5c   :  { %p5275_p6 = scmp.ne.s32.totalorder %s585_s25, %s5274_s12  ;;  %p5280_p8 = scmp.lt.s32.totalorder %s5274_s12, %s5274_s12 }
  0x5e   :  { %p5281_p9 = por %p5280_p8, %p5279_p7 }
  0x60   :  { %p5282_p10 = pnand %p5281_p9, %p5275_p6 }
  0x62   :  { %5285 = shalt.err (!%p5282_p10)  }
  0x63   :  { %587 = dma.hbm_to_vmem [thread:$0]  %s6567_s16, 8192, %s585_s25, [#allocation14 + $0xa]  ;;  %639 = vst [vmem:[#allocation13 + $0x40] sm:$0xff] %v638_v27  ;;  %641 = vst [vmem:[#allocation13 + $0x48] sm:$0xff] %v640_v30  ;;  %v644_v26 = vld [vmem:[%s6568_s17 + $0x58] sm:$0xff]  ;;  %v646_v59 = vld [vmem:[%s6568_s17 + $0x60] sm:$0xff] }
  0x64   :  { %643 = vst [vmem:[#allocation13 + $0x50] sm:$0xff] %v642_v58  ;;  %v648_v62 = vld [vmem:[%s6568_s17 + $0x68] sm:$0xff]  ;;  %645 = vst [vmem:[#allocation13 + $0x58] sm:$0xff] %v644_v26  ;;  %v650_v27 = vld [vmem:[%s6568_s17 + $0x70] sm:$0xff] }
  0x65   :  { %647 = vst [vmem:[#allocation13 + $0x60] sm:$0xff] %v646_v59  ;;  %649 = vst [vmem:[#allocation13 + $0x68] sm:$0xff] %v648_v62  ;;  %v652_v30 = vld [vmem:[%s6568_s17 + $0x78] sm:$0xff]  ;;  %v654_v58 = vld [vmem:[%s6568_s17 + $0x80] sm:$0xff] }
  0x66   :  { %651 = vst [vmem:[#allocation13 + $0x70] sm:$0xff] %v650_v27  ;;  %653 = vst [vmem:[#allocation13 + $0x78] sm:$0xff] %v652_v30  ;;  %v656_v26 = vld [vmem:[%s6568_s17 + $0x88] sm:$0xff]  ;;  %v658_v59 = vld [vmem:[%s6568_s17 + $0x90] sm:$0xff] }
  0x67   :  { %655 = vst [vmem:[#allocation13 + $0x80] sm:$0xff] %v654_v58  ;;  %v660_v62 = vld [vmem:[%s6568_s17 + $0x98] sm:$0xff]  ;;  %657 = vst [vmem:[#allocation13 + $0x88] sm:$0xff] %v656_v26  ;;  %v662_v27 = vld [vmem:[%s6568_s17 + $0xa0] sm:$0xff] }
  0x68   :  { %659 = vst [vmem:[#allocation13 + $0x90] sm:$0xff] %v658_v59  ;;  %661 = vst [vmem:[#allocation13 + $0x98] sm:$0xff] %v660_v62  ;;  %v664_v30 = vld [vmem:[%s6568_s17 + $0xa8] sm:$0xff]  ;;  %v666_v58 = vld [vmem:[%s6568_s17 + $0xb0] sm:$0xff] }
  0x69   :  { %663 = vst [vmem:[#allocation13 + $0xa0] sm:$0xff] %v662_v27  ;;  %665 = vst [vmem:[#allocation13 + $0xa8] sm:$0xff] %v664_v30  ;;  %v668_v26 = vld [vmem:[%s6568_s17 + $0xb8] sm:$0xff]  ;;  %v670_v59 = vld [vmem:[%s6568_s17 + $0xc0] sm:$0xff] }
  0x6a   :  { %667 = vst [vmem:[#allocation13 + $0xb0] sm:$0xff] %v666_v58  ;;  %v672_v62 = vld [vmem:[%s6568_s17 + $0xc8] sm:$0xff]  ;;  %669 = vst [vmem:[#allocation13 + $0xb8] sm:$0xff] %v668_v26  ;;  %v674_v27 = vld [vmem:[%s6568_s17 + $0xd0] sm:$0xff] }
  0x6b   :  { %671 = vst [vmem:[#allocation13 + $0xc0] sm:$0xff] %v670_v59  ;;  %673 = vst [vmem:[#allocation13 + $0xc8] sm:$0xff] %v672_v62  ;;  %v676_v30 = vld [vmem:[%s6568_s17 + $0xd8] sm:$0xff]  ;;  %v678_v58 = vld [vmem:[%s6568_s17 + $0xe0] sm:$0xff] }
  0x6c   :  { %675 = vst [vmem:[#allocation13 + $0xd0] sm:$0xff] %v674_v27  ;;  %677 = vst [vmem:[#allocation13 + $0xd8] sm:$0xff] %v676_v30  ;;  %v680_v26 = vld [vmem:[%s6568_s17 + $0xe8] sm:$0xff]  ;;  %v682_v59 = vld [vmem:[%s6568_s17 + $0xf0] sm:$0xff] }
  0x6d   :  { %679 = vst [vmem:[#allocation13 + $0xe0] sm:$0xff] %v678_v58  ;;  %v684_v62 = vld [vmem:[%s6568_s17 + $0xf8] sm:$0xff]  ;;  %681 = vst [vmem:[#allocation13 + $0xe8] sm:$0xff] %v680_v26 }
  0x6e   :  { %683 = vst [vmem:[#allocation13 + $0xf0] sm:$0xff] %v682_v59  ;;  %685 = vst [vmem:[#allocation13 + $0xf8] sm:$0xff] %v684_v62 }
  0x6f   :  { %693 = vsyncadd [#allocation14 + $0xb], 4096  ;;  %s6648_s21 = sld [smem:[#allocation86_spill]]  ;;  %v6037_v30 = vld [vmem:[%s6554_s3] sm:$0xff]  ;;  %s5315_s2 = smov 0.0   ;;  %v4831_v59 = vcombine.high %v5417_v0, %v5427_v2  ;;  %v4833_v62 = vcombine.high %v5422_v1, %v5432_v3 }
  0x70   :  { %6650 = vst [vmem:[#allocation79_spill] sm:$0xff] %v6037_v30  ;;  %s6042_s15 = smax.f32 %s5315_s2, %s6556_s5  ;;  %s6651_s26 = sld [smem:[#allocation84_spill]]  ;;  %v4830_v30 = vcombine.low %v5417_v0, %v5427_v2 }
  0x75   :  { %v6032_v27 = vld [vmem:[%s6648_s21] sm:$0xff] }
  0x76   :  { %6649 = vst [vmem:[#allocation78_spill] sm:$0xff] %v6032_v27  ;;  %v698_v58 = vld [vmem:[%s6651_s26] sm:$0xff]  ;;  %v699_v26 = vld [vmem:[%s6651_s26 + $0x8] sm:$0xff]  ;;  %v4832_v27 = vcombine.low %v5422_v1, %v5432_v3 }
  0x77   :  { %5286 = dma.done.wait [#allocation14], 512 }
  0x78   :  { %5287 = vsyncadd [#allocation14], 4294966784  ;;  %769 = vmatprep.subr.bf16.mxu0 %v4831_v59  ;;  %812 = vmatprep.subr.bf16.mxu1 %v4833_v62  ;;  %v709_v63 = vpack.c.bf16 %v699_v26, %v698_v58  ;;  %vm751_vm0 = vcmask 130048   ;;  %v6590_v31 = vmov 0   ;;  %v711_v55 = vlaneseq  ;;  %v708_v3 = vld [vmem:[%s6555_s4] sm:$0xf] }
  0x79   :  { %770 = vmatpush1.bf16.msra.mxu0 %v4830_v30  ;;  %813 = vmatpush1.bf16.msra.mxu1 %v4832_v27  ;;  %v967_v47 = vunpack.c.h.s8.bf16 %v5497_v16 }
  0x7a   :  { %787 = vmatprep.mubr.bf16.mxu0 %v6590_v31  ;;  %830 = vmatprep.mubr.bf16.mxu1 %v6590_v31  ;;  %v712_v0 = vshrl.u32 %v711_v55, 7 }
  0x7c   :  { %4834 = vmatmul.mubr.msk.bf16.vlgmr.msra.gmra.mxu0 %vm751_vm0, %v709_v63  ;;  %4835 = vmatmul.mubr.msk.bf16.vlgmr.msra.gmra.mxu1 %vm751_vm0, %v709_v63  ;;  %v6060_v2 = vsub.s32 0, %v712_v0  ;;  %v6062_v1 = vsub.s32 2, %v712_v0  ;;  %v6067_v30 = vsub.s32 1, %v712_v0  ;;  %v6069_v27 = vsub.s32 3, %v712_v0 }
  0x7e   :  { %6652 = vst [vmem:[#allocation80_spill] sm:$0xff] %v6060_v2  ;;  %6653 = vst [vmem:[#allocation81_spill] sm:$0xff] %v6062_v1  ;;  %v714_v58 = vrot.slane %v708_v3, %v6060_v2  ;;  %v722_v26 = vrot.slane %v708_v3, %v6062_v1  ;;  %v718_v55 = vrot.slane %v708_v3, %v6067_v30 }
  0x7f   :  { %6654 = vst [vmem:[#allocation82_spill] sm:$0xff] %v6067_v30  ;;  %6655 = vst [vmem:[#allocation83_spill] sm:$0xff] %v6069_v27  ;;  %v726_v62 = vrot.slane %v708_v3, %v6069_v27 }
 0x13c   :  { %v789_v59 = vpop.f32.mrf.mxu0  ;;  %v832_v63 = vpop.f32.mrf.mxu1 }
 0x13d   :  { %v790_v31 = vadd.f32 %v789_v59, %v714_v58  ;;  %v833_v34 = vadd.f32 %v832_v63, %v722_v26 }
 0x13e   :  { %v791_v23 = vpop.f32.mrf.mxu0  ;;  %v834_v35 = vpop.f32.mrf.mxu1 }
 0x13f   :  { %vm841_vm1 = vcmp.gt.f32.partialorder %v790_v31, 0.0  ;;  %v849_v38 = vmul.f32 0.01, %v790_v31  ;;  %vm843_vm2 = vcmp.gt.f32.partialorder %v833_v34, 0.0  ;;  %v851_v6 = vmul.f32 0.01, %v833_v34 }
 0x140   :  { %v792_v0 = vadd.f32 %v791_v23, %v718_v55  ;;  %v835_v39 = vadd.f32 %v834_v35, %v726_v62  ;;  %v793_v7 = vpop.f32.mrf.mxu0  ;;  %v836_v2 = vpop.f32.mrf.mxu1 }
 0x141   :  { %v6075_v42 = vsel %vm841_vm1, %v790_v31, %v849_v38  ;;  %v6077_v1 = vsel %vm843_vm2, %v833_v34, %v851_v6  ;;  %v794_v10 = vadd.f32 %v793_v7, %v714_v58  ;;  %v837_v30 = vadd.f32 %v836_v2, %v722_v26 }
 0x142   :  { %vm842_vm3 = vcmp.gt.f32.partialorder %v792_v0, 0.0  ;;  %v850_v3 = vmul.f32 0.01, %v792_v0  ;;  %vm844_vm4 = vcmp.gt.f32.partialorder %v835_v39, 0.0  ;;  %v852_v59 = vmul.f32 0.01, %v835_v39  ;;  %v795_v63 = vpop.f32.mrf.mxu0  ;;  %v838_v27 = vpop.f32.mrf.mxu1 }
 0x143   :  { %vm845_vm5 = vcmp.gt.f32.partialorder %v794_v10, 0.0  ;;  %v853_v43 = vmul.f32 0.01, %v794_v10  ;;  %vm847_vm6 = vcmp.gt.f32.partialorder %v837_v30, 0.0  ;;  %v855_v11 = vmul.f32 0.01, %v837_v30 }
 0x144   :  { %v858_v23 = vsel %vm842_vm3, %v792_v0, %v850_v3  ;;  %v860_v35 = vsel %vm844_vm4, %v835_v39, %v852_v59  ;;  %v796_v46 = vadd.f32 %v795_v63, %v718_v55  ;;  %v839_v14 = vadd.f32 %v838_v27, %v726_v62 }
 0x145   :  { %v6079_v31 = vsel %vm845_vm5, %v794_v10, %v853_v43  ;;  %v6081_v6 = vsel %vm847_vm6, %v837_v30, %v855_v11  ;;  %v968_v58 = vunpack.c.h.s8.bf16 %v5502_v17  ;;  %v1032_v26 = vunpack.c.h.s8.bf16 %v5662_v49 }
 0x146   :  { %vm846_vm7 = vcmp.gt.f32.partialorder %v796_v46, 0.0  ;;  %v854_v7 = vmul.f32 0.01, %v796_v46  ;;  %vm848_vm8 = vcmp.gt.f32.partialorder %v839_v14, 0.0  ;;  %v856_v34 = vmul.f32 0.01, %v839_v14 }
 0x147   :  { %v1031_v39 = vunpack.c.h.s8.bf16 %v5657_v48 }
 0x148   :  { %v862_v38 = vsel %vm846_vm7, %v796_v46, %v854_v7  ;;  %v864_v2 = vsel %vm848_vm8, %v839_v14, %v856_v34 }
 0x149   :  { %5288 = dma.done.wait [#allocation14 + $0x1], 8192 }
 0x14a   :  { %5289 = vsyncadd [#allocation14 + $0x1], 4294959104  ;;  %v964_v10 = vunpack.c.l.s8.bf16 %v5502_v17  ;;  %v1028_v11 = vunpack.c.l.s8.bf16 %v5662_v49  ;;  %1067 = vmatprep.subr.bf16.mxu0 %v968_v58  ;;  %1110 = vmatprep.subr.bf16.mxu1 %v1032_v26  ;;  %v963_v14 = vunpack.c.l.s8.bf16 %v5497_v16  ;;  %v1027_v43 = vunpack.c.l.s8.bf16 %v5657_v48 }
 0x14b   :  { %1068 = vmatpush1.bf16.msra.mxu0 %v967_v47  ;;  %1111 = vmatpush1.bf16.msra.mxu1 %v1031_v39  ;;  %v960_v46 = vunpack.c.h.s8.bf16 %v5482_v13  ;;  %v1024_v30 = vunpack.c.h.s8.bf16 %v5642_v45  ;;  %v959_v17 = vunpack.c.h.s8.bf16 %v5477_v12  ;;  %v1023_v49 = vunpack.c.h.s8.bf16 %v5637_v44 }
 0x14c   :  { %1069 = vmatprep.subr.bf16.mxu0 %v964_v10  ;;  %1112 = vmatprep.subr.bf16.mxu1 %v1028_v11  ;;  %v956_v47 = vunpack.c.l.s8.bf16 %v5482_v13  ;;  %v1020_v16 = vunpack.c.l.s8.bf16 %v5642_v45  ;;  %v955_v48 = vunpack.c.l.s8.bf16 %v5477_v12  ;;  %v1019_v27 = vunpack.c.l.s8.bf16 %v5637_v44 }
 0x14d   :  { %v952_v55 = vunpack.c.h.s8.bf16 %v5462_v9  ;;  %v1016_v62 = vunpack.c.h.s8.bf16 %v5622_v41  ;;  %v951_v0 = vunpack.c.h.s8.bf16 %v5457_v8  ;;  %v1015_v13 = vunpack.c.h.s8.bf16 %v5617_v40 }
 0x14e   :  { %v948_v45 = vunpack.c.l.s8.bf16 %v5462_v9  ;;  %v1012_v12 = vunpack.c.l.s8.bf16 %v5622_v41  ;;  %v6105_v3 = vpack.c.bf16 %v862_v38, %v858_v23  ;;  %v6107_v44 = vpack.c.bf16 %v864_v2, %v860_v35 }
 0x14f   :  { %1070 = vmatpush1.bf16.msra.mxu0 %v963_v14  ;;  %1113 = vmatpush1.bf16.msra.mxu1 %v1027_v43  ;;  %v947_v59 = vunpack.c.l.s8.bf16 %v5457_v8  ;;  %v1011_v63 = vunpack.c.l.s8.bf16 %v5617_v40  ;;  %v944_v9 = vunpack.c.h.s8.bf16 %v5442_v5  ;;  %v1008_v41 = vunpack.c.h.s8.bf16 %v5602_v37 }
 0x150   :  { %1071 = vmatprep.subr.bf16.mxu0 %v960_v46  ;;  %1114 = vmatprep.subr.bf16.mxu1 %v1024_v30  ;;  %v943_v23 = vunpack.c.h.s8.bf16 %v5437_v4  ;;  %v1007_v35 = vunpack.c.h.s8.bf16 %v5597_v36  ;;  %v940_v7 = vunpack.c.l.s8.bf16 %v5442_v5  ;;  %v1004_v8 = vunpack.c.l.s8.bf16 %v5602_v37 }
 0x151   :  { %1099 = vmatprep.mubr.bf16.mxu0 %v6105_v3  ;;  %1142 = vmatprep.mubr.bf16.mxu1 %v6107_v44  ;;  %v939_v40 = vunpack.c.l.s8.bf16 %v5437_v4  ;;  %v1003_v34 = vunpack.c.l.s8.bf16 %v5597_v36  ;;  %v1000_v38 = vunpack.c.h.s8.bf16 %v5582_v33  ;;  %v1064_v2 = vunpack.c.h.s8.bf16 %v5742_v22 }
 0x152   :  { %v999_v58 = vunpack.c.h.s8.bf16 %v5577_v32  ;;  %v1063_v5 = vunpack.c.h.s8.bf16 %v5737_v54  ;;  %v996_v37 = vunpack.c.l.s8.bf16 %v5582_v33  ;;  %v1060_v4 = vunpack.c.l.s8.bf16 %v5742_v22 }
 0x153   :  { %1072 = vmatpush1.bf16.msra.mxu0 %v959_v17  ;;  %1115 = vmatpush1.bf16.msra.mxu1 %v1023_v49  ;;  %v995_v36 = vunpack.c.l.s8.bf16 %v5577_v32  ;;  %v1059_v26 = vunpack.c.l.s8.bf16 %v5737_v54  ;;  %v992_v39 = vunpack.c.h.s8.bf16 %v5562_v29  ;;  %v1056_v10 = vunpack.c.h.s8.bf16 %v5722_v61 }
 0x154   :  { %1073 = vmatprep.subr.bf16.mxu0 %v956_v47  ;;  %1116 = vmatprep.subr.bf16.mxu1 %v1020_v16  ;;  %v991_v11 = vunpack.c.h.s8.bf16 %v5557_v28  ;;  %v1055_v33 = vunpack.c.h.s8.bf16 %v5717_v60  ;;  %v988_v22 = vunpack.c.l.s8.bf16 %v5562_v29  ;;  %v1052_v32 = vunpack.c.l.s8.bf16 %v5722_v61 }
 0x155   :  { %v987_v54 = vunpack.c.l.s8.bf16 %v5557_v28  ;;  %v1051_v14 = vunpack.c.l.s8.bf16 %v5717_v60  ;;  %v984_v43 = vunpack.c.h.s8.bf16 %v5542_v25  ;;  %v1048_v46 = vunpack.c.h.s8.bf16 %v5702_v57 }
 0x156   :  { %v983_v30 = vunpack.c.h.s8.bf16 %v5537_v24  ;;  %v1047_v29 = vunpack.c.h.s8.bf16 %v5697_v56  ;;  %v980_v61 = vunpack.c.l.s8.bf16 %v5542_v25  ;;  %v1044_v28 = vunpack.c.l.s8.bf16 %v5702_v57 }
 0x157   :  { %1074 = vmatpush1.bf16.msra.mxu0 %v955_v48  ;;  %1117 = vmatpush1.bf16.msra.mxu1 %v1019_v27  ;;  %v979_v60 = vunpack.c.l.s8.bf16 %v5537_v24  ;;  %v1043_v17 = vunpack.c.l.s8.bf16 %v5697_v56  ;;  %v976_v49 = vunpack.c.h.s8.bf16 %v5522_v21  ;;  %v1040_v47 = vunpack.c.h.s8.bf16 %v5682_v53 }
 0x158   :  { %1075 = vmatprep.subr.bf16.mxu0 %v952_v55  ;;  %1118 = vmatprep.subr.bf16.mxu1 %v1016_v62  ;;  %v975_v16 = vunpack.c.h.s8.bf16 %v5517_v20  ;;  %v1039_v25 = vunpack.c.h.s8.bf16 %v5677_v52  ;;  %v972_v57 = vunpack.c.l.s8.bf16 %v5522_v21  ;;  %v1036_v24 = vunpack.c.l.s8.bf16 %v5682_v53 }
 0x159   :  { %v971_v56 = vunpack.c.l.s8.bf16 %v5517_v20  ;;  %v1035_v48 = vunpack.c.l.s8.bf16 %v5677_v52  ;;  %v970_v27 = vunpack.c.h.s8.bf16 %v5512_v19  ;;  %v1034_v55 = vunpack.c.h.s8.bf16 %v5672_v51 }
 0x15a   :  { %v6157_v62 = vpack.c.bf16 %v6079_v31, %v6075_v42  ;;  %v6161_v21 = vpack.c.bf16 %v6081_v6, %v6077_v1  ;;  %v969_v20 = vunpack.c.h.s8.bf16 %v5507_v18  ;;  %v1033_v52 = vunpack.c.h.s8.bf16 %v5667_v50  ;;  %v6656_v6 = vld [vmem:[#allocation65_spill] sm:$0xff] }
 0x15b   :  { %1076 = vmatpush1.bf16.msra.mxu0 %v951_v0  ;;  %1119 = vmatpush1.bf16.msra.mxu1 %v1015_v13  ;;  %v966_v53 = vunpack.c.l.s8.bf16 %v5512_v19  ;;  %v1030_v0 = vunpack.c.l.s8.bf16 %v5672_v51  ;;  %v965_v42 = vunpack.c.l.s8.bf16 %v5507_v18  ;;  %v1029_v1 = vunpack.c.l.s8.bf16 %v5667_v50  ;;  %v6657_v19 = vld [vmem:[#allocation51_spill] sm:$0xff] }
 0x15c   :  { %1077 = vmatprep.subr.bf16.mxu0 %v948_v45  ;;  %1120 = vmatprep.subr.bf16.mxu1 %v1012_v12  ;;  %v962_v31 = vunpack.c.h.s8.bf16 %v5492_v15  ;;  %v1026_v13 = vunpack.c.h.s8.bf16 %v6656_v6  ;;  %v961_v51 = vunpack.c.h.s8.bf16 %v6657_v19  ;;  %v6658_v45 = vld [vmem:[#allocation64_spill] sm:$0xff]  ;;  %v958_v18 = vunpack.c.l.s8.bf16 %v5492_v15 }
 0x15d   :  { %v1025_v12 = vunpack.c.h.s8.bf16 %v6658_v45  ;;  %v1022_v50 = vunpack.c.l.s8.bf16 %v6656_v6  ;;  %v6677_v6 = vld [vmem:[#allocation54_spill] sm:$0xff] }
 0x15f   :  { %1078 = vmatpush1.bf16.msra.mxu0 %v947_v59  ;;  %1121 = vmatpush1.bf16.msra.mxu1 %v1011_v63  ;;  %v957_v59 = vunpack.c.l.s8.bf16 %v6657_v19  ;;  %v6678_v19 = vld [vmem:[#allocation68_spill] sm:$0xff] }
 0x160   :  { %1079 = vmatprep.subr.bf16.mxu0 %v944_v9  ;;  %1122 = vmatprep.subr.bf16.mxu1 %v1008_v41  ;;  %v6660_v9 = vld [vmem:[#allocation63_spill] sm:$0xff] }
 0x161   :  { %v1018_v41 = vunpack.c.h.s8.bf16 %v6660_v9 }
 0x163   :  { %1080 = vmatpush1.bf16.msra.mxu0 %v943_v23  ;;  %1123 = vmatpush1.bf16.msra.mxu1 %v1007_v35  ;;  %v6661_v23 = vld [vmem:[#allocation49_spill] sm:$0xff] }
 0x164   :  { %1081 = vmatprep.subr.bf16.mxu0 %v940_v7  ;;  %1124 = vmatprep.subr.bf16.mxu1 %v1004_v8  ;;  %v953_v35 = vunpack.c.h.s8.bf16 %v6661_v23  ;;  %v6662_v7 = vld [vmem:[#allocation62_spill] sm:$0xff] }
 0x165   :  { %v1017_v15 = vunpack.c.h.s8.bf16 %v6662_v7 }
 0x167   :  { %1082 = vmatpush1.bf16.msra.mxu0 %v939_v40  ;;  %1125 = vmatpush1.bf16.msra.mxu1 %v1003_v34  ;;  %v1014_v40 = vunpack.c.l.s8.bf16 %v6660_v9  ;;  %v949_v34 = vunpack.c.l.s8.bf16 %v6661_v23  ;;  %v6681_v9 = vld [vmem:[#allocation52_spill] sm:$0xff]  ;;  %v6682_v23 = vld [vmem:[#allocation66_spill] sm:$0xff] }
 0x168   :  { %1083 = vmatprep.subr.bf16.mxu0 %v1000_v38  ;;  %1126 = vmatprep.subr.bf16.mxu1 %v1064_v2  ;;  %v1013_v38 = vunpack.c.l.s8.bf16 %v6662_v7  ;;  %v6663_v2 = vld [vmem:[#allocation48_spill] sm:$0xff] }
 0x16b   :  { %1084 = vmatpush2.bf16.msra.mxu0 %v999_v58  ;;  %1127 = vmatpush2.bf16.msra.mxu1 %v1063_v5  ;;  %v946_v58 = vunpack.c.h.s8.bf16 %v6663_v2  ;;  %v6664_v5 = vld [vmem:[#allocation61_spill] sm:$0xff] }
 0x16c   :  { %1085 = vmatprep.subr.bf16.mxu0 %v996_v37  ;;  %1128 = vmatprep.subr.bf16.mxu1 %v1060_v4  ;;  %v1010_v37 = vunpack.c.h.s8.bf16 %v6664_v5  ;;  %v6665_v4 = vld [vmem:[#allocation47_spill] sm:$0xff] }
 0x16f   :  { %1086 = vmatpush2.bf16.msra.mxu0 %v995_v36  ;;  %1129 = vmatpush2.bf16.msra.mxu1 %v1059_v26  ;;  %v945_v36 = vunpack.c.h.s8.bf16 %v6665_v4  ;;  %v6666_v26 = vld [vmem:[#allocation60_spill] sm:$0xff] }
 0x170   :  { %1087 = vmatprep.subr.bf16.mxu0 %v992_v39  ;;  %1130 = vmatprep.subr.bf16.mxu1 %v1056_v10  ;;  %v1009_v39 = vunpack.c.h.s8.bf16 %v6666_v26  ;;  %v942_v10 = vunpack.c.l.s8.bf16 %v6663_v2  ;;  %v6683_v2 = vld [vmem:[#allocation80_spill] sm:$0xff] }
 0x173   :  { %1088 = vmatpush2.bf16.msra.mxu0 %v991_v11  ;;  %1131 = vmatpush2.bf16.msra.mxu1 %v1055_v33  ;;  %v1006_v11 = vunpack.c.l.s8.bf16 %v6664_v5  ;;  %v941_v33 = vunpack.c.l.s8.bf16 %v6665_v4 }
 0x174   :  { %1089 = vmatprep.subr.bf16.mxu0 %v988_v22  ;;  %1132 = vmatprep.subr.bf16.mxu1 %v1052_v32  ;;  %v1005_v22 = vunpack.c.l.s8.bf16 %v6666_v26  ;;  %v6667_v32 = vld [vmem:[#allocation59_spill] sm:$0xff]  ;;  %v6684_v26 = vld [vmem:[#allocation82_spill] sm:$0xff] }
 0x177   :  { %1090 = vmatpush2.bf16.msra.mxu0 %v987_v54  ;;  %1133 = vmatpush2.bf16.msra.mxu1 %v1051_v14  ;;  %v1002_v54 = vunpack.c.h.s8.bf16 %v6667_v32  ;;  %v6668_v14 = vld [vmem:[#allocation73_spill] sm:$0xff] }
 0x178   :  { %1091 = vmatprep.subr.bf16.mxu0 %v984_v43  ;;  %1134 = vmatprep.subr.bf16.mxu1 %v1048_v46  ;;  %v1066_v43 = vunpack.c.h.s8.bf16 %v6668_v14  ;;  %v6669_v46 = vld [vmem:[#allocation58_spill] sm:$0xff] }
 0x17b   :  { %1092 = vmatpush2.bf16.msra.mxu0 %v983_v30  ;;  %1135 = vmatpush2.bf16.msra.mxu1 %v1047_v29  ;;  %v1001_v30 = vunpack.c.h.s8.bf16 %v6669_v46  ;;  %v6670_v29 = vld [vmem:[#allocation72_spill] sm:$0xff] }
 0x17c   :  { %1093 = vmatprep.subr.bf16.mxu0 %v980_v61  ;;  %1136 = vmatprep.subr.bf16.mxu1 %v1044_v28  ;;  %v1065_v61 = vunpack.c.h.s8.bf16 %v6670_v29  ;;  %v998_v28 = vunpack.c.l.s8.bf16 %v6667_v32 }
 0x17f   :  { %1094 = vmatpush2.bf16.msra.mxu0 %v979_v60  ;;  %1137 = vmatpush2.bf16.msra.mxu1 %v1043_v17  ;;  %v1062_v60 = vunpack.c.l.s8.bf16 %v6668_v14  ;;  %v997_v17 = vunpack.c.l.s8.bf16 %v6669_v46 }
 0x180   :  { %1095 = vmatprep.subr.bf16.mxu0 %v976_v49  ;;  %1138 = vmatprep.subr.bf16.mxu1 %v1040_v47  ;;  %v1061_v49 = vunpack.c.l.s8.bf16 %v6670_v29  ;;  %v6671_v47 = vld [vmem:[#allocation57_spill] sm:$0xff] }
 0x183   :  { %1096 = vmatpush2.bf16.msra.mxu0 %v975_v16  ;;  %1139 = vmatpush2.bf16.msra.mxu1 %v1039_v25  ;;  %v994_v16 = vunpack.c.h.s8.bf16 %v6671_v47  ;;  %v6672_v25 = vld [vmem:[#allocation71_spill] sm:$0xff] }
 0x184   :  { %1097 = vmatprep.subr.bf16.mxu0 %v972_v57  ;;  %1140 = vmatprep.subr.bf16.mxu1 %v1036_v24  ;;  %v1058_v57 = vunpack.c.h.s8.bf16 %v6672_v25  ;;  %v6673_v24 = vld [vmem:[#allocation56_spill] sm:$0xff] }
 0x187   :  { %1098 = vmatpush2.bf16.msra.mxu0 %v971_v56  ;;  %1141 = vmatpush2.bf16.msra.mxu1 %v1035_v48  ;;  %v993_v56 = vunpack.c.h.s8.bf16 %v6673_v24  ;;  %v6674_v48 = vld [vmem:[#allocation70_spill] sm:$0xff] }
 0x188   :  { %1153 = vmatprep.subr.bf16.mxu0 %v970_v27  ;;  %1196 = vmatprep.subr.bf16.mxu1 %v1034_v55  ;;  %v1057_v27 = vunpack.c.h.s8.bf16 %v6674_v48  ;;  %v990_v55 = vunpack.c.l.s8.bf16 %v6671_v47 }
 0x18a   :  { %1100 = vmatmul.mubr.bf16.vlgmr.msra.gmra.mxu0 %v6157_v62  ;;  %1143 = vmatmul.mubr.bf16.vlgmr.msra.gmra.mxu1 %v6161_v21 }
 0x18b   :  { %1154 = vmatpush1.bf16.msra.mxu0 %v969_v20  ;;  %1197 = vmatpush1.bf16.msra.mxu1 %v1033_v52  ;;  %v1054_v20 = vunpack.c.l.s8.bf16 %v6672_v25  ;;  %v989_v52 = vunpack.c.l.s8.bf16 %v6673_v24 }
 0x18c   :  { %1155 = vmatprep.subr.bf16.mxu0 %v966_v53  ;;  %1198 = vmatprep.subr.bf16.mxu1 %v1030_v0  ;;  %v1053_v53 = vunpack.c.l.s8.bf16 %v6674_v48  ;;  %v6675_v0 = vld [vmem:[#allocation55_spill] sm:$0xff] }
 0x18d   :  { %1185 = vmatprep.mubr.bf16.mxu0 %v6105_v3  ;;  %1228 = vmatprep.mubr.bf16.mxu1 %v6107_v44  ;;  %v1021_v3 = vunpack.c.l.s8.bf16 %v6658_v45  ;;  %v6659_v44 = vld [vmem:[#allocation50_spill] sm:$0xff]  ;;  %v982_v45 = vunpack.c.l.s8.bf16 %v6675_v0 }
 0x18e   :  { %v954_v63 = vunpack.c.h.s8.bf16 %v6659_v44  ;;  %v950_v8 = vunpack.c.l.s8.bf16 %v6659_v44  ;;  %v6680_v44 = vld [vmem:[#allocation67_spill] sm:$0xff] }
 0x18f   :  { %1156 = vmatpush1.bf16.msra.mxu0 %v965_v42  ;;  %1199 = vmatpush1.bf16.msra.mxu1 %v1029_v1  ;;  %v986_v42 = vunpack.c.h.s8.bf16 %v6675_v0  ;;  %v6676_v1 = vld [vmem:[#allocation69_spill] sm:$0xff] }
 0x190   :  { %1157 = vmatprep.subr.bf16.mxu0 %v962_v31  ;;  %1200 = vmatprep.subr.bf16.mxu1 %v1026_v13  ;;  %v1050_v31 = vunpack.c.h.s8.bf16 %v6676_v1  ;;  %v985_v13 = vunpack.c.h.s8.bf16 %v6677_v6 }
 0x193   :  { %1158 = vmatpush1.bf16.msra.mxu0 %v961_v51  ;;  %1201 = vmatpush1.bf16.msra.mxu1 %v1025_v12  ;;  %v1049_v51 = vunpack.c.h.s8.bf16 %v6678_v19  ;;  %v1046_v12 = vunpack.c.l.s8.bf16 %v6676_v1  ;;  %v6686_v1 = vld [vmem:[#allocation83_spill] sm:$0xff] }
 0x194   :  { %1159 = vmatprep.subr.bf16.mxu0 %v958_v18  ;;  %1202 = vmatprep.subr.bf16.mxu1 %v1022_v50  ;;  %v981_v18 = vunpack.c.l.s8.bf16 %v6677_v6  ;;  %v1045_v50 = vunpack.c.l.s8.bf16 %v6678_v19 }
 0x197   :  { %1160 = vmatpush1.bf16.msra.mxu0 %v957_v59  ;;  %1203 = vmatpush1.bf16.msra.mxu1 %v1021_v3  ;;  %v6679_v59 = vld [vmem:[#allocation53_spill] sm:$0xff] }
 0x198   :  { %1161 = vmatprep.subr.bf16.mxu0 %v954_v63  ;;  %1204 = vmatprep.subr.bf16.mxu1 %v1018_v41  ;;  %v978_v3 = vunpack.c.h.s8.bf16 %v6679_v59  ;;  %v1042_v63 = vunpack.c.h.s8.bf16 %v6680_v44  ;;  %v977_v41 = vunpack.c.h.s8.bf16 %v6681_v9  ;;  %v974_v7 = vunpack.c.l.s8.bf16 %v6679_v59 }
 0x19b   :  { %1162 = vmatpush1.bf16.msra.mxu0 %v953_v35  ;;  %1205 = vmatpush1.bf16.msra.mxu1 %v1017_v15  ;;  %v1041_v35 = vunpack.c.h.s8.bf16 %v6682_v23  ;;  %v1038_v15 = vunpack.c.l.s8.bf16 %v6680_v44 }
 0x19c   :  { %1163 = vmatprep.subr.bf16.mxu0 %v950_v8  ;;  %1206 = vmatprep.subr.bf16.mxu1 %v1014_v40  ;;  %v973_v8 = vunpack.c.l.s8.bf16 %v6681_v9  ;;  %v1037_v40 = vunpack.c.l.s8.bf16 %v6682_v23 }
 0x19f   :  { %1164 = vmatpush1.bf16.msra.mxu0 %v949_v34  ;;  %1207 = vmatpush1.bf16.msra.mxu1 %v1013_v38  ;;  %v934_v34 = vld [vmem:[%s6555_s4 + $0x8] sm:$0xf]  ;;  %v933_v38 = vld [vmem:[%s6555_s4 + $0x4] sm:$0xf] }
 0x1a0   :  { %1165 = vmatprep.subr.bf16.mxu0 %v946_v58  ;;  %1208 = vmatprep.subr.bf16.mxu1 %v1010_v37  ;;  %v1243_v58 = vrot.slane %v934_v34, %v6683_v2 }
 0x1a3   :  { %1166 = vmatpush1.bf16.msra.mxu0 %v945_v36  ;;  %1209 = vmatpush1.bf16.msra.mxu1 %v1009_v39  ;;  %v1272_v36 = vrot.slane %v933_v38, %v6683_v2  ;;  %v1247_v39 = vrot.slane %v934_v34, %v6684_v26 }
 0x1a4   :  { %1167 = vmatprep.subr.bf16.mxu0 %v942_v10  ;;  %1210 = vmatprep.subr.bf16.mxu1 %v1006_v11 }
 0x1a7   :  { %1168 = vmatpush1.bf16.msra.mxu0 %v941_v33  ;;  %1211 = vmatpush1.bf16.msra.mxu1 %v1005_v22  ;;  %v1276_v33 = vrot.slane %v933_v38, %v6684_v26 }
 0x1a8   :  { %1169 = vmatprep.subr.bf16.mxu0 %v1002_v54  ;;  %1212 = vmatprep.subr.bf16.mxu1 %v1066_v43 }
 0x1ab   :  { %1170 = vmatpush2.bf16.msra.mxu0 %v1001_v30  ;;  %1213 = vmatpush2.bf16.msra.mxu1 %v1065_v61 }
 0x1ac   :  { %1171 = vmatprep.subr.bf16.mxu0 %v998_v28  ;;  %1214 = vmatprep.subr.bf16.mxu1 %v1062_v60 }
 0x1af   :  { %1172 = vmatpush2.bf16.msra.mxu0 %v997_v17  ;;  %1215 = vmatpush2.bf16.msra.mxu1 %v1061_v49 }
 0x1b0   :  { %1173 = vmatprep.subr.bf16.mxu0 %v994_v16  ;;  %1216 = vmatprep.subr.bf16.mxu1 %v1058_v57 }
 0x1b3   :  { %1174 = vmatpush2.bf16.msra.mxu0 %v993_v56  ;;  %1217 = vmatpush2.bf16.msra.mxu1 %v1057_v27 }
 0x1b4   :  { %1175 = vmatprep.subr.bf16.mxu0 %v990_v55  ;;  %1218 = vmatprep.subr.bf16.mxu1 %v1054_v20  ;;  %v6685_v55 = vld [vmem:[#allocation81_spill] sm:$0xff] }
 0x1b5   :  { %v1251_v20 = vrot.slane %v934_v34, %v6685_v55 }
 0x1b7   :  { %1176 = vmatpush2.bf16.msra.mxu0 %v989_v52  ;;  %1219 = vmatpush2.bf16.msra.mxu1 %v1053_v53 }
 0x1b8   :  { %1177 = vmatprep.subr.bf16.mxu0 %v986_v42  ;;  %1220 = vmatprep.subr.bf16.mxu1 %v1050_v31  ;;  %v1280_v42 = vrot.slane %v933_v38, %v6685_v55  ;;  %v1255_v31 = vrot.slane %v934_v34, %v6686_v1 }
 0x1bb   :  { %1178 = vmatpush2.bf16.msra.mxu0 %v985_v13  ;;  %1221 = vmatpush2.bf16.msra.mxu1 %v1049_v51 }
 0x1bc   :  { %1179 = vmatprep.subr.bf16.mxu0 %v982_v45  ;;  %1222 = vmatprep.subr.bf16.mxu1 %v1046_v12  ;;  %v1284_v45 = vrot.slane %v933_v38, %v6686_v1 }
 0x1bf   :  { %1180 = vmatpush2.bf16.msra.mxu0 %v981_v18  ;;  %1223 = vmatpush2.bf16.msra.mxu1 %v1045_v50 }
 0x1c0   :  { %1181 = vmatprep.subr.bf16.mxu0 %v978_v3  ;;  %1224 = vmatprep.subr.bf16.mxu1 %v1042_v63 }
 0x1c3   :  { %1182 = vmatpush2.bf16.msra.mxu0 %v977_v41  ;;  %1225 = vmatpush2.bf16.msra.mxu1 %v1041_v35 }
 0x1c4   :  { %1183 = vmatprep.subr.bf16.mxu0 %v974_v7  ;;  %1226 = vmatprep.subr.bf16.mxu1 %v1038_v15 }
 0x1c7   :  { %1184 = vmatpush2.bf16.msra.mxu0 %v973_v8  ;;  %1227 = vmatpush2.bf16.msra.mxu1 %v1037_v40 }
 0x1ca   :  { %1186 = vmatmul.mubr.bf16.vlgmr.msra.gmra.mxu0 %v6157_v62  ;;  %1229 = vmatmul.mubr.bf16.vlgmr.msra.gmra.mxu1 %v6161_v21 }
 0x24a   :  { %v1101_v5 = vpop.f32.mrf.mxu0  ;;  %v1144_v37 = vpop.f32.mrf.mxu1 }
 0x24b   :  { %v1145_v4 = vadd.f32 %v1144_v37, %v1101_v5 }
 0x24c   :  { %v1103_v62 = vpop.f32.mrf.mxu0  ;;  %v1146_v10 = vpop.f32.mrf.mxu1 }
 0x24d   :  { %v1260_v21 = vmul.f32 %v1243_v58, %v1145_v4  ;;  %v1147_v11 = vadd.f32 %v1146_v10, %v1103_v62 }
 0x24e   :  { %v1105_v22 = vpop.f32.mrf.mxu0  ;;  %v1148_v32 = vpop.f32.mrf.mxu1 }
 0x24f   :  { %v1289_v54 = vadd.f32 %v1272_v36, %v1260_v21  ;;  %v1261_v14 = vmul.f32 %v1247_v39, %v1147_v11  ;;  %v1149_v43 = vadd.f32 %v1148_v32, %v1105_v22 }
 0x250   :  { %v1107_v46 = vpop.f32.mrf.mxu0  ;;  %v1150_v30 = vpop.f32.mrf.mxu1 }
 0x251   :  { %vm1297_vm9 = vcmp.gt.f32.partialorder %v1289_v54, 0.0  ;;  %v1305_v29 = vmul.f32 0.01, %v1289_v54  ;;  %v1290_v61 = vadd.f32 %v1276_v33, %v1261_v14  ;;  %v1264_v28 = vmul.f32 %v1243_v58, %v1149_v43 }
 0x252   :  { %v1151_v60 = vadd.f32 %v1150_v30, %v1107_v46 }
 0x253   :  { %v6241_v17 = vsel %vm1297_vm9, %v1289_v54, %v1305_v29  ;;  %vm1298_vm10 = vcmp.gt.f32.partialorder %v1290_v61, 0.0  ;;  %v1306_v49 = vmul.f32 0.01, %v1290_v61  ;;  %v1293_v47 = vadd.f32 %v1272_v36, %v1264_v28 }
 0x254   :  { %v1265_v16 = vmul.f32 %v1247_v39, %v1151_v60 }
 0x255   :  { %v1314_v25 = vsel %vm1298_vm10, %v1290_v61, %v1306_v49  ;;  %vm1301_vm11 = vcmp.gt.f32.partialorder %v1293_v47, 0.0  ;;  %v1309_v57 = vmul.f32 0.01, %v1293_v47 }
 0x256   :  { %v1294_v24 = vadd.f32 %v1276_v33, %v1265_v16 }
 0x257   :  { %v6243_v56 = vsel %vm1301_vm11, %v1293_v47, %v1309_v57 }
 0x258   :  { %vm1302_vm12 = vcmp.gt.f32.partialorder %v1294_v24, 0.0  ;;  %v1310_v48 = vmul.f32 0.01, %v1294_v24 }
 0x25a   :  { %v1318_v27 = vsel %vm1302_vm12, %v1294_v24, %v1310_v48 }
 0x28a   :  { %v1187_v52 = vpop.f32.mrf.mxu0  ;;  %v1230_v53 = vpop.f32.mrf.mxu1 }
 0x28b   :  { %v1231_v0 = vadd.f32 %v1230_v53, %v1187_v52 }
 0x28c   :  { %v1189_v6 = vpop.f32.mrf.mxu0  ;;  %v1232_v13 = vpop.f32.mrf.mxu1 }
 0x28d   :  { %v1262_v19 = vmul.f32 %v1251_v20, %v1231_v0  ;;  %v1233_v51 = vadd.f32 %v1232_v13, %v1189_v6 }
 0x28e   :  { %v1191_v12 = vpop.f32.mrf.mxu0  ;;  %v1234_v18 = vpop.f32.mrf.mxu1 }
 0x28f   :  { %v1291_v50 = vadd.f32 %v1280_v42, %v1262_v19  ;;  %v1263_v59 = vmul.f32 %v1255_v31, %v1233_v51  ;;  %v1235_v3 = vadd.f32 %v1234_v18, %v1191_v12 }
 0x290   :  { %v1193_v44 = vpop.f32.mrf.mxu0  ;;  %v1236_v63 = vpop.f32.mrf.mxu1 }
 0x291   :  { %vm1299_vm13 = vcmp.gt.f32.partialorder %v1291_v50, 0.0  ;;  %v1307_v9 = vmul.f32 0.01, %v1291_v50  ;;  %v1292_v41 = vadd.f32 %v1284_v45, %v1263_v59  ;;  %v1266_v23 = vmul.f32 %v1251_v20, %v1235_v3 }
 0x292   :  { %v1237_v35 = vadd.f32 %v1236_v63, %v1193_v44 }
 0x293   :  { %v6249_v7 = vsel %vm1299_vm13, %v1291_v50, %v1307_v9  ;;  %vm1300_vm14 = vcmp.gt.f32.partialorder %v1292_v41, 0.0  ;;  %v1308_v15 = vmul.f32 0.01, %v1292_v41  ;;  %v1295_v8 = vadd.f32 %v1280_v42, %v1266_v23 }
 0x294   :  { %v1267_v40 = vmul.f32 %v1255_v31, %v1237_v35 }
 0x295   :  { %v1316_v34 = vsel %vm1300_vm14, %v1292_v41, %v1308_v15  ;;  %vm1303_vm15 = vcmp.gt.f32.partialorder %v1295_v8, 0.0  ;;  %v1311_v38 = vmul.f32 0.01, %v1295_v8 }
 0x296   :  { %v1296_v58 = vadd.f32 %v1284_v45, %v1267_v40 }
 0x297   :  { %v6251_v5 = vsel %vm1303_vm15, %v1295_v8, %v1311_v38 }
 0x298   :  { %vm1304_vm0 = vcmp.gt.f32.partialorder %v1296_v58, 0.0  ;;  %v1312_v37 = vmul.f32 0.01, %v1296_v58 }
 0x29a   :  { %v1320_v4 = vsel %vm1304_vm0, %v1296_v58, %v1312_v37 }
 0x29b   :  { %5290 = dma.done.wait [#allocation14 + $0x2], 4096 }
 0x29c   :  { %5291 = vsyncadd [#allocation14 + $0x2], 4294963200  ;;  %v1359_v36 = vpack.c.bf16 %v1318_v27, %v1314_v25  ;;  %v1361_v39 = vpack.c.bf16 %v1320_v4, %v1316_v34  ;;  %v1331_v62 = vld [vmem:[#allocation4 + $0x38] sm:$0xff]  ;;  %v1330_v21 = vld [vmem:[#allocation4 + $0x30] sm:$0xff] }
 0x29d   :  { %v1347_v10 = vld [vmem:[#allocation4 + $0xb8] sm:$0xff]  ;;  %v1375_v11 = vunpack.c.l.s8.bf16 %v1331_v62  ;;  %v1377_v33 = vunpack.c.h.s8.bf16 %v1331_v62  ;;  %v1346_v54 = vld [vmem:[#allocation4 + $0xb0] sm:$0xff]  ;;  %v1376_v14 = vunpack.c.h.s8.bf16 %v1330_v21  ;;  %v1329_v46 = vld [vmem:[#allocation4 + $0x28] sm:$0xff]  ;;  %v1374_v29 = vunpack.c.l.s8.bf16 %v1330_v21 }
 0x29e   :  { %1458 = vmatprep.mubr.bf16.mxu0 %v1359_v36  ;;  %1501 = vmatprep.mubr.bf16.mxu1 %v1361_v39  ;;  %v1407_v22 = vunpack.c.l.s8.bf16 %v1347_v10  ;;  %v1409_v32 = vunpack.c.h.s8.bf16 %v1347_v10  ;;  %v1408_v43 = vunpack.c.h.s8.bf16 %v1346_v54  ;;  %v1345_v30 = vld [vmem:[#allocation4 + $0xa8] sm:$0xff]  ;;  %v1406_v61 = vunpack.c.l.s8.bf16 %v1346_v54  ;;  %v1328_v49 = vld [vmem:[#allocation4 + $0x20] sm:$0xff]  ;;  %v1327_v48 = vld [vmem:[#allocation4 + $0x18] sm:$0xff] }
 0x29f   :  { %1426 = vmatprep.subr.bf16.mxu0 %v1377_v33  ;;  %v1373_v28 = vunpack.c.h.s8.bf16 %v1329_v46  ;;  %v1405_v60 = vunpack.c.h.s8.bf16 %v1345_v30  ;;  %v1344_v47 = vld [vmem:[#allocation4 + $0xa0] sm:$0xff]  ;;  %v1372_v16 = vunpack.c.h.s8.bf16 %v1328_v49  ;;  %v1371_v57 = vunpack.c.l.s8.bf16 %v1329_v46  ;;  %v1343_v27 = vld [vmem:[#allocation4 + $0x98] sm:$0xff]  ;;  %v1326_v42 = vld [vmem:[#allocation4 + $0x10] sm:$0xff] }
 0x2a0   :  { %1469 = vmatprep.subr.bf16.mxu1 %v1409_v32  ;;  %1427 = vmatpush1.bf16.msra.mxu0 %v1376_v14  ;;  %v1404_v25 = vunpack.c.h.s8.bf16 %v1344_v47  ;;  %v1403_v24 = vunpack.c.l.s8.bf16 %v1345_v30  ;;  %v1370_v20 = vunpack.c.l.s8.bf16 %v1328_v49  ;;  %v1402_v52 = vunpack.c.l.s8.bf16 %v1344_v47  ;;  %v1342_v31 = vld [vmem:[#allocation4 + $0x90] sm:$0xff]  ;;  %v1325_v45 = vld [vmem:[#allocation4 + $0x8] sm:$0xff]  ;;  %v1324_v44 = vld [vmem:[#allocation4] sm:$0xff] }
 0x2a1   :  { %1470 = vmatpush1.bf16.msra.mxu1 %v1408_v43  ;;  %1428 = vmatprep.subr.bf16.mxu0 %v1375_v11  ;;  %v1369_v53 = vunpack.c.h.s8.bf16 %v1327_v48  ;;  %v1401_v0 = vunpack.c.h.s8.bf16 %v1343_v27  ;;  %v1368_v6 = vunpack.c.h.s8.bf16 %v1326_v42  ;;  %v1400_v13 = vunpack.c.h.s8.bf16 %v1342_v31  ;;  %v1341_v12 = vld [vmem:[#allocation4 + $0x88] sm:$0xff]  ;;  %v1340_v63 = vld [vmem:[#allocation4 + $0x80] sm:$0xff]  ;;  %v1339_v15 = vld [vmem:[#allocation4 + $0x78] sm:$0xff] }
 0x2a2   :  { %1471 = vmatprep.subr.bf16.mxu1 %v1407_v22  ;;  %v1367_v19 = vunpack.c.l.s8.bf16 %v1327_v48  ;;  %v1399_v51 = vunpack.c.l.s8.bf16 %v1343_v27  ;;  %v1366_v18 = vunpack.c.l.s8.bf16 %v1326_v42  ;;  %v1398_v50 = vunpack.c.l.s8.bf16 %v1342_v31  ;;  %v1355_v8 = vld [vmem:[#allocation4 + $0xf8] sm:$0xff]  ;;  %v1338_v37 = vld [vmem:[#allocation4 + $0x70] sm:$0xff]  ;;  %v1337_v21 = vld [vmem:[#allocation4 + $0x68] sm:$0xff] }
 0x2a3   :  { %v1365_v59 = vunpack.c.h.s8.bf16 %v1325_v45  ;;  %v1397_v3 = vunpack.c.h.s8.bf16 %v1341_v12  ;;  %v1364_v9 = vunpack.c.h.s8.bf16 %v1324_v44  ;;  %v1396_v41 = vunpack.c.h.s8.bf16 %v1340_v63  ;;  %v1354_v4 = vld [vmem:[#allocation4 + $0xf0] sm:$0xff]  ;;  %v1353_v11 = vld [vmem:[#allocation4 + $0xe8] sm:$0xff]  ;;  %v1336_v14 = vld [vmem:[#allocation4 + $0x60] sm:$0xff] }
 0x2a4   :  { %1429 = vmatpush1.bf16.msra.mxu0 %v1374_v29  ;;  %v1363_v23 = vunpack.c.l.s8.bf16 %v1325_v45  ;;  %v1395_v35 = vunpack.c.l.s8.bf16 %v1341_v12  ;;  %v1362_v40 = vunpack.c.l.s8.bf16 %v1324_v44  ;;  %v1394_v34 = vunpack.c.l.s8.bf16 %v1340_v63  ;;  %v1352_v43 = vld [vmem:[#allocation4 + $0xe0] sm:$0xff] }
 0x2a5   :  { %1472 = vmatpush1.bf16.msra.mxu1 %v1406_v61  ;;  %1430 = vmatprep.subr.bf16.mxu0 %v1373_v28  ;;  %v1393_v38 = vunpack.c.h.s8.bf16 %v1339_v15  ;;  %v1425_v58 = vunpack.c.h.s8.bf16 %v1355_v8  ;;  %v1392_v36 = vunpack.c.h.s8.bf16 %v1338_v37  ;;  %v1424_v39 = vunpack.c.h.s8.bf16 %v1354_v4  ;;  %v1335_v28 = vld [vmem:[#allocation4 + $0x58] sm:$0xff] }
 0x2a6   :  { %1473 = vmatprep.subr.bf16.mxu1 %v1405_v60  ;;  %v1391_v62 = vunpack.c.l.s8.bf16 %v1339_v15  ;;  %v1423_v10 = vunpack.c.l.s8.bf16 %v1355_v8  ;;  %v1390_v33 = vunpack.c.l.s8.bf16 %v1338_v37  ;;  %v1422_v22 = vunpack.c.l.s8.bf16 %v1354_v4  ;;  %v1351_v60 = vld [vmem:[#allocation4 + $0xd8] sm:$0xff] }
 0x2a7   :  { %v1389_v32 = vunpack.c.h.s8.bf16 %v1337_v21  ;;  %v1421_v54 = vunpack.c.h.s8.bf16 %v1353_v11  ;;  %v1388_v46 = vunpack.c.h.s8.bf16 %v1336_v14  ;;  %v1420_v30 = vunpack.c.h.s8.bf16 %v1352_v43 }
 0x2a8   :  { %1431 = vmatpush1.bf16.msra.mxu0 %v1372_v16  ;;  %v1387_v29 = vunpack.c.l.s8.bf16 %v1337_v21  ;;  %v1419_v61 = vunpack.c.l.s8.bf16 %v1353_v11  ;;  %v1386_v49 = vunpack.c.l.s8.bf16 %v1336_v14  ;;  %v1418_v47 = vunpack.c.l.s8.bf16 %v1352_v43 }
 0x2a9   :  { %1474 = vmatpush1.bf16.msra.mxu1 %v1404_v25  ;;  %1432 = vmatprep.subr.bf16.mxu0 %v1371_v57  ;;  %v1385_v16 = vunpack.c.h.s8.bf16 %v1335_v28  ;;  %v1417_v25 = vunpack.c.h.s8.bf16 %v1351_v60  ;;  %v1334_v57 = vld [vmem:[#allocation4 + $0x50] sm:$0xff]  ;;  %v1358_v44 = vpack.c.bf16 %v6243_v56, %v6241_v17  ;;  %v1360_v63 = vpack.c.bf16 %v6251_v5, %v6249_v7 }
 0x2aa   :  { %1475 = vmatprep.subr.bf16.mxu1 %v1403_v24  ;;  %v1350_v24 = vld [vmem:[#allocation4 + $0xd0] sm:$0xff]  ;;  %v1384_v48 = vunpack.c.h.s8.bf16 %v1334_v57  ;;  %v1382_v42 = vunpack.c.l.s8.bf16 %v1334_v57 }
 0x2ab   :  { %v1416_v27 = vunpack.c.h.s8.bf16 %v1350_v24  ;;  %v1414_v31 = vunpack.c.l.s8.bf16 %v1350_v24 }
 0x2ac   :  { %1433 = vmatpush1.bf16.msra.mxu0 %v1370_v20  ;;  %v1383_v20 = vunpack.c.l.s8.bf16 %v1335_v28 }
 0x2ad   :  { %1476 = vmatpush1.bf16.msra.mxu1 %v1402_v52  ;;  %1434 = vmatprep.subr.bf16.mxu0 %v1369_v53  ;;  %v1415_v52 = vunpack.c.l.s8.bf16 %v1351_v60  ;;  %v1333_v53 = vld [vmem:[#allocation4 + $0x48] sm:$0xff] }
 0x2ae   :  { %1477 = vmatprep.subr.bf16.mxu1 %v1401_v0  ;;  %v1349_v0 = vld [vmem:[#allocation4 + $0xc8] sm:$0xff] }
 0x2b0   :  { %1435 = vmatpush1.bf16.msra.mxu0 %v1368_v6  ;;  %v1381_v6 = vunpack.c.h.s8.bf16 %v1333_v53 }
 0x2b1   :  { %1478 = vmatpush1.bf16.msra.mxu1 %v1400_v13  ;;  %1436 = vmatprep.subr.bf16.mxu0 %v1367_v19  ;;  %v1413_v13 = vunpack.c.h.s8.bf16 %v1349_v0  ;;  %v1332_v19 = vld [vmem:[#allocation4 + $0x40] sm:$0xff] }
 0x2b2   :  { %1479 = vmatprep.subr.bf16.mxu1 %v1399_v51  ;;  %v1348_v51 = vld [vmem:[#allocation4 + $0xc0] sm:$0xff]  ;;  %v1380_v45 = vunpack.c.h.s8.bf16 %v1332_v19 }
 0x2b3   :  { %v1412_v12 = vunpack.c.h.s8.bf16 %v1348_v51 }
 0x2b4   :  { %1437 = vmatpush1.bf16.msra.mxu0 %v1366_v18  ;;  %v1379_v18 = vunpack.c.l.s8.bf16 %v1333_v53 }
 0x2b5   :  { %1480 = vmatpush1.bf16.msra.mxu1 %v1398_v50  ;;  %1438 = vmatprep.subr.bf16.mxu0 %v1365_v59  ;;  %v1411_v50 = vunpack.c.l.s8.bf16 %v1349_v0  ;;  %v1378_v59 = vunpack.c.l.s8.bf16 %v1332_v19 }
 0x2b6   :  { %1481 = vmatprep.subr.bf16.mxu1 %v1397_v3  ;;  %v1410_v3 = vunpack.c.l.s8.bf16 %v1348_v51 }
 0x2b8   :  { %1439 = vmatpush1.bf16.msra.mxu0 %v1364_v9  ;;  %v1357_v9 = vld [vmem:[%s6555_s4 + $0xe] sm:$0x3] }
 0x2b9   :  { %1482 = vmatpush1.bf16.msra.mxu1 %v1396_v41  ;;  %1440 = vmatprep.subr.bf16.mxu0 %v1363_v23  ;;  %v1356_v41 = vld [vmem:[%s6555_s4 + $0xc] sm:$0x3]  ;;  %v1516_v23 = vrot.slane %v1357_v9, %v6683_v2  ;;  %v1520_v7 = vrot.slane %v1357_v9, %v6684_v26 }
 0x2ba   :  { %1483 = vmatprep.subr.bf16.mxu1 %v1395_v35  ;;  %v1531_v56 = vrot.slane %v1356_v41, %v6683_v2 }
 0x2bc   :  { %1441 = vmatpush1.bf16.msra.mxu0 %v1362_v40 }
 0x2bd   :  { %1484 = vmatpush1.bf16.msra.mxu1 %v1394_v34  ;;  %1442 = vmatprep.subr.bf16.mxu0 %v1393_v38  ;;  %v1535_v38 = vrot.slane %v1356_v41, %v6684_v26 }
 0x2be   :  { %1485 = vmatprep.subr.bf16.mxu1 %v1425_v58 }
 0x2c0   :  { %1443 = vmatpush2.bf16.msra.mxu0 %v1392_v36 }
 0x2c1   :  { %1486 = vmatpush2.bf16.msra.mxu1 %v1424_v39  ;;  %1444 = vmatprep.subr.bf16.mxu0 %v1391_v62 }
 0x2c2   :  { %1487 = vmatprep.subr.bf16.mxu1 %v1423_v10 }
 0x2c4   :  { %1445 = vmatpush2.bf16.msra.mxu0 %v1390_v33 }
 0x2c5   :  { %1488 = vmatpush2.bf16.msra.mxu1 %v1422_v22  ;;  %1446 = vmatprep.subr.bf16.mxu0 %v1389_v32 }
 0x2c6   :  { %1489 = vmatprep.subr.bf16.mxu1 %v1421_v54 }
 0x2c8   :  { %1447 = vmatpush2.bf16.msra.mxu0 %v1388_v46 }
 0x2c9   :  { %1490 = vmatpush2.bf16.msra.mxu1 %v1420_v30  ;;  %1448 = vmatprep.subr.bf16.mxu0 %v1387_v29 }
 0x2ca   :  { %1491 = vmatprep.subr.bf16.mxu1 %v1419_v61 }
 0x2cc   :  { %1449 = vmatpush2.bf16.msra.mxu0 %v1386_v49 }
 0x2cd   :  { %1492 = vmatpush2.bf16.msra.mxu1 %v1418_v47  ;;  %1450 = vmatprep.subr.bf16.mxu0 %v1385_v16 }
 0x2ce   :  { %1493 = vmatprep.subr.bf16.mxu1 %v1417_v25 }
 0x2d0   :  { %1451 = vmatpush2.bf16.msra.mxu0 %v1384_v48 }
 0x2d1   :  { %1494 = vmatpush2.bf16.msra.mxu1 %v1416_v27  ;;  %1452 = vmatprep.subr.bf16.mxu0 %v1383_v20 }
 0x2d2   :  { %1495 = vmatprep.subr.bf16.mxu1 %v1415_v52 }
 0x2d4   :  { %1453 = vmatpush2.bf16.msra.mxu0 %v1382_v42 }
 0x2d5   :  { %1496 = vmatpush2.bf16.msra.mxu1 %v1414_v31  ;;  %1454 = vmatprep.subr.bf16.mxu0 %v1381_v6 }
 0x2d6   :  { %1497 = vmatprep.subr.bf16.mxu1 %v1413_v13 }
 0x2d8   :  { %1455 = vmatpush2.bf16.msra.mxu0 %v1380_v45 }
 0x2d9   :  { %1498 = vmatpush2.bf16.msra.mxu1 %v1412_v12  ;;  %1456 = vmatprep.subr.bf16.mxu0 %v1379_v18 }
 0x2da   :  { %1499 = vmatprep.subr.bf16.mxu1 %v1411_v50 }
 0x2dc   :  { %1457 = vmatpush2.bf16.msra.mxu0 %v1378_v59 }
 0x2dd   :  { %1500 = vmatpush2.bf16.msra.mxu1 %v1410_v3 }
 0x2df   :  { %1459 = vmatmul.mubr.bf16.vlgmr.msra.gmra.mxu0 %v1358_v44 }
 0x2e0   :  { %1502 = vmatmul.mubr.bf16.vlgmr.msra.gmra.mxu1 %v1360_v63 }
 0x39f   :  { %v1460_v35 = vpop.f32.mrf.mxu0 }
 0x3a0   :  { %v1503_v15 = vpop.f32.mrf.mxu1 }
 0x3a1   :  { %v1504_v17 = vadd.f32 %v1503_v15, %v1460_v35  ;;  %v1462_v5 = vpop.f32.mrf.mxu0 }
 0x3a2   :  { %v1505_v8 = vpop.f32.mrf.mxu1 }
 0x3a3   :  { %v1523_v40 = vmul.f32 %v1516_v23, %v1504_v17  ;;  %v1506_v34 = vadd.f32 %v1505_v8, %v1462_v5  ;;  %v1464_v58 = vpop.f32.mrf.mxu0 }
 0x3a4   :  { %v1507_v37 = vpop.f32.mrf.mxu1 }
 0x3a5   :  { %v1538_v4 = vadd.f32 %v1531_v56, %v1523_v40  ;;  %v1524_v36 = vmul.f32 %v1520_v7, %v1506_v34  ;;  %v1508_v39 = vadd.f32 %v1507_v37, %v1464_v58  ;;  %v1466_v62 = vpop.f32.mrf.mxu0 }
 0x3a6   :  { %v1509_v10 = vpop.f32.mrf.mxu1 }
 0x3a7   :  { %vm1542_vm1 = vcmp.gt.f32.partialorder %v1538_v4, 0.0  ;;  %v1546_v21 = vmul.f32 0.01, %v1538_v4  ;;  %v1539_v11 = vadd.f32 %v1535_v38, %v1524_v36  ;;  %v1525_v33 = vmul.f32 %v1516_v23, %v1508_v39 }
 0x3a8   :  { %v1510_v22 = vadd.f32 %v1509_v10, %v1466_v62 }
 0x3a9   :  { %v1550_v32 = vsel %vm1542_vm1, %v1538_v4, %v1546_v21  ;;  %vm1543_vm2 = vcmp.gt.f32.partialorder %v1539_v11, 0.0  ;;  %v1547_v54 = vmul.f32 0.01, %v1539_v11  ;;  %v1540_v14 = vadd.f32 %v1531_v56, %v1525_v33 }
 0x3aa   :  { %v1526_v43 = vmul.f32 %v1520_v7, %v1510_v22 }
 0x3ab   :  { %v1551_v46 = vsel %vm1543_vm2, %v1539_v11, %v1547_v54  ;;  %vm1544_vm3 = vcmp.gt.f32.partialorder %v1540_v14, 0.0  ;;  %v1548_v30 = vmul.f32 0.01, %v1540_v14 }
 0x3ac   :  { %v1541_v29 = vadd.f32 %v1535_v38, %v1526_v43 }
 0x3ad   :  { %v1552_v61 = vsel %vm1544_vm3, %v1540_v14, %v1548_v30 }
 0x3ae   :  { %vm1545_vm4 = vcmp.gt.f32.partialorder %v1541_v29, 0.0  ;;  %v1549_v28 = vmul.f32 0.01, %v1541_v29 }
 0x3b0   :  { %v1553_v60 = vsel %vm1545_vm4, %v1541_v29, %v1549_v28 }
 0x3b1   :  { %5292 = dma.done.wait [#allocation14 + $0x3], 2048 }
 0x3b2   :  { %5293 = vsyncadd [#allocation14 + $0x3], 4294965248  ;;  %s6687_s19 = sld [smem:[#allocation85_spill]]  ;;  %vm1752_vm5 = vcmask 64512   ;;  %v5086_v57 = vld [vmem:[#allocation5 + $0x78] sm:$0xff]   ;;  %v5088_v27 = vld [vmem:[#allocation5 + $0x70] sm:$0xff]   ;;  %v1592_v13 = vpack.c.bf16 %v1553_v60, %v1551_v46  ;;  %v1591_v44 = vpack.c.bf16 %v1552_v61, %v1550_v32 }
 0x3b3   :  { %v5087_v24 = vld [vmem:[#allocation5 + $0x38] sm:$0xff]   ;;  %4952 = vmatprep.subr.bf16.mxu0 %v5086_v57  ;;  %v5089_v20 = vld [vmem:[#allocation5 + $0x30] sm:$0xff]   ;;  %v5090_v53 = vld [vmem:[#allocation5 + $0x68] sm:$0xff]   ;;  %v5317_v45 = vmov 0.0   ;;  %vm5318_vm6 = vmmov 0   ;;  %vm1855_vm7 = vcmask 1043456  }
 0x3b4   :  { %4953 = vmatpush3.bf16.msra.mxu0 %v5087_v24  ;;  %v5091_v0 = vld [vmem:[#allocation5 + $0x28] sm:$0xff]   ;;  %v5092_v42 = vld [vmem:[#allocation5 + $0x60] sm:$0xff]   ;;  %v5094_v6 = vld [vmem:[#allocation5 + $0x58] sm:$0xff]   ;;  %1727 = vmatprep.mubr.bf16.mxu0 %v1592_v13  ;;  %v6689_v28 = vmov 0  }
 0x3b5   :  { %4954 = vmatprep.subr.bf16.mxu0 %v5088_v27  ;;  %v5093_v31 = vld [vmem:[#allocation5 + $0x20] sm:$0xff]   ;;  %v5095_v19 = vld [vmem:[#allocation5 + $0x18] sm:$0xff]   ;;  %v5096_v51 = vld [vmem:[#allocation5 + $0x50] sm:$0xff]   ;;  %5066 = vmatprep.subr.bf16.mxu1 %v5317_v45 }
 0x3b6   :  { %v5097_v12 = vld [vmem:[#allocation5 + $0x10] sm:$0xff]   ;;  %v5098_v18 = vld [vmem:[#allocation5 + $0x48] sm:$0xff]   ;;  %v5100_v59 = vld [vmem:[#allocation5 + $0x40] sm:$0xff]   ;;  %5068 = vmatprep.mubr.msk.bf16.mxu1 %vm5318_vm6, %v5317_v45 }
 0x3b7   :  { %v5099_v50 = vld [vmem:[#allocation5 + $0x8] sm:$0xff]   ;;  %v5101_v3 = vld [vmem:[#allocation5] sm:$0xff]   ;;  %v4836_v8 = vld [vmem:[%s6555_s4 + $0x10] ss:$0 sm:$0xff] }
 0x3b8   :  { %v1748_v49 = vld [vmem:[%s6687_s19] sm:$0xff]  ;;  %v1749_v47 = vld [vmem:[%s6687_s19 + $0x8] sm:$0xff]  ;;  %4955 = vmatpush3.bf16.msra.mxu0 %v5089_v20  ;;  %v6688_v30 = vld [vmem:[#allocation74_spill] sm:$0xff] }
 0x3b9   :  { %v1750_v16 = vmul.f32 %v1748_v49, %v1748_v49  ;;  %v1751_v25 = vmul.f32 %v1749_v47, %v1749_v47  ;;  %4956 = vmatprep.subr.bf16.mxu0 %v5090_v53  ;;  %v4857_v29 = vcombine.high %v6688_v30, %v6688_v30  ;;  %v4856_v61 = vcombine.low %v6688_v30, %v6688_v30 }
 0x3bb   :  { %v1753_v48 = vsel %vm1752_vm5, %v1750_v16, 0.0  ;;  %v1756_v52 = vsel %vm1752_vm5, %v1751_v25, 0.0 }
 0x3bc   :  { %1754 = vadd.xlane.f32.xlu0 %v1753_v48  ;;  %4957 = vmatpush3.bf16.msra.mxu0 %v5091_v0 }
 0x3bd   :  { %4958 = vmatprep.subr.bf16.mxu0 %v5092_v42 }
 0x3c0   :  { %1757 = vadd.xlane.f32.xlu0 %v1756_v52  ;;  %4959 = vmatpush3.bf16.msra.mxu0 %v5093_v31 }
 0x3c1   :  { %4960 = vmatprep.subr.bf16.mxu0 %v5094_v6 }
 0x3c4   :  { %4961 = vmatpush3.bf16.msra.mxu0 %v5095_v19 }
 0x3c5   :  { %4962 = vmatprep.subr.bf16.mxu0 %v5096_v51 }
 0x3c8   :  { %4963 = vmatpush3.bf16.msra.mxu0 %v5097_v12 }
 0x3c9   :  { %4964 = vmatprep.subr.bf16.mxu0 %v5098_v18 }
 0x3cc   :  { %4965 = vmatpush3.bf16.msra.mxu0 %v5099_v50 }
 0x3cd   :  { %4966 = vmatprep.subr.bf16.mxu0 %v5100_v59 }
 0x3d0   :  { %4967 = vmatpush3.bf16.msra.mxu0 %v5101_v3 }
 0x3d3   :  { %1728 = vmatmul.mubr.bf16.vlgmr.msra.gmra.mxu0 %v1591_v44 }
 0x445   :  { %v1755_v63 = vpop.xlane.xlu0 %1754 }
 0x446   :  { %5102 = vrsqrt.f32 %v1755_v63 }
 0x449   :  { %v1758_v9 = vpop.xlane.xlu0 %1757 }
 0x44a   :  { %5104 = vrsqrt.f32 %v1758_v9 }
 0x453   :  { %v5103_v41 = vpop.eup %5102 }
 0x454   :  { %v1761_v35 = vmul.f32 %v5103_v41, %v1748_v49 }
 0x457   :  { %v5105_v23 = vpop.eup %5104 }
 0x458   :  { %v1762_v15 = vmul.f32 %v5105_v23, %v1749_v47 }
 0x45a   :  { %v1763_v17 = vpack.c.bf16 %v1762_v15, %v1761_v35 }
 0x45c   :  { %v1765_v56 = vrot.slane %v1763_v17, 4 }
 0x45e   :  { %v1770_v7 = vsel %vm1752_vm5, %v1765_v56, 0 }
 0x45f   :  { %5067 = vmatpush3.bf16.xpose.msra.mxu1 %v1770_v7 }
 0x466   :  { %5069 = vmatmul.mubr.msk.bf16.vlgmr.msra.gmra.mxu1 %vm1752_vm5, %v1763_v17 }
 0x467   :  { %1900 = vmatprep.mubr.bf16.mxu1 %v6689_v28 }
 0x493   :  { %v4968_v5 = vpop.f32.mrf.mxu0 }
 0x495   :  { %v4969_v40 = vpop.f32.mrf.mxu0 }
 0x496   :  { %v4970_v34 = vadd.f32 %v4969_v40, %v4968_v5 }
 0x497   :  { %v4971_v38 = vpop.f32.mrf.mxu0 }
 0x498   :  { %v1730_v58 = vadd.f32 %v4970_v34, %v4836_v8 }
 0x499   :  { %v4972_v37 = vpop.f32.mrf.mxu0 }
 0x49a   :  { %v4853_v4 = vmul.f32 -1.442695, %v1730_v58  ;;  %v4973_v36 = vadd.f32 %v4972_v37, %v4971_v38 }
 0x49c   :  { %5106 = vpow2.f32 %v4853_v4  ;;  %v1733_v39 = vadd.f32 %v4973_v36, %v4836_v8 }
 0x49e   :  { %v4854_v62 = vmul.f32 -1.442695, %v1733_v39 }
 0x4a0   :  { %5108 = vpow2.f32 %v4854_v62 }
 0x4a9   :  { %v5107_v10 = vpop.eup %5106 }
 0x4aa   :  { %v1742_v21 = vadd.f32 1.0, %v5107_v10 }
 0x4ac   :  { %5110 = vrcp.f32 %v1742_v21 }
 0x4ad   :  { %v5109_v11 = vpop.eup %5108 }
 0x4ae   :  { %v1743_v33 = vadd.f32 1.0, %v5109_v11 }
 0x4b0   :  { %5112 = vrcp.f32 %v1743_v33 }
 0x4b9   :  { %v6283_v22 = vpop.eup %5110 }
 0x4bd   :  { %v6285_v32 = vpop.eup %5112 }
 0x526   :  { %v6287_v54 = vpop.f32.mrf.mxu1 }
 0x528   :  { %v5070_v14 = vpop.f32.mrf.mxu1 }
 0x52a   :  { %v6289_v43 = vpop.f32.mrf.mxu1 }
 0x52c   :  { %v5071_v46 = vpop.f32.mrf.mxu1 }
 0x52d   :  { %5294 = dma.done.wait [#allocation14 + $0x4], 256 }
 0x52e   :  { %5295 = vsyncadd [#allocation14 + $0x4], 4294967040  ;;  %v6690_v60 = vld [vmem:[#allocation75_spill] sm:$0xff]  ;;  %4860 = vmatprep.subr.msk.bf16.mxu1 %vm1855_vm7, %v4857_v29  ;;  %v1857_v16 = vsel %vm1855_vm7, %v4856_v61, 0  ;;  %v1820_v25 = vpack.c.bf16 %v6289_v43, %v6287_v54  ;;  %v1819_v24 = vld [vmem:[%s6555_s4 + $0x11] sm:$0xf] }
 0x52f   :  { %v4859_v49 = vcombine.high %v6690_v60, %v6690_v60  ;;  %v4858_v47 = vcombine.low %v6690_v60, %v6690_v60  ;;  %1883 = vmatpush1.bf16.msra.mxu1 %v1857_v16  ;;  %v1825_v48 = vrot.slane %v1819_v24, %v6683_v2  ;;  %v1829_v27 = vrot.slane %v1819_v24, %v6684_v26 }
 0x530   :  { %v1833_v6 = vrot.slane %v1819_v24, %v6685_v55  ;;  %v1837_v18 = vrot.slane %v1819_v24, %v6686_v1 }
 0x531   :  { %4862 = vmatprep.subr.msk.bf16.mxu1 %vm1855_vm7, %v4859_v49  ;;  %v1863_v57 = vsel %vm1855_vm7, %v4858_v47, 0 }
 0x532   :  { %4861 = vmatmul.mubr.msk.bf16.vlgmr.msra.gmra.mxu1 %vm1752_vm5, %v1820_v25 }
 0x533   :  { %1926 = vmatpush1.bf16.msra.mxu1 %v1863_v57  ;;  %1943 = vmatprep.mubr.bf16.mxu1 %v6689_v28 }
 0x53a   :  { %4863 = vmatmul.mubr.msk.bf16.vlgmr.msra.gmra.mxu1 %vm1752_vm5, %v1820_v25 }
 0x5f2   :  { %v1902_v20 = vpop.f32.mrf.mxu1 }
 0x5f3   :  { %v1903_v52 = vadd.f32 %v1902_v20, %v1825_v48 }
 0x5f4   :  { %v1904_v53 = vpop.f32.mrf.mxu1 }
 0x5f5   :  { %vm1954_vm8 = vcmp.gt.f32.partialorder %v1903_v52, 0.0  ;;  %v1962_v0 = vmul.f32 0.01, %v1903_v52  ;;  %v1905_v42 = vadd.f32 %v1904_v53, %v1829_v27 }
 0x5f6   :  { %v1906_v31 = vpop.f32.mrf.mxu1 }
 0x5f7   :  { %v6315_v13 = vsel %vm1954_vm8, %v1903_v52, %v1962_v0  ;;  %vm1955_vm9 = vcmp.gt.f32.partialorder %v1905_v42, 0.0  ;;  %v1963_v19 = vmul.f32 0.01, %v1905_v42  ;;  %v1907_v51 = vadd.f32 %v1906_v31, %v1825_v48 }
 0x5f8   :  { %v1908_v12 = vpop.f32.mrf.mxu1 }
 0x5f9   :  { %v1971_v50 = vsel %vm1955_vm9, %v1905_v42, %v1963_v19  ;;  %vm1958_vm10 = vcmp.gt.f32.partialorder %v1907_v51, 0.0  ;;  %v1966_v59 = vmul.f32 0.01, %v1907_v51  ;;  %v1909_v3 = vadd.f32 %v1908_v12, %v1829_v27 }
 0x5fa   :  { %v1945_v44 = vpop.f32.mrf.mxu1 }
 0x5fb   :  { %v6318_v63 = vsel %vm1958_vm10, %v1907_v51, %v1966_v59  ;;  %vm1959_vm11 = vcmp.gt.f32.partialorder %v1909_v3, 0.0  ;;  %v1967_v9 = vmul.f32 0.01, %v1909_v3  ;;  %v1946_v41 = vadd.f32 %v1945_v44, %v1833_v6 }
 0x5fc   :  { %v1947_v23 = vpop.f32.mrf.mxu1 }
 0x5fd   :  { %v1975_v35 = vsel %vm1959_vm11, %v1909_v3, %v1967_v9  ;;  %vm1956_vm12 = vcmp.gt.f32.partialorder %v1946_v41, 0.0  ;;  %v1964_v15 = vmul.f32 0.01, %v1946_v41  ;;  %v1948_v17 = vadd.f32 %v1947_v23, %v1837_v18 }
 0x5fe   :  { %v1949_v56 = vpop.f32.mrf.mxu1 }
 0x5ff   :  { %v6320_v7 = vsel %vm1956_vm12, %v1946_v41, %v1964_v15  ;;  %vm1957_vm13 = vcmp.gt.f32.partialorder %v1948_v17, 0.0  ;;  %v1965_v5 = vmul.f32 0.01, %v1948_v17  ;;  %v1950_v8 = vadd.f32 %v1949_v56, %v1833_v6 }
 0x600   :  { %v1951_v40 = vpop.f32.mrf.mxu1 }
 0x601   :  { %v1973_v34 = vsel %vm1957_vm13, %v1948_v17, %v1965_v5  ;;  %vm1960_vm14 = vcmp.gt.f32.partialorder %v1950_v8, 0.0  ;;  %v1968_v38 = vmul.f32 0.01, %v1950_v8  ;;  %v1952_v58 = vadd.f32 %v1951_v40, %v1837_v18 }
 0x603   :  { %v6322_v37 = vsel %vm1960_vm14, %v1950_v8, %v1968_v38  ;;  %vm1961_vm15 = vcmp.gt.f32.partialorder %v1952_v58, 0.0  ;;  %v1969_v4 = vmul.f32 0.01, %v1952_v58 }
 0x605   :  { %v1977_v36 = vsel %vm1961_vm15, %v1952_v58, %v1969_v4 }
 0x606   :  { %5296 = dma.done.wait [#allocation14 + $0x5], 8192 }
 0x607   :  { %5297 = vsyncadd [#allocation14 + $0x5], 4294959104  ;;  %v6324_v39 = vpack.c.bf16 %v1975_v35, %v1971_v50  ;;  %v6326_v62 = vpack.c.bf16 %v1977_v36, %v1973_v34  ;;  %v1993_v10 = vld [vmem:[#allocation7 + $0x68] sm:$0xff]  ;;  %v1992_v11 = vld [vmem:[#allocation7 + $0x60] sm:$0xff] }
 0x608   :  { %v2025_v21 = vld [vmem:[#allocation7 + $0x168] sm:$0xff]  ;;  %v2075_v33 = vunpack.c.l.s8.bf16 %v1993_v10  ;;  %v2079_v14 = vunpack.c.h.s8.bf16 %v1993_v10  ;;  %v2024_v29 = vld [vmem:[#allocation7 + $0x160] sm:$0xff]  ;;  %v2078_v61 = vunpack.c.h.s8.bf16 %v1992_v11  ;;  %v2074_v16 = vunpack.c.l.s8.bf16 %v1992_v11 }
 0x609   :  { %2210 = vmatprep.mubr.bf16.mxu1 %v6324_v39  ;;  %2253 = vmatprep.mubr.bf16.mxu0 %v6326_v62  ;;  %v2139_v46 = vunpack.c.l.s8.bf16 %v2025_v21  ;;  %v2143_v30 = vunpack.c.h.s8.bf16 %v2025_v21  ;;  %v2142_v60 = vunpack.c.h.s8.bf16 %v2024_v29  ;;  %v1989_v49 = vld [vmem:[#allocation7 + $0x48] sm:$0xff]  ;;  %v2138_v25 = vunpack.c.l.s8.bf16 %v2024_v29  ;;  %v1988_v48 = vld [vmem:[#allocation7 + $0x40] sm:$0xff] }
 0x60a   :  { %v2021_v47 = vld [vmem:[#allocation7 + $0x148] sm:$0xff]  ;;  %2178 = vmatprep.subr.bf16.mxu1 %v2079_v14  ;;  %v2071_v57 = vunpack.c.h.s8.bf16 %v1989_v49  ;;  %v2020_v27 = vld [vmem:[#allocation7 + $0x140] sm:$0xff]  ;;  %v2070_v20 = vunpack.c.h.s8.bf16 %v1988_v48  ;;  %v2067_v53 = vunpack.c.l.s8.bf16 %v1989_v49  ;;  %v2066_v6 = vunpack.c.l.s8.bf16 %v1988_v48 }
 0x60b   :  { %2221 = vmatprep.subr.bf16.mxu0 %v2143_v30  ;;  %2179 = vmatpush1.bf16.msra.mxu1 %v2078_v61  ;;  %v2135_v24 = vunpack.c.h.s8.bf16 %v2021_v47  ;;  %v2134_v52 = vunpack.c.h.s8.bf16 %v2020_v27  ;;  %v2131_v0 = vunpack.c.l.s8.bf16 %v2021_v47  ;;  %v1985_v42 = vld [vmem:[#allocation7 + $0x28] sm:$0xff]  ;;  %v2130_v19 = vunpack.c.l.s8.bf16 %v2020_v27  ;;  %v1984_v18 = vld [vmem:[#allocation7 + $0x20] sm:$0xff] }
 0x60c   :  { %2222 = vmatpush1.bf16.msra.mxu0 %v2142_v60  ;;  %2180 = vmatprep.subr.bf16.mxu1 %v2075_v33  ;;  %v2017_v31 = vld [vmem:[#allocation7 + $0x128] sm:$0xff]  ;;  %v2063_v51 = vunpack.c.h.s8.bf16 %v1985_v42  ;;  %v2016_v50 = vld [vmem:[#allocation7 + $0x120] sm:$0xff]  ;;  %v2062_v59 = vunpack.c.h.s8.bf16 %v1984_v18  ;;  %v2059_v44 = vunpack.c.l.s8.bf16 %v1985_v42  ;;  %v2058_v35 = vunpack.c.l.s8.bf16 %v1984_v18 }
 0x60d   :  { %2223 = vmatprep.subr.bf16.mxu0 %v2139_v46  ;;  %v2127_v12 = vunpack.c.h.s8.bf16 %v2017_v31  ;;  %v2126_v3 = vunpack.c.h.s8.bf16 %v2016_v50  ;;  %v2123_v9 = vunpack.c.l.s8.bf16 %v2017_v31  ;;  %v1981_v41 = vld [vmem:[#allocation7 + $0x8] sm:$0xff]  ;;  %v2122_v15 = vunpack.c.l.s8.bf16 %v2016_v50  ;;  %v1980_v5 = vld [vmem:[#allocation7] sm:$0xff] }
 0x60e   :  { %v2013_v23 = vld [vmem:[#allocation7 + $0x108] sm:$0xff]  ;;  %v2055_v17 = vunpack.c.h.s8.bf16 %v1981_v41  ;;  %v2012_v8 = vld [vmem:[#allocation7 + $0x100] sm:$0xff]  ;;  %v2054_v40 = vunpack.c.h.s8.bf16 %v1980_v5  ;;  %v2051_v38 = vunpack.c.l.s8.bf16 %v1981_v41  ;;  %v2050_v10 = vunpack.c.l.s8.bf16 %v1980_v5 }
 0x60f   :  { %2181 = vmatpush1.bf16.msra.mxu1 %v2074_v16  ;;  %v2119_v56 = vunpack.c.h.s8.bf16 %v2013_v23  ;;  %v2118_v34 = vunpack.c.h.s8.bf16 %v2012_v8  ;;  %v2115_v58 = vunpack.c.l.s8.bf16 %v2013_v23  ;;  %v2009_v4 = vld [vmem:[#allocation7 + $0xe8] sm:$0xff]  ;;  %v2114_v21 = vunpack.c.l.s8.bf16 %v2012_v8  ;;  %v2008_v14 = vld [vmem:[#allocation7 + $0xe0] sm:$0xff] }
 0x610   :  { %2224 = vmatpush1.bf16.msra.mxu0 %v2138_v25  ;;  %2182 = vmatprep.subr.bf16.mxu1 %v2071_v57  ;;  %v2041_v36 = vld [vmem:[#allocation7 + $0x1e8] sm:$0xff]  ;;  %v2111_v11 = vunpack.c.h.s8.bf16 %v2009_v4  ;;  %v2040_v46 = vld [vmem:[#allocation7 + $0x1e0] sm:$0xff]  ;;  %v2110_v30 = vunpack.c.h.s8.bf16 %v2008_v14  ;;  %v2107_v61 = vunpack.c.l.s8.bf16 %v2009_v4  ;;  %v2106_v16 = vunpack.c.l.s8.bf16 %v2008_v14  ;;  %v1995_v4 = vld [vmem:[#allocation7 + $0x78] sm:$0xff] }
 0x611   :  { %2225 = vmatprep.subr.bf16.mxu0 %v2135_v24  ;;  %v2175_v33 = vunpack.c.h.s8.bf16 %v2041_v36  ;;  %v2174_v29 = vunpack.c.h.s8.bf16 %v2040_v46  ;;  %v2171_v60 = vunpack.c.l.s8.bf16 %v2041_v36  ;;  %v2005_v49 = vld [vmem:[#allocation7 + $0xc8] sm:$0xff]  ;;  %v2170_v25 = vunpack.c.l.s8.bf16 %v2040_v46  ;;  %v2004_v48 = vld [vmem:[#allocation7 + $0xc0] sm:$0xff]  ;;  %v2027_v36 = vld [vmem:[#allocation7 + $0x178] sm:$0xff] }
 0x612   :  { %v2037_v47 = vld [vmem:[#allocation7 + $0x1c8] sm:$0xff]  ;;  %v2103_v57 = vunpack.c.h.s8.bf16 %v2005_v49  ;;  %v2036_v27 = vld [vmem:[#allocation7 + $0x1c0] sm:$0xff]  ;;  %v1994_v14 = vld [vmem:[#allocation7 + $0x70] sm:$0xff] }
 0x613   :  { %2183 = vmatpush1.bf16.msra.mxu1 %v2070_v20  ;;  %v2167_v24 = vunpack.c.h.s8.bf16 %v2037_v47  ;;  %v2102_v20 = vunpack.c.h.s8.bf16 %v2004_v48  ;;  %v2001_v42 = vld [vmem:[#allocation7 + $0xa8] sm:$0xff]  ;;  %v2000_v18 = vld [vmem:[#allocation7 + $0xa0] sm:$0xff]  ;;  %v2026_v46 = vld [vmem:[#allocation7 + $0x170] sm:$0xff] }
 0x614   :  { %2226 = vmatpush1.bf16.msra.mxu0 %v2134_v52  ;;  %2184 = vmatprep.subr.bf16.mxu1 %v2067_v53  ;;  %v2166_v52 = vunpack.c.h.s8.bf16 %v2036_v27  ;;  %v2099_v53 = vunpack.c.l.s8.bf16 %v2005_v49  ;;  %v2033_v31 = vld [vmem:[#allocation7 + $0x1a8] sm:$0xff]  ;;  %v2032_v50 = vld [vmem:[#allocation7 + $0x1a0] sm:$0xff]  ;;  %v2077_v49 = vunpack.c.l.s8.bf16 %v1995_v4 }
 0x615   :  { %2227 = vmatprep.subr.bf16.mxu0 %v2131_v0  ;;  %v2163_v0 = vunpack.c.l.s8.bf16 %v2037_v47  ;;  %v1997_v41 = vld [vmem:[#allocation7 + $0x88] sm:$0xff]  ;;  %v1996_v5 = vld [vmem:[#allocation7 + $0x80] sm:$0xff]  ;;  %v2141_v47 = vunpack.c.l.s8.bf16 %v2027_v36 }
 0x616   :  { %v2029_v23 = vld [vmem:[#allocation7 + $0x188] sm:$0xff]  ;;  %v2028_v8 = vld [vmem:[#allocation7 + $0x180] sm:$0xff] }
 0x617   :  { %2185 = vmatpush1.bf16.msra.mxu1 %v2066_v6  ;;  %v2098_v6 = vunpack.c.l.s8.bf16 %v2004_v48 }
 0x618   :  { %2228 = vmatpush1.bf16.msra.mxu0 %v2130_v19  ;;  %2186 = vmatprep.subr.bf16.mxu1 %v2063_v51  ;;  %v2162_v19 = vunpack.c.l.s8.bf16 %v2036_v27  ;;  %v2095_v51 = vunpack.c.h.s8.bf16 %v2001_v42 }
 0x619   :  { %2229 = vmatprep.subr.bf16.mxu0 %v2127_v12  ;;  %v2159_v12 = vunpack.c.h.s8.bf16 %v2033_v31 }
 0x61b   :  { %2187 = vmatpush1.bf16.msra.mxu1 %v2062_v59  ;;  %v2094_v59 = vunpack.c.h.s8.bf16 %v2000_v18 }
 0x61c   :  { %2230 = vmatpush1.bf16.msra.mxu0 %v2126_v3  ;;  %2188 = vmatprep.subr.bf16.mxu1 %v2059_v44  ;;  %v2158_v3 = vunpack.c.h.s8.bf16 %v2032_v50  ;;  %v2091_v44 = vunpack.c.l.s8.bf16 %v2001_v42 }
 0x61d   :  { %2231 = vmatprep.subr.bf16.mxu0 %v2123_v9  ;;  %v2155_v9 = vunpack.c.l.s8.bf16 %v2033_v31 }
 0x61f   :  { %2189 = vmatpush1.bf16.msra.mxu1 %v2058_v35  ;;  %v2090_v35 = vunpack.c.l.s8.bf16 %v2000_v18 }
 0x620   :  { %2232 = vmatpush1.bf16.msra.mxu0 %v2122_v15  ;;  %2190 = vmatprep.subr.bf16.mxu1 %v2055_v17  ;;  %v2154_v15 = vunpack.c.l.s8.bf16 %v2032_v50  ;;  %v2087_v17 = vunpack.c.h.s8.bf16 %v1997_v41 }
 0x621   :  { %2233 = vmatprep.subr.bf16.mxu0 %v2119_v56  ;;  %v2151_v56 = vunpack.c.h.s8.bf16 %v2029_v23 }
 0x623   :  { %2191 = vmatpush1.bf16.msra.mxu1 %v2054_v40  ;;  %v2086_v40 = vunpack.c.h.s8.bf16 %v1996_v5 }
 0x624   :  { %2234 = vmatpush1.bf16.msra.mxu0 %v2118_v34  ;;  %2192 = vmatprep.subr.bf16.mxu1 %v2051_v38  ;;  %v2150_v34 = vunpack.c.h.s8.bf16 %v2028_v8  ;;  %v2083_v38 = vunpack.c.l.s8.bf16 %v1997_v41 }
 0x625   :  { %2235 = vmatprep.subr.bf16.mxu0 %v2115_v58  ;;  %v2147_v58 = vunpack.c.l.s8.bf16 %v2029_v23 }
 0x627   :  { %2193 = vmatpush1.bf16.msra.mxu1 %v2050_v10  ;;  %v2082_v10 = vunpack.c.l.s8.bf16 %v1996_v5 }
 0x628   :  { %2236 = vmatpush1.bf16.msra.mxu0 %v2114_v21  ;;  %2194 = vmatprep.subr.bf16.mxu1 %v2111_v11  ;;  %v2146_v21 = vunpack.c.l.s8.bf16 %v2028_v8  ;;  %v2081_v11 = vunpack.c.h.s8.bf16 %v1995_v4 }
 0x629   :  { %2237 = vmatprep.subr.bf16.mxu0 %v2175_v33  ;;  %v2145_v33 = vunpack.c.h.s8.bf16 %v2027_v36 }
 0x62b   :  { %2195 = vmatpush2.bf16.msra.mxu1 %v2110_v30  ;;  %v6332_v30 = vpack.c.bf16 %v6318_v63, %v6315_v13  ;;  %v2076_v13 = vunpack.c.l.s8.bf16 %v1994_v14  ;;  %v2140_v63 = vunpack.c.l.s8.bf16 %v2026_v46 }
 0x62c   :  { %2238 = vmatpush2.bf16.msra.mxu0 %v2174_v29  ;;  %2196 = vmatprep.subr.bf16.mxu1 %v2107_v61  ;;  %v6336_v29 = vpack.c.bf16 %v6322_v37, %v6320_v7  ;;  %v2080_v61 = vunpack.c.h.s8.bf16 %v1994_v14 }
 0x62d   :  { %2239 = vmatprep.subr.bf16.mxu0 %v2171_v60  ;;  %v2144_v60 = vunpack.c.h.s8.bf16 %v2026_v46 }
 0x62f   :  { %2197 = vmatpush2.bf16.msra.mxu1 %v2106_v16  ;;  %v1991_v16 = vld [vmem:[#allocation7 + $0x58] sm:$0xff] }
 0x630   :  { %2240 = vmatpush2.bf16.msra.mxu0 %v2170_v25  ;;  %2198 = vmatprep.subr.bf16.mxu1 %v2103_v57  ;;  %v2023_v25 = vld [vmem:[#allocation7 + $0x158] sm:$0xff]  ;;  %v2073_v7 = vunpack.c.h.s8.bf16 %v1991_v16  ;;  %v1990_v57 = vld [vmem:[#allocation7 + $0x50] sm:$0xff] }
 0x631   :  { %2241 = vmatprep.subr.bf16.mxu0 %v2167_v24  ;;  %v2137_v37 = vunpack.c.h.s8.bf16 %v2023_v25  ;;  %v2022_v24 = vld [vmem:[#allocation7 + $0x150] sm:$0xff]  ;;  %v2072_v48 = vunpack.c.h.s8.bf16 %v1990_v57  ;;  %v2068_v42 = vunpack.c.l.s8.bf16 %v1990_v57 }
 0x632   :  { %v2136_v27 = vunpack.c.h.s8.bf16 %v2022_v24  ;;  %v2132_v31 = vunpack.c.l.s8.bf16 %v2022_v24 }
 0x633   :  { %2199 = vmatpush2.bf16.msra.mxu1 %v2102_v20  ;;  %v2069_v20 = vunpack.c.l.s8.bf16 %v1991_v16 }
 0x634   :  { %2242 = vmatpush2.bf16.msra.mxu0 %v2166_v52  ;;  %2200 = vmatprep.subr.bf16.mxu1 %v2099_v53  ;;  %v2133_v52 = vunpack.c.l.s8.bf16 %v2023_v25  ;;  %v1987_v53 = vld [vmem:[#allocation7 + $0x38] sm:$0xff] }
 0x635   :  { %2243 = vmatprep.subr.bf16.mxu0 %v2163_v0  ;;  %v2019_v0 = vld [vmem:[#allocation7 + $0x138] sm:$0xff]  ;;  %v2061_v18 = vunpack.c.l.s8.bf16 %v1987_v53 }
 0x636   :  { %v2125_v50 = vunpack.c.l.s8.bf16 %v2019_v0 }
 0x637   :  { %2201 = vmatpush2.bf16.msra.mxu1 %v2098_v6  ;;  %v2065_v6 = vunpack.c.h.s8.bf16 %v1987_v53 }
 0x638   :  { %2244 = vmatpush2.bf16.msra.mxu0 %v2162_v19  ;;  %2202 = vmatprep.subr.bf16.mxu1 %v2095_v51  ;;  %v1986_v19 = vld [vmem:[#allocation7 + $0x30] sm:$0xff] }
 0x639   :  { %2245 = vmatprep.subr.bf16.mxu0 %v2159_v12  ;;  %v2064_v51 = vunpack.c.h.s8.bf16 %v1986_v19 }
 0x63b   :  { %2203 = vmatpush2.bf16.msra.mxu1 %v2094_v59  ;;  %v1983_v59 = vld [vmem:[#allocation7 + $0x18] sm:$0xff] }
 0x63c   :  { %2246 = vmatpush2.bf16.msra.mxu0 %v2158_v3  ;;  %2204 = vmatprep.subr.bf16.mxu1 %v2091_v44  ;;  %v2015_v3 = vld [vmem:[#allocation7 + $0x118] sm:$0xff]  ;;  %v2060_v44 = vunpack.c.l.s8.bf16 %v1986_v19  ;;  %v2057_v41 = vunpack.c.h.s8.bf16 %v1983_v59  ;;  %v2053_v5 = vunpack.c.l.s8.bf16 %v1983_v59 }
 0x63d   :  { %2247 = vmatprep.subr.bf16.mxu0 %v2155_v9  ;;  %v2121_v23 = vunpack.c.h.s8.bf16 %v2015_v3  ;;  %v2117_v8 = vunpack.c.l.s8.bf16 %v2015_v3 }
 0x63f   :  { %2205 = vmatpush2.bf16.msra.mxu1 %v2090_v35  ;;  %v1982_v35 = vld [vmem:[#allocation7 + $0x10] sm:$0xff] }
 0x640   :  { %2248 = vmatpush2.bf16.msra.mxu0 %v2154_v15  ;;  %2206 = vmatprep.subr.bf16.mxu1 %v2087_v17  ;;  %v2014_v15 = vld [vmem:[#allocation7 + $0x110] sm:$0xff]  ;;  %v2056_v17 = vunpack.c.h.s8.bf16 %v1982_v35 }
 0x641   :  { %2249 = vmatprep.subr.bf16.mxu0 %v2151_v56  ;;  %v2120_v56 = vunpack.c.h.s8.bf16 %v2014_v15 }
 0x643   :  { %2207 = vmatpush2.bf16.msra.mxu1 %v2086_v40  ;;  %v2011_v40 = vld [vmem:[#allocation7 + $0xf8] sm:$0xff] }
 0x644   :  { %2250 = vmatpush2.bf16.msra.mxu0 %v2150_v34  ;;  %2208 = vmatprep.subr.bf16.mxu1 %v2083_v38  ;;  %v2043_v34 = vld [vmem:[#allocation7 + $0x1f8] sm:$0xff]  ;;  %v2052_v38 = vunpack.c.l.s8.bf16 %v1982_v35  ;;  %v2113_v4 = vunpack.c.h.s8.bf16 %v2011_v40  ;;  %v2109_v14 = vunpack.c.l.s8.bf16 %v2011_v40 }
 0x645   :  { %2251 = vmatprep.subr.bf16.mxu0 %v2147_v58  ;;  %v2116_v58 = vunpack.c.l.s8.bf16 %v2014_v15  ;;  %v2177_v36 = vunpack.c.h.s8.bf16 %v2043_v34  ;;  %v2173_v46 = vunpack.c.l.s8.bf16 %v2043_v34 }
 0x647   :  { %2209 = vmatpush2.bf16.msra.mxu1 %v2082_v10  ;;  %v2010_v10 = vld [vmem:[#allocation7 + $0xf0] sm:$0xff] }
 0x648   :  { %2252 = vmatpush2.bf16.msra.mxu0 %v2146_v21  ;;  %2264 = vmatprep.subr.bf16.mxu1 %v2081_v11  ;;  %v2042_v21 = vld [vmem:[#allocation7 + $0x1f0] sm:$0xff]  ;;  %v2112_v11 = vunpack.c.h.s8.bf16 %v2010_v10 }
 0x649   :  { %2307 = vmatprep.subr.bf16.mxu0 %v2145_v33  ;;  %v2176_v33 = vunpack.c.h.s8.bf16 %v2042_v21 }
 0x64a   :  { %2211 = vmatmul.mubr.bf16.vlgmr.msra.gmra.mxu1 %v6332_v30 }
 0x64b   :  { %2254 = vmatmul.mubr.bf16.vlgmr.msra.gmra.mxu0 %v6336_v29  ;;  %2265 = vmatpush1.bf16.msra.mxu1 %v2080_v61  ;;  %v2007_v61 = vld [vmem:[#allocation7 + $0xd8] sm:$0xff] }
 0x64c   :  { %2308 = vmatpush1.bf16.msra.mxu0 %v2144_v60  ;;  %2266 = vmatprep.subr.bf16.mxu1 %v2077_v49  ;;  %v2039_v60 = vld [vmem:[#allocation7 + $0x1d8] sm:$0xff]  ;;  %v2108_v49 = vunpack.c.l.s8.bf16 %v2010_v10  ;;  %v2105_v16 = vunpack.c.h.s8.bf16 %v2007_v61  ;;  %v2101_v57 = vunpack.c.l.s8.bf16 %v2007_v61 }
 0x64d   :  { %2309 = vmatprep.subr.bf16.mxu0 %v2141_v47  ;;  %2296 = vmatprep.mubr.bf16.mxu1 %v6324_v39  ;;  %v2129_v39 = vunpack.c.h.s8.bf16 %v2019_v0  ;;  %v2172_v47 = vunpack.c.l.s8.bf16 %v2042_v21  ;;  %v2169_v25 = vunpack.c.h.s8.bf16 %v2039_v60  ;;  %v2165_v24 = vunpack.c.l.s8.bf16 %v2039_v60 }
 0x64e   :  { %2339 = vmatprep.mubr.bf16.mxu0 %v6326_v62  ;;  %v2018_v62 = vld [vmem:[#allocation7 + $0x130] sm:$0xff] }
 0x64f   :  { %2267 = vmatpush1.bf16.msra.mxu1 %v2076_v13  ;;  %v2128_v12 = vunpack.c.h.s8.bf16 %v2018_v62  ;;  %v2124_v9 = vunpack.c.l.s8.bf16 %v2018_v62  ;;  %v2006_v13 = vld [vmem:[#allocation7 + $0xd0] sm:$0xff] }
 0x650   :  { %2310 = vmatpush1.bf16.msra.mxu0 %v2140_v63  ;;  %2268 = vmatprep.subr.bf16.mxu1 %v2073_v7  ;;  %v2038_v63 = vld [vmem:[#allocation7 + $0x1d0] sm:$0xff]  ;;  %v2104_v7 = vunpack.c.h.s8.bf16 %v2006_v13 }
 0x651   :  { %2311 = vmatprep.subr.bf16.mxu0 %v2137_v37  ;;  %v2168_v37 = vunpack.c.h.s8.bf16 %v2038_v63 }
 0x653   :  { %2269 = vmatpush1.bf16.msra.mxu1 %v2072_v48  ;;  %v2003_v48 = vld [vmem:[#allocation7 + $0xb8] sm:$0xff] }
 0x654   :  { %2312 = vmatpush1.bf16.msra.mxu0 %v2136_v27  ;;  %2270 = vmatprep.subr.bf16.mxu1 %v2069_v20  ;;  %v2035_v27 = vld [vmem:[#allocation7 + $0x1b8] sm:$0xff]  ;;  %v2100_v20 = vunpack.c.l.s8.bf16 %v2006_v13  ;;  %v2097_v53 = vunpack.c.h.s8.bf16 %v2003_v48  ;;  %v2093_v19 = vunpack.c.l.s8.bf16 %v2003_v48 }
 0x655   :  { %2313 = vmatprep.subr.bf16.mxu0 %v2133_v52  ;;  %v2164_v52 = vunpack.c.l.s8.bf16 %v2038_v63  ;;  %v2161_v0 = vunpack.c.h.s8.bf16 %v2035_v27  ;;  %v2157_v62 = vunpack.c.l.s8.bf16 %v2035_v27 }
 0x657   :  { %2271 = vmatpush1.bf16.msra.mxu1 %v2068_v42  ;;  %v2002_v42 = vld [vmem:[#allocation7 + $0xb0] sm:$0xff] }
 0x658   :  { %2314 = vmatpush1.bf16.msra.mxu0 %v2132_v31  ;;  %2272 = vmatprep.subr.bf16.mxu1 %v2065_v6  ;;  %v2034_v31 = vld [vmem:[#allocation7 + $0x1b0] sm:$0xff]  ;;  %v2096_v6 = vunpack.c.h.s8.bf16 %v2002_v42 }
 0x659   :  { %2315 = vmatprep.subr.bf16.mxu0 %v2129_v39  ;;  %v2160_v39 = vunpack.c.h.s8.bf16 %v2034_v31 }
 0x65b   :  { %2273 = vmatpush1.bf16.msra.mxu1 %v2064_v51  ;;  %v1999_v51 = vld [vmem:[#allocation7 + $0x98] sm:$0xff] }
 0x65c   :  { %2316 = vmatpush1.bf16.msra.mxu0 %v2128_v12  ;;  %2274 = vmatprep.subr.bf16.mxu1 %v2061_v18  ;;  %v2031_v12 = vld [vmem:[#allocation7 + $0x198] sm:$0xff]  ;;  %v2092_v18 = vunpack.c.l.s8.bf16 %v2002_v42  ;;  %v2089_v59 = vunpack.c.h.s8.bf16 %v1999_v51  ;;  %v2085_v35 = vunpack.c.l.s8.bf16 %v1999_v51 }
 0x65d   :  { %2317 = vmatprep.subr.bf16.mxu0 %v2125_v50  ;;  %v2156_v50 = vunpack.c.l.s8.bf16 %v2034_v31  ;;  %v2153_v3 = vunpack.c.h.s8.bf16 %v2031_v12  ;;  %v2149_v15 = vunpack.c.l.s8.bf16 %v2031_v12 }
 0x65f   :  { %2275 = vmatpush1.bf16.msra.mxu1 %v2060_v44  ;;  %v1998_v44 = vld [vmem:[#allocation7 + $0x90] sm:$0xff] }
 0x660   :  { %2318 = vmatpush1.bf16.msra.mxu0 %v2124_v9  ;;  %2276 = vmatprep.subr.bf16.mxu1 %v2057_v41  ;;  %v2030_v9 = vld [vmem:[#allocation7 + $0x190] sm:$0xff]  ;;  %v2088_v41 = vunpack.c.h.s8.bf16 %v1998_v44 }
 0x661   :  { %2319 = vmatprep.subr.bf16.mxu0 %v2121_v23  ;;  %v2152_v23 = vunpack.c.h.s8.bf16 %v2030_v9 }
 0x663   :  { %2277 = vmatpush1.bf16.msra.mxu1 %v2056_v17  ;;  %v2084_v17 = vunpack.c.l.s8.bf16 %v1998_v44 }
 0x664   :  { %2320 = vmatpush1.bf16.msra.mxu0 %v2120_v56  ;;  %2278 = vmatprep.subr.bf16.mxu1 %v2053_v5  ;;  %v2148_v56 = vunpack.c.l.s8.bf16 %v2030_v9  ;;  %v2045_v5 = vld [vmem:[%s6555_s4 + $0x19] sm:$0xf] }
 0x665   :  { %2321 = vmatprep.subr.bf16.mxu0 %v2117_v8  ;;  %v2044_v8 = vld [vmem:[%s6555_s4 + $0x15] sm:$0xf]  ;;  %v2354_v40 = vrot.slane %v2045_v5, %v6683_v2  ;;  %v2362_v42 = vrot.slane %v2045_v5, %v6685_v55 }
 0x667   :  { %2279 = vmatpush1.bf16.msra.mxu1 %v2052_v38 }
 0x668   :  { %2322 = vmatpush1.bf16.msra.mxu0 %v2116_v58  ;;  %2280 = vmatprep.subr.bf16.mxu1 %v2113_v4  ;;  %v2383_v4 = vrot.slane %v2044_v8, %v6683_v2 }
 0x669   :  { %2323 = vmatprep.subr.bf16.mxu0 %v2177_v36  ;;  %v2358_v36 = vrot.slane %v2045_v5, %v6684_v26 }
 0x66b   :  { %2281 = vmatpush2.bf16.msra.mxu1 %v2112_v11  ;;  %v2387_v11 = vrot.slane %v2044_v8, %v6684_v26 }
 0x66c   :  { %2324 = vmatpush2.bf16.msra.mxu0 %v2176_v33  ;;  %2282 = vmatprep.subr.bf16.mxu1 %v2109_v14 }
 0x66d   :  { %2325 = vmatprep.subr.bf16.mxu0 %v2173_v46 }
 0x66f   :  { %2283 = vmatpush2.bf16.msra.mxu1 %v2108_v49 }
 0x670   :  { %2326 = vmatpush2.bf16.msra.mxu0 %v2172_v47  ;;  %2284 = vmatprep.subr.bf16.mxu1 %v2105_v16 }
 0x671   :  { %2327 = vmatprep.subr.bf16.mxu0 %v2169_v25 }
 0x673   :  { %2285 = vmatpush2.bf16.msra.mxu1 %v2104_v7 }
 0x674   :  { %2328 = vmatpush2.bf16.msra.mxu0 %v2168_v37  ;;  %2286 = vmatprep.subr.bf16.mxu1 %v2101_v57 }
 0x675   :  { %2329 = vmatprep.subr.bf16.mxu0 %v2165_v24 }
 0x677   :  { %2287 = vmatpush2.bf16.msra.mxu1 %v2100_v20 }
 0x678   :  { %2330 = vmatpush2.bf16.msra.mxu0 %v2164_v52  ;;  %2288 = vmatprep.subr.bf16.mxu1 %v2097_v53 }
 0x679   :  { %2331 = vmatprep.subr.bf16.mxu0 %v2161_v0 }
 0x67b   :  { %2289 = vmatpush2.bf16.msra.mxu1 %v2096_v6 }
 0x67c   :  { %2332 = vmatpush2.bf16.msra.mxu0 %v2160_v39  ;;  %2290 = vmatprep.subr.bf16.mxu1 %v2093_v19  ;;  %v2391_v19 = vrot.slane %v2044_v8, %v6685_v55 }
 0x67d   :  { %2333 = vmatprep.subr.bf16.mxu0 %v2157_v62  ;;  %v2366_v62 = vrot.slane %v2045_v5, %v6686_v1 }
 0x67f   :  { %2291 = vmatpush2.bf16.msra.mxu1 %v2092_v18 }
 0x680   :  { %2334 = vmatpush2.bf16.msra.mxu0 %v2156_v50  ;;  %2292 = vmatprep.subr.bf16.mxu1 %v2089_v59  ;;  %v2395_v59 = vrot.slane %v2044_v8, %v6686_v1 }
 0x681   :  { %2335 = vmatprep.subr.bf16.mxu0 %v2153_v3 }
 0x683   :  { %2293 = vmatpush2.bf16.msra.mxu1 %v2088_v41 }
 0x684   :  { %2336 = vmatpush2.bf16.msra.mxu0 %v2152_v23  ;;  %2294 = vmatprep.subr.bf16.mxu1 %v2085_v35 }
 0x685   :  { %2337 = vmatprep.subr.bf16.mxu0 %v2149_v15 }
 0x687   :  { %2295 = vmatpush2.bf16.msra.mxu1 %v2084_v17 }
 0x688   :  { %2338 = vmatpush2.bf16.msra.mxu0 %v2148_v56 }
 0x68a   :  { %2297 = vmatmul.mubr.bf16.vlgmr.msra.gmra.mxu1 %v6332_v30 }
 0x68b   :  { %2340 = vmatmul.mubr.bf16.vlgmr.msra.gmra.mxu0 %v6336_v29 }
 0x70a   :  { %v2212_v34 = vpop.f32.mrf.mxu1 }
 0x70b   :  { %v2255_v38 = vpop.f32.mrf.mxu0 }
 0x70c   :  { %v2256_v58 = vadd.f32 %v2255_v38, %v2212_v34  ;;  %v2214_v30 = vpop.f32.mrf.mxu1 }
 0x70d   :  { %v2257_v10 = vpop.f32.mrf.mxu0 }
 0x70e   :  { %v2371_v29 = vmul.f32 %v2354_v40, %v2256_v58  ;;  %v2258_v21 = vadd.f32 %v2257_v10, %v2214_v30  ;;  %v2216_v33 = vpop.f32.mrf.mxu1 }
 0x70f   :  { %v2259_v14 = vpop.f32.mrf.mxu0 }
 0x710   :  { %v2400_v46 = vadd.f32 %v2383_v4, %v2371_v29  ;;  %v2372_v61 = vmul.f32 %v2358_v36, %v2258_v21  ;;  %v2260_v60 = vadd.f32 %v2259_v14, %v2216_v33  ;;  %v2218_v49 = vpop.f32.mrf.mxu1 }
 0x711   :  { %v2261_v47 = vpop.f32.mrf.mxu0 }
 0x712   :  { %vm2408_vm0 = vcmp.gt.f32.partialorder %v2400_v46, 0.0  ;;  %v2416_v16 = vmul.f32 0.01, %v2400_v46  ;;  %v2401_v25 = vadd.f32 %v2387_v11, %v2372_v61  ;;  %v2375_v13 = vmul.f32 %v2354_v40, %v2260_v60 }
 0x713   :  { %v2262_v63 = vadd.f32 %v2261_v47, %v2218_v49 }
 0x714   :  { %v6354_v7 = vsel %vm2408_vm0, %v2400_v46, %v2416_v16  ;;  %vm2409_vm1 = vcmp.gt.f32.partialorder %v2401_v25, 0.0  ;;  %v2417_v37 = vmul.f32 0.01, %v2401_v25  ;;  %v2404_v57 = vadd.f32 %v2383_v4, %v2375_v13 }
 0x715   :  { %v2376_v24 = vmul.f32 %v2358_v36, %v2262_v63 }
 0x716   :  { %v2425_v48 = vsel %vm2409_vm1, %v2401_v25, %v2417_v37  ;;  %vm2412_vm2 = vcmp.gt.f32.partialorder %v2404_v57, 0.0  ;;  %v2420_v27 = vmul.f32 0.01, %v2404_v57 }
 0x717   :  { %v2405_v20 = vadd.f32 %v2387_v11, %v2376_v24 }
 0x718   :  { %v6356_v52 = vsel %vm2412_vm2, %v2404_v57, %v2420_v27 }
 0x719   :  { %vm2413_vm3 = vcmp.gt.f32.partialorder %v2405_v20, 0.0  ;;  %v2421_v53 = vmul.f32 0.01, %v2405_v20 }
 0x71b   :  { %v2429_v0 = vsel %vm2413_vm3, %v2405_v20, %v2421_v53 }
 0x74a   :  { %v2298_v31 = vpop.f32.mrf.mxu1 }
 0x74b   :  { %v2341_v6 = vpop.f32.mrf.mxu0 }
 0x74c   :  { %v2342_v39 = vadd.f32 %v2341_v6, %v2298_v31  ;;  %v2300_v51 = vpop.f32.mrf.mxu1 }
 0x74d   :  { %v2343_v12 = vpop.f32.mrf.mxu0 }
 0x74e   :  { %v2373_v18 = vmul.f32 %v2362_v42, %v2342_v39  ;;  %v2344_v50 = vadd.f32 %v2343_v12, %v2300_v51  ;;  %v2302_v3 = vpop.f32.mrf.mxu1 }
 0x74f   :  { %v2345_v44 = vpop.f32.mrf.mxu0 }
 0x750   :  { %v2402_v9 = vadd.f32 %v2391_v19, %v2373_v18  ;;  %v2374_v41 = vmul.f32 %v2366_v62, %v2344_v50  ;;  %v2346_v23 = vadd.f32 %v2345_v44, %v2302_v3  ;;  %v2304_v35 = vpop.f32.mrf.mxu1 }
 0x751   :  { %v2347_v15 = vpop.f32.mrf.mxu0 }
 0x752   :  { %vm2410_vm4 = vcmp.gt.f32.partialorder %v2402_v9, 0.0  ;;  %v2418_v17 = vmul.f32 0.01, %v2402_v9  ;;  %v2403_v56 = vadd.f32 %v2395_v59, %v2374_v41  ;;  %v2377_v40 = vmul.f32 %v2362_v42, %v2346_v23 }
 0x753   :  { %v2348_v34 = vadd.f32 %v2347_v15, %v2304_v35 }
 0x754   :  { %v6362_v38 = vsel %vm2410_vm4, %v2402_v9, %v2418_v17  ;;  %vm2411_vm8 = vcmp.gt.f32.partialorder %v2403_v56, 0.0  ;;  %v2419_v5 = vmul.f32 0.01, %v2403_v56  ;;  %v2406_v58 = vadd.f32 %v2391_v19, %v2377_v40 }
 0x755   :  { %v2378_v4 = vmul.f32 %v2366_v62, %v2348_v34 }
 0x756   :  { %v2427_v36 = vsel %vm2411_vm8, %v2403_v56, %v2419_v5  ;;  %vm2414_vm9 = vcmp.gt.f32.partialorder %v2406_v58, 0.0  ;;  %v2422_v8 = vmul.f32 0.01, %v2406_v58 }
 0x757   :  { %v2407_v30 = vadd.f32 %v2395_v59, %v2378_v4 }
 0x758   :  { %v6364_v10 = vsel %vm2414_vm9, %v2406_v58, %v2422_v8 }
 0x759   :  { %vm2415_vm10 = vcmp.gt.f32.partialorder %v2407_v30, 0.0  ;;  %v2423_v29 = vmul.f32 0.01, %v2407_v30 }
 0x75b   :  { %v2431_v21 = vsel %vm2415_vm10, %v2407_v30, %v2423_v29 }
 0x75c   :  { %5298 = dma.done.wait [#allocation14 + $0x6], 8192 }
 0x75d   :  { %5299 = vsyncadd [#allocation14 + $0x6], 4294959104  ;;  %v6366_v11 = vpack.c.bf16 %v2429_v0, %v2425_v48  ;;  %v6368_v33 = vpack.c.bf16 %v2431_v21, %v2427_v36  ;;  %v2447_v14 = vld [vmem:[#allocation8 + $0x68] sm:$0xff]  ;;  %v2446_v61 = vld [vmem:[#allocation8 + $0x60] sm:$0xff] }
 0x75e   :  { %v2479_v46 = vld [vmem:[#allocation8 + $0x168] sm:$0xff]  ;;  %v2529_v60 = vunpack.c.l.s8.bf16 %v2447_v14  ;;  %v2533_v49 = vunpack.c.h.s8.bf16 %v2447_v14  ;;  %v2478_v25 = vld [vmem:[#allocation8 + $0x160] sm:$0xff]  ;;  %v2532_v13 = vunpack.c.h.s8.bf16 %v2446_v61  ;;  %v2528_v24 = vunpack.c.l.s8.bf16 %v2446_v61 }
 0x75f   :  { %2664 = vmatprep.mubr.bf16.mxu1 %v6366_v11  ;;  %2707 = vmatprep.mubr.bf16.mxu0 %v6368_v33  ;;  %v2593_v47 = vunpack.c.l.s8.bf16 %v2479_v46  ;;  %v2597_v16 = vunpack.c.h.s8.bf16 %v2479_v46  ;;  %v2596_v63 = vunpack.c.h.s8.bf16 %v2478_v25  ;;  %v2443_v37 = vld [vmem:[#allocation8 + $0x48] sm:$0xff]  ;;  %v2592_v48 = vunpack.c.l.s8.bf16 %v2478_v25  ;;  %v2442_v53 = vld [vmem:[#allocation8 + $0x40] sm:$0xff] }
 0x760   :  { %v2475_v57 = vld [vmem:[#allocation8 + $0x148] sm:$0xff]  ;;  %2632 = vmatprep.subr.bf16.mxu1 %v2533_v49  ;;  %v2525_v27 = vunpack.c.h.s8.bf16 %v2443_v37  ;;  %v2474_v0 = vld [vmem:[#allocation8 + $0x140] sm:$0xff]  ;;  %v2524_v42 = vunpack.c.h.s8.bf16 %v2442_v53  ;;  %v2521_v6 = vunpack.c.l.s8.bf16 %v2443_v37  ;;  %v2520_v51 = vunpack.c.l.s8.bf16 %v2442_v53 }
 0x761   :  { %2675 = vmatprep.subr.bf16.mxu0 %v2597_v16  ;;  %2633 = vmatpush1.bf16.msra.mxu1 %v2532_v13  ;;  %v2589_v20 = vunpack.c.h.s8.bf16 %v2475_v57  ;;  %v2588_v31 = vunpack.c.h.s8.bf16 %v2474_v0  ;;  %v2585_v39 = vunpack.c.l.s8.bf16 %v2475_v57  ;;  %v2439_v19 = vld [vmem:[#allocation8 + $0x28] sm:$0xff]  ;;  %v2584_v12 = vunpack.c.l.s8.bf16 %v2474_v0  ;;  %v2438_v59 = vld [vmem:[#allocation8 + $0x20] sm:$0xff] }
 0x762   :  { %2676 = vmatpush1.bf16.msra.mxu0 %v2596_v63  ;;  %2634 = vmatprep.subr.bf16.mxu1 %v2529_v60  ;;  %v2471_v62 = vld [vmem:[#allocation8 + $0x128] sm:$0xff]  ;;  %v2517_v18 = vunpack.c.h.s8.bf16 %v2439_v19  ;;  %v2470_v3 = vld [vmem:[#allocation8 + $0x120] sm:$0xff]  ;;  %v2516_v44 = vunpack.c.h.s8.bf16 %v2438_v59  ;;  %v2513_v41 = vunpack.c.l.s8.bf16 %v2439_v19  ;;  %v2512_v17 = vunpack.c.l.s8.bf16 %v2438_v59 }
 0x763   :  { %2677 = vmatprep.subr.bf16.mxu0 %v2593_v47  ;;  %v2581_v50 = vunpack.c.h.s8.bf16 %v2471_v62  ;;  %v2580_v9 = vunpack.c.h.s8.bf16 %v2470_v3  ;;  %v2577_v23 = vunpack.c.l.s8.bf16 %v2471_v62  ;;  %v2435_v35 = vld [vmem:[#allocation8 + $0x8] sm:$0xff]  ;;  %v2576_v56 = vunpack.c.l.s8.bf16 %v2470_v3  ;;  %v2434_v5 = vld [vmem:[#allocation8] sm:$0xff] }
 0x764   :  { %v2467_v15 = vld [vmem:[#allocation8 + $0x108] sm:$0xff]  ;;  %v2509_v40 = vunpack.c.h.s8.bf16 %v2435_v35  ;;  %v2466_v58 = vld [vmem:[#allocation8 + $0x100] sm:$0xff]  ;;  %v2508_v4 = vunpack.c.h.s8.bf16 %v2434_v5  ;;  %v2505_v8 = vunpack.c.l.s8.bf16 %v2435_v35  ;;  %v2504_v14 = vunpack.c.l.s8.bf16 %v2434_v5 }
 0x765   :  { %2635 = vmatpush1.bf16.msra.mxu1 %v2528_v24  ;;  %v2573_v34 = vunpack.c.h.s8.bf16 %v2467_v15  ;;  %v2572_v36 = vunpack.c.h.s8.bf16 %v2466_v58  ;;  %v2569_v30 = vunpack.c.l.s8.bf16 %v2467_v15  ;;  %v2463_v29 = vld [vmem:[#allocation8 + $0xe8] sm:$0xff]  ;;  %v2568_v46 = vunpack.c.l.s8.bf16 %v2466_v58  ;;  %v2462_v49 = vld [vmem:[#allocation8 + $0xe0] sm:$0xff] }
 0x766   :  { %2678 = vmatpush1.bf16.msra.mxu0 %v2592_v48  ;;  %2636 = vmatprep.subr.bf16.mxu1 %v2525_v27  ;;  %v2495_v21 = vld [vmem:[#allocation8 + $0x1e8] sm:$0xff]  ;;  %v2565_v61 = vunpack.c.h.s8.bf16 %v2463_v29  ;;  %v2494_v47 = vld [vmem:[#allocation8 + $0x1e0] sm:$0xff]  ;;  %v2564_v16 = vunpack.c.h.s8.bf16 %v2462_v49  ;;  %v2561_v13 = vunpack.c.l.s8.bf16 %v2463_v29  ;;  %v2560_v24 = vunpack.c.l.s8.bf16 %v2462_v49  ;;  %v2449_v29 = vld [vmem:[#allocation8 + $0x78] sm:$0xff] }
 0x767   :  { %2679 = vmatprep.subr.bf16.mxu0 %v2589_v20  ;;  %v2629_v60 = vunpack.c.h.s8.bf16 %v2495_v21  ;;  %v2628_v25 = vunpack.c.h.s8.bf16 %v2494_v47  ;;  %v2625_v63 = vunpack.c.l.s8.bf16 %v2495_v21  ;;  %v2459_v37 = vld [vmem:[#allocation8 + $0xc8] sm:$0xff]  ;;  %v2624_v48 = vunpack.c.l.s8.bf16 %v2494_v47  ;;  %v2458_v53 = vld [vmem:[#allocation8 + $0xc0] sm:$0xff]  ;;  %v2481_v21 = vld [vmem:[#allocation8 + $0x178] sm:$0xff] }
 0x768   :  { %v2491_v57 = vld [vmem:[#allocation8 + $0x1c8] sm:$0xff]  ;;  %v2557_v27 = vunpack.c.h.s8.bf16 %v2459_v37  ;;  %v2490_v0 = vld [vmem:[#allocation8 + $0x1c0] sm:$0xff]  ;;  %v2448_v49 = vld [vmem:[#allocation8 + $0x70] sm:$0xff] }
 0x769   :  { %2637 = vmatpush1.bf16.msra.mxu1 %v2524_v42  ;;  %v2621_v20 = vunpack.c.h.s8.bf16 %v2491_v57  ;;  %v2556_v42 = vunpack.c.h.s8.bf16 %v2458_v53  ;;  %v2455_v19 = vld [vmem:[#allocation8 + $0xa8] sm:$0xff]  ;;  %v2454_v59 = vld [vmem:[#allocation8 + $0xa0] sm:$0xff]  ;;  %v2480_v47 = vld [vmem:[#allocation8 + $0x170] sm:$0xff] }
 0x76a   :  { %2680 = vmatpush1.bf16.msra.mxu0 %v2588_v31  ;;  %2638 = vmatprep.subr.bf16.mxu1 %v2521_v6  ;;  %v2620_v31 = vunpack.c.h.s8.bf16 %v2490_v0  ;;  %v2553_v6 = vunpack.c.l.s8.bf16 %v2459_v37  ;;  %v2487_v62 = vld [vmem:[#allocation8 + $0x1a8] sm:$0xff]  ;;  %v2486_v3 = vld [vmem:[#allocation8 + $0x1a0] sm:$0xff]  ;;  %v2531_v37 = vunpack.c.l.s8.bf16 %v2449_v29 }
 0x76b   :  { %2681 = vmatprep.subr.bf16.mxu0 %v2585_v39  ;;  %v2617_v39 = vunpack.c.l.s8.bf16 %v2491_v57  ;;  %v2451_v35 = vld [vmem:[#allocation8 + $0x88] sm:$0xff]  ;;  %v2450_v5 = vld [vmem:[#allocation8 + $0x80] sm:$0xff]  ;;  %v2595_v57 = vunpack.c.l.s8.bf16 %v2481_v21 }
 0x76c   :  { %v2483_v15 = vld [vmem:[#allocation8 + $0x188] sm:$0xff]  ;;  %v2482_v58 = vld [vmem:[#allocation8 + $0x180] sm:$0xff] }
 0x76d   :  { %2639 = vmatpush1.bf16.msra.mxu1 %v2520_v51  ;;  %v2552_v51 = vunpack.c.l.s8.bf16 %v2458_v53 }
 0x76e   :  { %2682 = vmatpush1.bf16.msra.mxu0 %v2584_v12  ;;  %2640 = vmatprep.subr.bf16.mxu1 %v2517_v18  ;;  %v2616_v12 = vunpack.c.l.s8.bf16 %v2490_v0  ;;  %v2549_v18 = vunpack.c.h.s8.bf16 %v2455_v19 }
 0x76f   :  { %2683 = vmatprep.subr.bf16.mxu0 %v2581_v50  ;;  %v2613_v50 = vunpack.c.h.s8.bf16 %v2487_v62 }
 0x771   :  { %2641 = vmatpush1.bf16.msra.mxu1 %v2516_v44  ;;  %v2548_v44 = vunpack.c.h.s8.bf16 %v2454_v59 }
 0x772   :  { %2684 = vmatpush1.bf16.msra.mxu0 %v2580_v9  ;;  %2642 = vmatprep.subr.bf16.mxu1 %v2513_v41  ;;  %v2612_v9 = vunpack.c.h.s8.bf16 %v2486_v3  ;;  %v2545_v41 = vunpack.c.l.s8.bf16 %v2455_v19 }
 0x773   :  { %2685 = vmatprep.subr.bf16.mxu0 %v2577_v23  ;;  %v2609_v23 = vunpack.c.l.s8.bf16 %v2487_v62 }
 0x775   :  { %2643 = vmatpush1.bf16.msra.mxu1 %v2512_v17  ;;  %v2544_v17 = vunpack.c.l.s8.bf16 %v2454_v59 }
 0x776   :  { %2686 = vmatpush1.bf16.msra.mxu0 %v2576_v56  ;;  %2644 = vmatprep.subr.bf16.mxu1 %v2509_v40  ;;  %v2608_v56 = vunpack.c.l.s8.bf16 %v2486_v3  ;;  %v2541_v40 = vunpack.c.h.s8.bf16 %v2451_v35 }
 0x777   :  { %2687 = vmatprep.subr.bf16.mxu0 %v2573_v34  ;;  %v2605_v34 = vunpack.c.h.s8.bf16 %v2483_v15 }
 0x779   :  { %2645 = vmatpush1.bf16.msra.mxu1 %v2508_v4  ;;  %v2540_v4 = vunpack.c.h.s8.bf16 %v2450_v5 }
 0x77a   :  { %2688 = vmatpush1.bf16.msra.mxu0 %v2572_v36  ;;  %2646 = vmatprep.subr.bf16.mxu1 %v2505_v8  ;;  %v2604_v36 = vunpack.c.h.s8.bf16 %v2482_v58  ;;  %v2537_v8 = vunpack.c.l.s8.bf16 %v2451_v35 }
 0x77b   :  { %2689 = vmatprep.subr.bf16.mxu0 %v2569_v30  ;;  %v2601_v30 = vunpack.c.l.s8.bf16 %v2483_v15 }
 0x77d   :  { %2647 = vmatpush1.bf16.msra.mxu1 %v2504_v14  ;;  %v2536_v14 = vunpack.c.l.s8.bf16 %v2450_v5 }
 0x77e   :  { %2690 = vmatpush1.bf16.msra.mxu0 %v2568_v46  ;;  %2648 = vmatprep.subr.bf16.mxu1 %v2565_v61  ;;  %v2600_v46 = vunpack.c.l.s8.bf16 %v2482_v58  ;;  %v2535_v61 = vunpack.c.h.s8.bf16 %v2449_v29 }
 0x77f   :  { %2691 = vmatprep.subr.bf16.mxu0 %v2629_v60  ;;  %v2599_v60 = vunpack.c.h.s8.bf16 %v2481_v21 }
 0x781   :  { %2649 = vmatpush2.bf16.msra.mxu1 %v2564_v16  ;;  %v6374_v16 = vpack.c.bf16 %v6356_v52, %v6354_v7  ;;  %v2530_v7 = vunpack.c.l.s8.bf16 %v2448_v49  ;;  %v2594_v52 = vunpack.c.l.s8.bf16 %v2480_v47 }
 0x782   :  { %2692 = vmatpush2.bf16.msra.mxu0 %v2628_v25  ;;  %2650 = vmatprep.subr.bf16.mxu1 %v2561_v13  ;;  %v6378_v25 = vpack.c.bf16 %v6364_v10, %v6362_v38  ;;  %v2534_v13 = vunpack.c.h.s8.bf16 %v2448_v49 }
 0x783   :  { %2693 = vmatprep.subr.bf16.mxu0 %v2625_v63  ;;  %v2598_v63 = vunpack.c.h.s8.bf16 %v2480_v47 }
 0x785   :  { %2651 = vmatpush2.bf16.msra.mxu1 %v2560_v24  ;;  %v2445_v24 = vld [vmem:[#allocation8 + $0x58] sm:$0xff] }
 0x786   :  { %2694 = vmatpush2.bf16.msra.mxu0 %v2624_v48  ;;  %2652 = vmatprep.subr.bf16.mxu1 %v2557_v27  ;;  %v2477_v48 = vld [vmem:[#allocation8 + $0x158] sm:$0xff]  ;;  %v2527_v38 = vunpack.c.h.s8.bf16 %v2445_v24  ;;  %v2444_v27 = vld [vmem:[#allocation8 + $0x50] sm:$0xff] }
 0x787   :  { %2695 = vmatprep.subr.bf16.mxu0 %v2621_v20  ;;  %v2591_v10 = vunpack.c.h.s8.bf16 %v2477_v48  ;;  %v2476_v20 = vld [vmem:[#allocation8 + $0x150] sm:$0xff]  ;;  %v2526_v53 = vunpack.c.h.s8.bf16 %v2444_v27  ;;  %v2522_v19 = vunpack.c.l.s8.bf16 %v2444_v27 }
 0x788   :  { %v2590_v0 = vunpack.c.h.s8.bf16 %v2476_v20  ;;  %v2586_v62 = vunpack.c.l.s8.bf16 %v2476_v20 }
 0x789   :  { %2653 = vmatpush2.bf16.msra.mxu1 %v2556_v42  ;;  %v2523_v42 = vunpack.c.l.s8.bf16 %v2445_v24 }
 0x78a   :  { %2696 = vmatpush2.bf16.msra.mxu0 %v2620_v31  ;;  %2654 = vmatprep.subr.bf16.mxu1 %v2553_v6  ;;  %v2587_v31 = vunpack.c.l.s8.bf16 %v2477_v48  ;;  %v2441_v6 = vld [vmem:[#allocation8 + $0x38] sm:$0xff] }
 0x78b   :  { %2697 = vmatprep.subr.bf16.mxu0 %v2617_v39  ;;  %v2473_v39 = vld [vmem:[#allocation8 + $0x138] sm:$0xff]  ;;  %v2515_v59 = vunpack.c.l.s8.bf16 %v2441_v6 }
 0x78c   :  { %v2579_v3 = vunpack.c.l.s8.bf16 %v2473_v39 }
 0x78d   :  { %2655 = vmatpush2.bf16.msra.mxu1 %v2552_v51  ;;  %v2519_v51 = vunpack.c.h.s8.bf16 %v2441_v6 }
 0x78e   :  { %2698 = vmatpush2.bf16.msra.mxu0 %v2616_v12  ;;  %2656 = vmatprep.subr.bf16.mxu1 %v2549_v18  ;;  %v2440_v12 = vld [vmem:[#allocation8 + $0x30] sm:$0xff] }
 0x78f   :  { %2699 = vmatprep.subr.bf16.mxu0 %v2613_v50  ;;  %v2518_v18 = vunpack.c.h.s8.bf16 %v2440_v12 }
 0x791   :  { %2657 = vmatpush2.bf16.msra.mxu1 %v2548_v44  ;;  %v2437_v44 = vld [vmem:[#allocation8 + $0x18] sm:$0xff] }
 0x792   :  { %2700 = vmatpush2.bf16.msra.mxu0 %v2612_v9  ;;  %2658 = vmatprep.subr.bf16.mxu1 %v2545_v41  ;;  %v2469_v9 = vld [vmem:[#allocation8 + $0x118] sm:$0xff]  ;;  %v2514_v41 = vunpack.c.l.s8.bf16 %v2440_v12  ;;  %v2511_v35 = vunpack.c.h.s8.bf16 %v2437_v44  ;;  %v2507_v5 = vunpack.c.l.s8.bf16 %v2437_v44 }
 0x793   :  { %2701 = vmatprep.subr.bf16.mxu0 %v2609_v23  ;;  %v2575_v15 = vunpack.c.h.s8.bf16 %v2469_v9  ;;  %v2571_v58 = vunpack.c.l.s8.bf16 %v2469_v9 }
 0x795   :  { %2659 = vmatpush2.bf16.msra.mxu1 %v2544_v17  ;;  %v2436_v17 = vld [vmem:[#allocation8 + $0x10] sm:$0xff] }
 0x796   :  { %2702 = vmatpush2.bf16.msra.mxu0 %v2608_v56  ;;  %2660 = vmatprep.subr.bf16.mxu1 %v2541_v40  ;;  %v2468_v56 = vld [vmem:[#allocation8 + $0x110] sm:$0xff]  ;;  %v2510_v40 = vunpack.c.h.s8.bf16 %v2436_v17 }
 0x797   :  { %2703 = vmatprep.subr.bf16.mxu0 %v2605_v34  ;;  %v2574_v34 = vunpack.c.h.s8.bf16 %v2468_v56 }
 0x799   :  { %2661 = vmatpush2.bf16.msra.mxu1 %v2540_v4  ;;  %v2465_v4 = vld [vmem:[#allocation8 + $0xf8] sm:$0xff] }
 0x79a   :  { %2704 = vmatpush2.bf16.msra.mxu0 %v2604_v36  ;;  %2662 = vmatprep.subr.bf16.mxu1 %v2537_v8  ;;  %v2497_v36 = vld [vmem:[#allocation8 + $0x1f8] sm:$0xff]  ;;  %v2506_v8 = vunpack.c.l.s8.bf16 %v2436_v17  ;;  %v2567_v29 = vunpack.c.h.s8.bf16 %v2465_v4  ;;  %v2563_v49 = vunpack.c.l.s8.bf16 %v2465_v4 }
 0x79b   :  { %2705 = vmatprep.subr.bf16.mxu0 %v2601_v30  ;;  %v2570_v30 = vunpack.c.l.s8.bf16 %v2468_v56  ;;  %v2631_v21 = vunpack.c.h.s8.bf16 %v2497_v36  ;;  %v2627_v47 = vunpack.c.l.s8.bf16 %v2497_v36 }
 0x79d   :  { %2663 = vmatpush2.bf16.msra.mxu1 %v2536_v14  ;;  %v2464_v14 = vld [vmem:[#allocation8 + $0xf0] sm:$0xff] }
 0x79e   :  { %2706 = vmatpush2.bf16.msra.mxu0 %v2600_v46  ;;  %2718 = vmatprep.subr.bf16.mxu1 %v2535_v61  ;;  %v2496_v46 = vld [vmem:[#allocation8 + $0x1f0] sm:$0xff]  ;;  %v2566_v61 = vunpack.c.h.s8.bf16 %v2464_v14 }
 0x79f   :  { %2761 = vmatprep.subr.bf16.mxu0 %v2599_v60  ;;  %v2630_v60 = vunpack.c.h.s8.bf16 %v2496_v46 }
 0x7a0   :  { %2665 = vmatmul.mubr.bf16.vlgmr.msra.gmra.mxu1 %v6374_v16 }
 0x7a1   :  { %2708 = vmatmul.mubr.bf16.vlgmr.msra.gmra.mxu0 %v6378_v25  ;;  %2719 = vmatpush1.bf16.msra.mxu1 %v2534_v13  ;;  %v2461_v13 = vld [vmem:[#allocation8 + $0xd8] sm:$0xff] }
 0x7a2   :  { %2762 = vmatpush1.bf16.msra.mxu0 %v2598_v63  ;;  %2720 = vmatprep.subr.bf16.mxu1 %v2531_v37  ;;  %v2493_v63 = vld [vmem:[#allocation8 + $0x1d8] sm:$0xff]  ;;  %v2562_v37 = vunpack.c.l.s8.bf16 %v2464_v14  ;;  %v2559_v24 = vunpack.c.h.s8.bf16 %v2461_v13  ;;  %v2555_v27 = vunpack.c.l.s8.bf16 %v2461_v13 }
 0x7a3   :  { %2763 = vmatprep.subr.bf16.mxu0 %v2595_v57  ;;  %2750 = vmatprep.mubr.bf16.mxu1 %v6366_v11  ;;  %v2583_v11 = vunpack.c.h.s8.bf16 %v2473_v39  ;;  %v2626_v57 = vunpack.c.l.s8.bf16 %v2496_v46  ;;  %v2623_v48 = vunpack.c.h.s8.bf16 %v2493_v63  ;;  %v2619_v20 = vunpack.c.l.s8.bf16 %v2493_v63 }
 0x7a4   :  { %2793 = vmatprep.mubr.bf16.mxu0 %v6368_v33  ;;  %v2472_v33 = vld [vmem:[#allocation8 + $0x130] sm:$0xff] }
 0x7a5   :  { %2721 = vmatpush1.bf16.msra.mxu1 %v2530_v7  ;;  %v2582_v50 = vunpack.c.h.s8.bf16 %v2472_v33  ;;  %v2578_v23 = vunpack.c.l.s8.bf16 %v2472_v33  ;;  %v2460_v7 = vld [vmem:[#allocation8 + $0xd0] sm:$0xff] }
 0x7a6   :  { %2764 = vmatpush1.bf16.msra.mxu0 %v2594_v52  ;;  %2722 = vmatprep.subr.bf16.mxu1 %v2527_v38  ;;  %v2492_v52 = vld [vmem:[#allocation8 + $0x1d0] sm:$0xff]  ;;  %v2558_v38 = vunpack.c.h.s8.bf16 %v2460_v7 }
 0x7a7   :  { %2765 = vmatprep.subr.bf16.mxu0 %v2591_v10  ;;  %v2622_v10 = vunpack.c.h.s8.bf16 %v2492_v52 }
 0x7a9   :  { %2723 = vmatpush1.bf16.msra.mxu1 %v2526_v53  ;;  %v2457_v53 = vld [vmem:[#allocation8 + $0xb8] sm:$0xff] }
 0x7aa   :  { %2766 = vmatpush1.bf16.msra.mxu0 %v2590_v0  ;;  %2724 = vmatprep.subr.bf16.mxu1 %v2523_v42  ;;  %v2489_v0 = vld [vmem:[#allocation8 + $0x1b8] sm:$0xff]  ;;  %v2554_v42 = vunpack.c.l.s8.bf16 %v2460_v7  ;;  %v2551_v6 = vunpack.c.h.s8.bf16 %v2457_v53  ;;  %v2547_v12 = vunpack.c.l.s8.bf16 %v2457_v53 }
 0x7ab   :  { %2767 = vmatprep.subr.bf16.mxu0 %v2587_v31  ;;  %v2618_v31 = vunpack.c.l.s8.bf16 %v2492_v52  ;;  %v2615_v39 = vunpack.c.h.s8.bf16 %v2489_v0  ;;  %v2611_v33 = vunpack.c.l.s8.bf16 %v2489_v0 }
 0x7ad   :  { %2725 = vmatpush1.bf16.msra.mxu1 %v2522_v19  ;;  %v2456_v19 = vld [vmem:[#allocation8 + $0xb0] sm:$0xff] }
 0x7ae   :  { %2768 = vmatpush1.bf16.msra.mxu0 %v2586_v62  ;;  %2726 = vmatprep.subr.bf16.mxu1 %v2519_v51  ;;  %v2488_v62 = vld [vmem:[#allocation8 + $0x1b0] sm:$0xff]  ;;  %v2550_v51 = vunpack.c.h.s8.bf16 %v2456_v19 }
 0x7af   :  { %2769 = vmatprep.subr.bf16.mxu0 %v2583_v11  ;;  %v2614_v11 = vunpack.c.h.s8.bf16 %v2488_v62 }
 0x7b1   :  { %2727 = vmatpush1.bf16.msra.mxu1 %v2518_v18  ;;  %v2453_v18 = vld [vmem:[#allocation8 + $0x98] sm:$0xff] }
 0x7b2   :  { %2770 = vmatpush1.bf16.msra.mxu0 %v2582_v50  ;;  %2728 = vmatprep.subr.bf16.mxu1 %v2515_v59  ;;  %v2485_v50 = vld [vmem:[#allocation8 + $0x198] sm:$0xff]  ;;  %v2546_v59 = vunpack.c.l.s8.bf16 %v2456_v19  ;;  %v2543_v44 = vunpack.c.h.s8.bf16 %v2453_v18  ;;  %v2539_v17 = vunpack.c.l.s8.bf16 %v2453_v18 }
 0x7b3   :  { %2771 = vmatprep.subr.bf16.mxu0 %v2579_v3  ;;  %v2610_v3 = vunpack.c.l.s8.bf16 %v2488_v62  ;;  %v2607_v9 = vunpack.c.h.s8.bf16 %v2485_v50  ;;  %v2603_v56 = vunpack.c.l.s8.bf16 %v2485_v50 }
 0x7b5   :  { %2729 = vmatpush1.bf16.msra.mxu1 %v2514_v41  ;;  %v2452_v41 = vld [vmem:[#allocation8 + $0x90] sm:$0xff] }
 0x7b6   :  { %2772 = vmatpush1.bf16.msra.mxu0 %v2578_v23  ;;  %2730 = vmatprep.subr.bf16.mxu1 %v2511_v35  ;;  %v2484_v23 = vld [vmem:[#allocation8 + $0x190] sm:$0xff]  ;;  %v2542_v35 = vunpack.c.h.s8.bf16 %v2452_v41 }
 0x7b7   :  { %2773 = vmatprep.subr.bf16.mxu0 %v2575_v15  ;;  %v2606_v15 = vunpack.c.h.s8.bf16 %v2484_v23 }
 0x7b9   :  { %2731 = vmatpush1.bf16.msra.mxu1 %v2510_v40  ;;  %v2538_v40 = vunpack.c.l.s8.bf16 %v2452_v41 }
 0x7ba   :  { %2774 = vmatpush1.bf16.msra.mxu0 %v2574_v34  ;;  %2732 = vmatprep.subr.bf16.mxu1 %v2507_v5  ;;  %v2602_v34 = vunpack.c.l.s8.bf16 %v2484_v23  ;;  %v2499_v5 = vld [vmem:[%s6555_s4 + $0x21] sm:$0xf] }
 0x7bb   :  { %2775 = vmatprep.subr.bf16.mxu0 %v2571_v58  ;;  %v2498_v58 = vld [vmem:[%s6555_s4 + $0x1d] sm:$0xf]  ;;  %v2808_v4 = vrot.slane %v2499_v5, %v6683_v2  ;;  %v2816_v19 = vrot.slane %v2499_v5, %v6685_v55 }
 0x7bd   :  { %2733 = vmatpush1.bf16.msra.mxu1 %v2506_v8 }
 0x7be   :  { %2776 = vmatpush1.bf16.msra.mxu0 %v2570_v30  ;;  %2734 = vmatprep.subr.bf16.mxu1 %v2567_v29  ;;  %v2837_v29 = vrot.slane %v2498_v58, %v6683_v2 }
 0x7bf   :  { %2777 = vmatprep.subr.bf16.mxu0 %v2631_v21  ;;  %v2812_v21 = vrot.slane %v2499_v5, %v6684_v26 }
 0x7c1   :  { %2735 = vmatpush2.bf16.msra.mxu1 %v2566_v61  ;;  %v2841_v61 = vrot.slane %v2498_v58, %v6684_v26 }
 0x7c2   :  { %2778 = vmatpush2.bf16.msra.mxu0 %v2630_v60  ;;  %2736 = vmatprep.subr.bf16.mxu1 %v2563_v49 }
 0x7c3   :  { %2779 = vmatprep.subr.bf16.mxu0 %v2627_v47 }
 0x7c5   :  { %2737 = vmatpush2.bf16.msra.mxu1 %v2562_v37 }
 0x7c6   :  { %2780 = vmatpush2.bf16.msra.mxu0 %v2626_v57  ;;  %2738 = vmatprep.subr.bf16.mxu1 %v2559_v24 }
 0x7c7   :  { %2781 = vmatprep.subr.bf16.mxu0 %v2623_v48 }
 0x7c9   :  { %2739 = vmatpush2.bf16.msra.mxu1 %v2558_v38 }
 0x7ca   :  { %2782 = vmatpush2.bf16.msra.mxu0 %v2622_v10  ;;  %2740 = vmatprep.subr.bf16.mxu1 %v2555_v27 }
 0x7cb   :  { %2783 = vmatprep.subr.bf16.mxu0 %v2619_v20 }
 0x7cd   :  { %2741 = vmatpush2.bf16.msra.mxu1 %v2554_v42 }
 0x7ce   :  { %2784 = vmatpush2.bf16.msra.mxu0 %v2618_v31  ;;  %2742 = vmatprep.subr.bf16.mxu1 %v2551_v6 }
 0x7cf   :  { %2785 = vmatprep.subr.bf16.mxu0 %v2615_v39 }
 0x7d1   :  { %2743 = vmatpush2.bf16.msra.mxu1 %v2550_v51 }
 0x7d2   :  { %2786 = vmatpush2.bf16.msra.mxu0 %v2614_v11  ;;  %2744 = vmatprep.subr.bf16.mxu1 %v2547_v12  ;;  %v2845_v12 = vrot.slane %v2498_v58, %v6685_v55 }
 0x7d3   :  { %2787 = vmatprep.subr.bf16.mxu0 %v2611_v33  ;;  %v2820_v33 = vrot.slane %v2499_v5, %v6686_v1 }
 0x7d5   :  { %2745 = vmatpush2.bf16.msra.mxu1 %v2546_v59 }
 0x7d6   :  { %2788 = vmatpush2.bf16.msra.mxu0 %v2610_v3  ;;  %2746 = vmatprep.subr.bf16.mxu1 %v2543_v44  ;;  %v2849_v44 = vrot.slane %v2498_v58, %v6686_v1 }
 0x7d7   :  { %2789 = vmatprep.subr.bf16.mxu0 %v2607_v9 }
 0x7d9   :  { %2747 = vmatpush2.bf16.msra.mxu1 %v2542_v35 }
 0x7da   :  { %2790 = vmatpush2.bf16.msra.mxu0 %v2606_v15  ;;  %2748 = vmatprep.subr.bf16.mxu1 %v2539_v17 }
 0x7db   :  { %2791 = vmatprep.subr.bf16.mxu0 %v2603_v56 }
 0x7dd   :  { %2749 = vmatpush2.bf16.msra.mxu1 %v2538_v40 }
 0x7de   :  { %2792 = vmatpush2.bf16.msra.mxu0 %v2602_v34 }
 0x7e0   :  { %2751 = vmatmul.mubr.bf16.vlgmr.msra.gmra.mxu1 %v6374_v16 }
 0x7e1   :  { %2794 = vmatmul.mubr.bf16.vlgmr.msra.gmra.mxu0 %v6378_v25 }
 0x860   :  { %v2666_v36 = vpop.f32.mrf.mxu1 }
 0x861   :  { %v2709_v8 = vpop.f32.mrf.mxu0 }
 0x862   :  { %v2710_v30 = vadd.f32 %v2709_v8, %v2666_v36  ;;  %v2668_v16 = vpop.f32.mrf.mxu1 }
 0x863   :  { %v2711_v14 = vpop.f32.mrf.mxu0 }
 0x864   :  { %v2825_v25 = vmul.f32 %v2808_v4, %v2710_v30  ;;  %v2712_v46 = vadd.f32 %v2711_v14, %v2668_v16  ;;  %v2670_v60 = vpop.f32.mrf.mxu1 }
 0x865   :  { %v2713_v49 = vpop.f32.mrf.mxu0 }
 0x866   :  { %v2854_v47 = vadd.f32 %v2837_v29, %v2825_v25  ;;  %v2826_v13 = vmul.f32 %v2812_v21, %v2712_v46  ;;  %v2714_v63 = vadd.f32 %v2713_v49, %v2670_v60  ;;  %v2672_v37 = vpop.f32.mrf.mxu1 }
 0x867   :  { %v2715_v57 = vpop.f32.mrf.mxu0 }
 0x868   :  { %vm2862_vm11 = vcmp.gt.f32.partialorder %v2854_v47, 0.0  ;;  %v2870_v24 = vmul.f32 0.01, %v2854_v47  ;;  %v2855_v48 = vadd.f32 %v2841_v61, %v2826_v13  ;;  %v2829_v7 = vmul.f32 %v2808_v4, %v2714_v63 }
 0x869   :  { %v2716_v52 = vadd.f32 %v2715_v57, %v2672_v37 }
 0x86a   :  { %v6396_v38 = vsel %vm2862_vm11, %v2854_v47, %v2870_v24  ;;  %vm2863_vm12 = vcmp.gt.f32.partialorder %v2855_v48, 0.0  ;;  %v2871_v10 = vmul.f32 0.01, %v2855_v48  ;;  %v2858_v27 = vadd.f32 %v2837_v29, %v2829_v7 }
 0x86b   :  { %v2830_v20 = vmul.f32 %v2812_v21, %v2716_v52 }
 0x86c   :  { %v2879_v53 = vsel %vm2863_vm12, %v2855_v48, %v2871_v10  ;;  %vm2866_vm13 = vcmp.gt.f32.partialorder %v2858_v27, 0.0  ;;  %v2874_v0 = vmul.f32 0.01, %v2858_v27 }
 0x86d   :  { %v2859_v42 = vadd.f32 %v2841_v61, %v2830_v20 }
 0x86e   :  { %v6398_v31 = vsel %vm2866_vm13, %v2858_v27, %v2874_v0 }
 0x86f   :  { %vm2867_vm14 = vcmp.gt.f32.partialorder %v2859_v42, 0.0  ;;  %v2875_v6 = vmul.f32 0.01, %v2859_v42 }
 0x871   :  { %v2883_v39 = vsel %vm2867_vm14, %v2859_v42, %v2875_v6 }
 0x8a0   :  { %v2752_v62 = vpop.f32.mrf.mxu1 }
 0x8a1   :  { %v2795_v51 = vpop.f32.mrf.mxu0 }
 0x8a2   :  { %v2796_v11 = vadd.f32 %v2795_v51, %v2752_v62  ;;  %v2754_v18 = vpop.f32.mrf.mxu1 }
 0x8a3   :  { %v2797_v50 = vpop.f32.mrf.mxu0 }
 0x8a4   :  { %v2827_v59 = vmul.f32 %v2816_v19, %v2796_v11  ;;  %v2798_v3 = vadd.f32 %v2797_v50, %v2754_v18  ;;  %v2756_v9 = vpop.f32.mrf.mxu1 }
 0x8a5   :  { %v2799_v41 = vpop.f32.mrf.mxu0 }
 0x8a6   :  { %v2856_v23 = vadd.f32 %v2845_v12, %v2827_v59  ;;  %v2828_v35 = vmul.f32 %v2820_v33, %v2798_v3  ;;  %v2800_v15 = vadd.f32 %v2799_v41, %v2756_v9  ;;  %v2758_v17 = vpop.f32.mrf.mxu1 }
 0x8a7   :  { %v2801_v56 = vpop.f32.mrf.mxu0 }
 0x8a8   :  { %vm2864_vm15 = vcmp.gt.f32.partialorder %v2856_v23, 0.0  ;;  %v2872_v40 = vmul.f32 0.01, %v2856_v23  ;;  %v2857_v34 = vadd.f32 %v2849_v44, %v2828_v35  ;;  %v2831_v4 = vmul.f32 %v2816_v19, %v2800_v15 }
 0x8a9   :  { %v2802_v36 = vadd.f32 %v2801_v56, %v2758_v17 }
 0x8aa   :  { %v6404_v8 = vsel %vm2864_vm15, %v2856_v23, %v2872_v40  ;;  %vm2865_vm0 = vcmp.gt.f32.partialorder %v2857_v34, 0.0  ;;  %v2873_v5 = vmul.f32 0.01, %v2857_v34  ;;  %v2860_v30 = vadd.f32 %v2845_v12, %v2831_v4 }
 0x8ab   :  { %v2832_v29 = vmul.f32 %v2820_v33, %v2802_v36 }
 0x8ac   :  { %v2881_v21 = vsel %vm2865_vm0, %v2857_v34, %v2873_v5  ;;  %vm2868_vm1 = vcmp.gt.f32.partialorder %v2860_v30, 0.0  ;;  %v2876_v58 = vmul.f32 0.01, %v2860_v30 }
 0x8ad   :  { %v2861_v16 = vadd.f32 %v2849_v44, %v2832_v29 }
 0x8ae   :  { %v6406_v14 = vsel %vm2868_vm1, %v2860_v30, %v2876_v58 }
 0x8af   :  { %vm2869_vm2 = vcmp.gt.f32.partialorder %v2861_v16, 0.0  ;;  %v2877_v25 = vmul.f32 0.01, %v2861_v16 }
 0x8b1   :  { %v2885_v46 = vsel %vm2869_vm2, %v2861_v16, %v2877_v25 }
 0x8b2   :  { %5300 = dma.done.wait [#allocation14 + $0x7], 4096 }
 0x8b3   :  { %5301 = vsyncadd [#allocation14 + $0x7], 4294963200  ;;  %v2956_v61 = vpack.c.bf16 %v2883_v39, %v2879_v53  ;;  %v2958_v60 = vpack.c.bf16 %v2885_v46, %v2881_v21  ;;  %v5114_v49 = vld [vmem:[#allocation9 + $0x78] sm:$0xff]   ;;  %v5118_v37 = vld [vmem:[#allocation9 + $0x70] sm:$0xff]   ;;  %v2955_v35 = vpack.c.bf16 %v6398_v31, %v6396_v38  ;;  %v2957_v15 = vpack.c.bf16 %v6406_v14, %v6404_v8 }
 0x8b4   :  { %v5115_v47 = vld [vmem:[#allocation9 + $0xf8] sm:$0xff]   ;;  %4976 = vmatprep.subr.bf16.mxu1 %v5114_v49  ;;  %v5119_v57 = vld [vmem:[#allocation9 + $0xf0] sm:$0xff]   ;;  %v5122_v7 = vld [vmem:[#allocation9 + $0x68] sm:$0xff]  }
 0x8b5   :  { %3189 = vmatprep.mubr.bf16.mxu1 %v2956_v61  ;;  %3230 = vmatprep.mubr.bf16.mxu0 %v2958_v60  ;;  %v5116_v13 = vld [vmem:[#allocation9 + $0x38] sm:$0xff]   ;;  %v5120_v24 = vld [vmem:[#allocation9 + $0x30] sm:$0xff]   ;;  %v5123_v52 = vld [vmem:[#allocation9 + $0xe8] sm:$0xff]  }
 0x8b6   :  { %4998 = vmatprep.subr.bf16.mxu0 %v5115_v47  ;;  %v5117_v63 = vld [vmem:[#allocation9 + $0xb8] sm:$0xff]   ;;  %4977 = vmatpush3.bf16.msra.mxu1 %v5116_v13  ;;  %v5121_v48 = vld [vmem:[#allocation9 + $0xb0] sm:$0xff]   ;;  %v5124_v10 = vld [vmem:[#allocation9 + $0x28] sm:$0xff]  }
 0x8b7   :  { %4999 = vmatpush3.bf16.msra.mxu0 %v5117_v63  ;;  %4978 = vmatprep.subr.bf16.mxu1 %v5118_v37  ;;  %v5125_v27 = vld [vmem:[#allocation9 + $0xa8] sm:$0xff]   ;;  %v5126_v20 = vld [vmem:[#allocation9 + $0x60] sm:$0xff]   ;;  %v5130_v6 = vld [vmem:[#allocation9 + $0x58] sm:$0xff]  }
 0x8b8   :  { %5000 = vmatprep.subr.bf16.mxu0 %v5119_v57  ;;  %v5127_v53 = vld [vmem:[#allocation9 + $0xe0] sm:$0xff]   ;;  %v5131_v39 = vld [vmem:[#allocation9 + $0xd8] sm:$0xff]   ;;  %v5134_v51 = vld [vmem:[#allocation9 + $0x50] sm:$0xff]  }
 0x8b9   :  { %v5128_v0 = vld [vmem:[#allocation9 + $0x20] sm:$0xff]   ;;  %v5132_v19 = vld [vmem:[#allocation9 + $0x18] sm:$0xff]   ;;  %v5135_v11 = vld [vmem:[#allocation9 + $0xd0] sm:$0xff]  }
 0x8ba   :  { %4979 = vmatpush3.bf16.msra.mxu1 %v5120_v24  ;;  %v5129_v42 = vld [vmem:[#allocation9 + $0xa0] sm:$0xff]   ;;  %v5133_v62 = vld [vmem:[#allocation9 + $0x98] sm:$0xff]   ;;  %v5136_v12 = vld [vmem:[#allocation9 + $0x10] sm:$0xff]  }
 0x8bb   :  { %5001 = vmatpush3.bf16.msra.mxu0 %v5121_v48  ;;  %4980 = vmatprep.subr.bf16.mxu1 %v5122_v7  ;;  %v5137_v33 = vld [vmem:[#allocation9 + $0x90] sm:$0xff]   ;;  %v5138_v18 = vld [vmem:[#allocation9 + $0x48] sm:$0xff]   ;;  %v5142_v44 = vld [vmem:[#allocation9 + $0x40] sm:$0xff]  }
 0x8bc   :  { %5002 = vmatprep.subr.bf16.mxu0 %v5123_v52  ;;  %v5139_v50 = vld [vmem:[#allocation9 + $0xc8] sm:$0xff]   ;;  %v5143_v9 = vld [vmem:[#allocation9 + $0xc0] sm:$0xff]   ;;  %v6691_v60 = vld [vmem:[#allocation78_spill] sm:$0xff] }
 0x8bd   :  { %v5140_v59 = vld [vmem:[#allocation9 + $0x8] sm:$0xff]   ;;  %v5144_v41 = vld [vmem:[#allocation9] sm:$0xff]  }
 0x8be   :  { %4981 = vmatpush3.bf16.msra.mxu1 %v5124_v10  ;;  %v5141_v3 = vld [vmem:[#allocation9 + $0x88] sm:$0xff]   ;;  %v5145_v23 = vld [vmem:[#allocation9 + $0x80] sm:$0xff]  }
 0x8bf   :  { %5003 = vmatpush3.bf16.msra.mxu0 %v5125_v27  ;;  %4982 = vmatprep.subr.bf16.mxu1 %v5126_v20  ;;  %v4864_v40 = vld [vmem:[%s6555_s4 + $0x25] ss:$0 sm:$0xff]  ;;  %v6693_v27 = vld [vmem:[#allocation76_spill] sm:$0xff] }
 0x8c0   :  { %5004 = vmatprep.subr.bf16.mxu0 %v5127_v53  ;;  %v6692_v49 = vld [vmem:[#allocation79_spill] sm:$0xff]  ;;  %v4898_v20 = vcombine.high %v6693_v27, %v6693_v27 }
 0x8c1   :  { %v3241_v47 = vmul.f32 %v6692_v49, %v6691_v60 }
 0x8c2   :  { %4983 = vmatpush3.bf16.msra.mxu1 %v5128_v0  ;;  %v4897_v0 = vcombine.low %v6693_v27, %v6693_v27 }
 0x8c3   :  { %5005 = vmatpush3.bf16.msra.mxu0 %v5129_v42  ;;  %4984 = vmatprep.subr.bf16.mxu1 %v5130_v6 }
 0x8c4   :  { %5006 = vmatprep.subr.bf16.mxu0 %v5131_v39 }
 0x8c6   :  { %4985 = vmatpush3.bf16.msra.mxu1 %v5132_v19 }
 0x8c7   :  { %5007 = vmatpush3.bf16.msra.mxu0 %v5133_v62  ;;  %4986 = vmatprep.subr.bf16.mxu1 %v5134_v51 }
 0x8c8   :  { %5008 = vmatprep.subr.bf16.mxu0 %v5135_v11 }
 0x8ca   :  { %4987 = vmatpush3.bf16.msra.mxu1 %v5136_v12 }
 0x8cb   :  { %5009 = vmatpush3.bf16.msra.mxu0 %v5137_v33  ;;  %4988 = vmatprep.subr.bf16.mxu1 %v5138_v18 }
 0x8cc   :  { %5010 = vmatprep.subr.bf16.mxu0 %v5139_v50 }
 0x8ce   :  { %4989 = vmatpush3.bf16.msra.mxu1 %v5140_v59 }
 0x8cf   :  { %5011 = vmatpush3.bf16.msra.mxu0 %v5141_v3  ;;  %4990 = vmatprep.subr.bf16.mxu1 %v5142_v44 }
 0x8d0   :  { %5012 = vmatprep.subr.bf16.mxu0 %v5143_v9 }
 0x8d2   :  { %4991 = vmatpush3.bf16.msra.mxu1 %v5144_v41 }
 0x8d3   :  { %5013 = vmatpush3.bf16.msra.mxu0 %v5145_v23 }
 0x8d5   :  { %3190 = vmatmul.mubr.bf16.vlgmr.msra.gmra.mxu1 %v2955_v35 }
 0x8d6   :  { %3231 = vmatmul.mubr.bf16.vlgmr.msra.gmra.mxu0 %v2957_v15  ;;  %3337 = vmatprep.mubr.bf16.mxu1 %v6689_v28 }
 0x995   :  { %v4992_v17 = vpop.f32.mrf.mxu1 }
 0x996   :  { %v5014_v56 = vpop.f32.mrf.mxu0 }
 0x997   :  { %v4993_v34 = vpop.f32.mrf.mxu1 }
 0x998   :  { %v4994_v4 = vadd.f32 %v4993_v34, %v4992_v17  ;;  %v5015_v36 = vpop.f32.mrf.mxu0 }
 0x999   :  { %v4995_v5 = vpop.f32.mrf.mxu1  ;;  %v5016_v29 = vadd.f32 %v5015_v36, %v5014_v56 }
 0x99a   :  { %v3192_v30 = vadd.f32 %v4994_v4, %v4864_v40  ;;  %v5017_v38 = vpop.f32.mrf.mxu0 }
 0x99b   :  { %v4996_v31 = vpop.f32.mrf.mxu1 }
 0x99c   :  { %v3233_v21 = vadd.f32 %v5016_v29, %v3192_v30  ;;  %v4997_v58 = vadd.f32 %v4996_v31, %v4995_v5  ;;  %v5018_v8 = vpop.f32.mrf.mxu0 }
 0x99d   :  { %v5019_v14 = vadd.f32 %v5018_v8, %v5017_v38 }
 0x99e   :  { %v3195_v16 = vadd.f32 %v4997_v58, %v4864_v40  ;;  %5146 = vtanh.f32 %v3233_v21 }
 0x9a0   :  { %v3236_v25 = vadd.f32 %v5019_v14, %v3195_v16 }
 0x9a2   :  { %5148 = vtanh.f32 %v3236_v25 }
 0x9ab   :  { %v5147_v46 = vpop.eup %5146 }
 0x9ac   :  { %v3242_v63 = vmul.f32 %v5147_v46, %v6287_v54 }
 0x9ae   :  { %v3244_v24 = vmul.f32 %v3242_v63, %v3241_v47 }
 0x9af   :  { %v5149_v61 = vpop.eup %5148 }
 0x9b0   :  { %v3243_v13 = vmul.f32 %v5149_v61, %v6289_v43  ;;  %v3245_v48 = vsel %vm1752_vm5, %v3244_v24, 0.0  ;;  %v6694_v43 = vld [vmem:[#allocation77_spill] sm:$0xff] }
 0x9b1   :  { %v4900_v53 = vcombine.high %v6694_v43, %v6694_v43  ;;  %v4899_v42 = vcombine.low %v6694_v43, %v6694_v43 }
 0x9b2   :  { %v3248_v37 = vmul.f32 %v3243_v13, %v3241_v47 }
 0x9b4   :  { %v3249_v57 = vsel %vm1752_vm5, %v3248_v37, 0.0 }
 0x9b5   :  { %3250 = vadd.xlane.f32.xlu0 %v3249_v57 }
 0x9b9   :  { %3246 = vadd.xlane.f32.xlu0 %v3245_v48 }
 0xa3e   :  { %v3251_v7 = vpop.xlane.xlu0 %3250 }
 0xa3f   :  { %v6422_v52 = vadd.f32 %v6285_v32, %v3251_v7 }
 0xa42   :  { %v6424_v10 = vpop.xlane.xlu0 %3246 }
 0xa43   :  { %5302 = dma.done.wait [#allocation14 + $0x8], 256 }
 0xa44   :  { %5303 = vsyncadd [#allocation14 + $0x8], 4294967040  ;;  %3378 = vmatprep.mubr.bf16.mxu0 %v6689_v28  ;;  %4901 = vmatprep.subr.msk.bf16.mxu1 %vm1855_vm7, %v4898_v20  ;;  %v3294_v32 = vsel %vm1855_vm7, %v4897_v0, 0  ;;  %v3300_v6 = vsel %vm1855_vm7, %v4899_v42, 0  ;;  %v3258_v39 = vpack.c.bf16 %v6287_v54, %v6287_v54  ;;  %v3257_v28 = vld [vmem:[%s6555_s4 + $0x26] sm:$0xf] }
 0xa45   :  { %4903 = vmatprep.subr.msk.bf16.mxu0 %vm1855_vm7, %v4900_v53  ;;  %3320 = vmatpush1.bf16.msra.mxu1 %v3294_v32  ;;  %v3263_v19 = vrot.slane %v3257_v28, %v6683_v2  ;;  %v3271_v62 = vrot.slane %v3257_v28, %v6685_v55  ;;  %v3267_v12 = vrot.slane %v3257_v28, %v6684_v26 }
 0xa46   :  { %3361 = vmatpush1.bf16.msra.mxu0 %v3300_v6  ;;  %v3275_v33 = vrot.slane %v3257_v28, %v6686_v1 }
 0xa48   :  { %4902 = vmatmul.mubr.msk.bf16.vlgmr.msra.gmra.mxu1 %vm1752_vm5, %v3258_v39 }
 0xa49   :  { %4904 = vmatmul.mubr.msk.bf16.vlgmr.msra.gmra.mxu0 %vm1752_vm5, %v3258_v39 }
 0xb08   :  { %v3339_v51 = vpop.f32.mrf.mxu1 }
 0xb09   :  { %v3380_v11 = vpop.f32.mrf.mxu0  ;;  %v3340_v18 = vadd.f32 %v3339_v51, %v3263_v19 }
 0xb0a   :  { %v3381_v50 = vadd.f32 %v3380_v11, %v3271_v62  ;;  %v3341_v59 = vpop.f32.mrf.mxu1 }
 0xb0b   :  { %v3382_v3 = vpop.f32.mrf.mxu0  ;;  %vm3387_vm7 = vcmp.gt.f32.partialorder %v3340_v18, 0.0  ;;  %v3391_v44 = vmul.f32 0.01, %v3340_v18  ;;  %v3342_v41 = vadd.f32 %v3341_v59, %v3267_v12 }
 0xb0c   :  { %vm3389_vm3 = vcmp.gt.f32.partialorder %v3381_v50, 0.0  ;;  %v3393_v9 = vmul.f32 0.01, %v3381_v50  ;;  %v3383_v23 = vadd.f32 %v3382_v3, %v3275_v33  ;;  %v3343_v35 = vpop.f32.mrf.mxu1 }
 0xb0d   :  { %v3384_v15 = vpop.f32.mrf.mxu0  ;;  %v6451_v17 = vsel %vm3387_vm7, %v3340_v18, %v3391_v44  ;;  %vm3388_vm4 = vcmp.gt.f32.partialorder %v3342_v41, 0.0  ;;  %v3392_v40 = vmul.f32 0.01, %v3342_v41 }
 0xb0e   :  { %v6453_v56 = vsel %vm3389_vm3, %v3381_v50, %v3393_v9  ;;  %vm3390_vm8 = vcmp.gt.f32.partialorder %v3383_v23, 0.0  ;;  %v3394_v34 = vmul.f32 0.01, %v3383_v23  ;;  %v3344_v4 = vpop.f32.mrf.mxu1 }
 0xb0f   :  { %v3385_v36 = vpop.f32.mrf.mxu0  ;;  %v3396_v5 = vsel %vm3388_vm4, %v3342_v41, %v3392_v40 }
 0xb10   :  { %v3398_v30 = vsel %vm3390_vm8, %v3383_v23, %v3394_v34 }
 0xb11   :  { %5304 = dma.done.wait [#allocation14 + $0x9], 8192 }
 0xb12   :  { %5305 = vsyncadd [#allocation14 + $0x9], 4294959104  ;;  %v6455_v29 = vpack.c.bf16 %v3396_v5, %v3396_v5  ;;  %v6457_v38 = vpack.c.bf16 %v3398_v30, %v3398_v30  ;;  %v3414_v31 = vld [vmem:[#allocation11 + $0x68] sm:$0xff]  ;;  %v3413_v58 = vld [vmem:[#allocation11 + $0x60] sm:$0xff] }
 0xb13   :  { %v3446_v21 = vld [vmem:[#allocation11 + $0x168] sm:$0xff]  ;;  %v3496_v8 = vunpack.c.l.s8.bf16 %v3414_v31  ;;  %v3500_v16 = vunpack.c.h.s8.bf16 %v3414_v31  ;;  %v3445_v46 = vld [vmem:[#allocation11 + $0x160] sm:$0xff]  ;;  %v3499_v61 = vunpack.c.h.s8.bf16 %v3413_v58  ;;  %v3495_v63 = vunpack.c.l.s8.bf16 %v3413_v58 }
 0xb14   :  { %3631 = vmatprep.mubr.bf16.mxu1 %v6455_v29  ;;  %3672 = vmatprep.mubr.bf16.mxu0 %v6457_v38  ;;  %v3560_v14 = vunpack.c.l.s8.bf16 %v3446_v21  ;;  %v3564_v25 = vunpack.c.h.s8.bf16 %v3446_v21  ;;  %v3563_v49 = vunpack.c.h.s8.bf16 %v3445_v46  ;;  %v3410_v47 = vld [vmem:[#allocation11 + $0x48] sm:$0xff]  ;;  %v3559_v37 = vunpack.c.l.s8.bf16 %v3445_v46  ;;  %v3409_v48 = vld [vmem:[#allocation11 + $0x40] sm:$0xff] }
 0xb15   :  { %v3442_v13 = vld [vmem:[#allocation11 + $0x148] sm:$0xff]  ;;  %3599 = vmatprep.subr.bf16.mxu1 %v3500_v16  ;;  %v3492_v57 = vunpack.c.h.s8.bf16 %v3410_v47  ;;  %v3441_v7 = vld [vmem:[#allocation11 + $0x140] sm:$0xff]  ;;  %v3491_v27 = vunpack.c.h.s8.bf16 %v3409_v48  ;;  %v3488_v43 = vunpack.c.l.s8.bf16 %v3410_v47  ;;  %v3487_v32 = vunpack.c.l.s8.bf16 %v3409_v48 }
 0xb16   :  { %3640 = vmatprep.subr.bf16.mxu0 %v3564_v25  ;;  %3600 = vmatpush1.bf16.msra.mxu1 %v3499_v61  ;;  %v3556_v24 = vunpack.c.h.s8.bf16 %v3442_v13  ;;  %v3555_v20 = vunpack.c.h.s8.bf16 %v3441_v7  ;;  %v3552_v53 = vunpack.c.l.s8.bf16 %v3442_v13  ;;  %v3406_v0 = vld [vmem:[#allocation11 + $0x28] sm:$0xff]  ;;  %v3551_v6 = vunpack.c.l.s8.bf16 %v3441_v7  ;;  %v3405_v19 = vld [vmem:[#allocation11 + $0x20] sm:$0xff] }
 0xb17   :  { %3641 = vmatpush1.bf16.msra.mxu0 %v3563_v49  ;;  %3601 = vmatprep.subr.bf16.mxu1 %v3496_v8  ;;  %v3438_v42 = vld [vmem:[#allocation11 + $0x128] sm:$0xff]  ;;  %v3484_v39 = vunpack.c.h.s8.bf16 %v3406_v0  ;;  %v3437_v62 = vld [vmem:[#allocation11 + $0x120] sm:$0xff]  ;;  %v3483_v51 = vunpack.c.h.s8.bf16 %v3405_v19  ;;  %v3480_v12 = vunpack.c.l.s8.bf16 %v3406_v0  ;;  %v3479_v59 = vunpack.c.l.s8.bf16 %v3405_v19 }
 0xb18   :  { %3642 = vmatprep.subr.bf16.mxu0 %v3560_v14  ;;  %v3548_v28 = vunpack.c.h.s8.bf16 %v3438_v42  ;;  %v3547_v11 = vunpack.c.h.s8.bf16 %v3437_v62  ;;  %v3544_v33 = vunpack.c.l.s8.bf16 %v3438_v42  ;;  %v3402_v18 = vld [vmem:[#allocation11 + $0x8] sm:$0xff]  ;;  %v3543_v3 = vunpack.c.l.s8.bf16 %v3437_v62  ;;  %v3401_v41 = vld [vmem:[#allocation11] sm:$0xff] }
 0xb19   :  { %v3434_v50 = vld [vmem:[#allocation11 + $0x108] sm:$0xff]  ;;  %v3476_v44 = vunpack.c.h.s8.bf16 %v3402_v18  ;;  %v3433_v23 = vld [vmem:[#allocation11 + $0x100] sm:$0xff]  ;;  %v3475_v35 = vunpack.c.h.s8.bf16 %v3401_v41  ;;  %v3472_v40 = vunpack.c.l.s8.bf16 %v3402_v18  ;;  %v3471_v5 = vunpack.c.l.s8.bf16 %v3401_v41 }
 0xb1a   :  { %3602 = vmatpush1.bf16.msra.mxu1 %v3495_v63  ;;  %v3540_v9 = vunpack.c.h.s8.bf16 %v3434_v50  ;;  %v3539_v15 = vunpack.c.h.s8.bf16 %v3433_v23  ;;  %v3536_v34 = vunpack.c.l.s8.bf16 %v3434_v50  ;;  %v3430_v4 = vld [vmem:[#allocation11 + $0xe8] sm:$0xff]  ;;  %v3535_v30 = vunpack.c.l.s8.bf16 %v3433_v23  ;;  %v3429_v58 = vld [vmem:[#allocation11 + $0xe0] sm:$0xff] }
 0xb1b   :  { %3643 = vmatpush1.bf16.msra.mxu0 %v3559_v37  ;;  %3603 = vmatprep.subr.bf16.mxu1 %v3492_v57  ;;  %v3462_v36 = vld [vmem:[#allocation11 + $0x1e8] sm:$0xff]  ;;  %v3532_v31 = vunpack.c.h.s8.bf16 %v3430_v4  ;;  %v3461_v8 = vld [vmem:[#allocation11 + $0x1e0] sm:$0xff]  ;;  %v3531_v16 = vunpack.c.h.s8.bf16 %v3429_v58  ;;  %v3528_v25 = vunpack.c.l.s8.bf16 %v3430_v4  ;;  %v3527_v47 = vunpack.c.l.s8.bf16 %v3429_v58 }
 0xb1c   :  { %3644 = vmatprep.subr.bf16.mxu0 %v3556_v24  ;;  %v3596_v21 = vunpack.c.h.s8.bf16 %v3462_v36  ;;  %v3595_v14 = vunpack.c.h.s8.bf16 %v3461_v8  ;;  %v3592_v46 = vunpack.c.l.s8.bf16 %v3462_v36  ;;  %v3426_v61 = vld [vmem:[#allocation11 + $0xc8] sm:$0xff]  ;;  %v3591_v13 = vunpack.c.l.s8.bf16 %v3461_v8  ;;  %v3425_v57 = vld [vmem:[#allocation11 + $0xc0] sm:$0xff] }
 0xb1d   :  { %v3458_v49 = vld [vmem:[#allocation11 + $0x1c8] sm:$0xff]  ;;  %v3524_v63 = vunpack.c.h.s8.bf16 %v3426_v61  ;;  %v3457_v24 = vld [vmem:[#allocation11 + $0x1c0] sm:$0xff]  ;;  %v3523_v48 = vunpack.c.h.s8.bf16 %v3425_v57  ;;  %v3519_v0 = vunpack.c.l.s8.bf16 %v3425_v57  ;;  %v6463_v58 = vpack.c.bf16 %v6451_v17, %v6451_v17 }
 0xb1e   :  { %3604 = vmatpush1.bf16.msra.mxu1 %v3491_v27  ;;  %v3588_v37 = vunpack.c.h.s8.bf16 %v3458_v49  ;;  %v3587_v7 = vunpack.c.h.s8.bf16 %v3457_v24  ;;  %v3520_v27 = vunpack.c.l.s8.bf16 %v3426_v61  ;;  %v3583_v42 = vunpack.c.l.s8.bf16 %v3457_v24  ;;  %v3412_v61 = vld [vmem:[#allocation11 + $0x58] sm:$0xff] }
 0xb1f   :  { %3645 = vmatpush1.bf16.msra.mxu0 %v3555_v20  ;;  %3605 = vmatprep.subr.bf16.mxu1 %v3488_v43  ;;  %v3584_v20 = vunpack.c.l.s8.bf16 %v3458_v49  ;;  %v3422_v43 = vld [vmem:[#allocation11 + $0xa8] sm:$0xff]  ;;  %v6467_v8 = vpack.c.bf16 %v6453_v56, %v6453_v56  ;;  %v3444_v49 = vld [vmem:[#allocation11 + $0x158] sm:$0xff]  ;;  %v3494_v56 = vunpack.c.h.s8.bf16 %v3412_v61 }
 0xb20   :  { %3646 = vmatprep.subr.bf16.mxu0 %v3552_v53  ;;  %v3454_v53 = vld [vmem:[#allocation11 + $0x1a8] sm:$0xff] }
 0xb22   :  { %3606 = vmatpush1.bf16.msra.mxu1 %v3487_v32  ;;  %v3516_v32 = vunpack.c.h.s8.bf16 %v3422_v43 }
 0xb23   :  { %3647 = vmatpush1.bf16.msra.mxu0 %v3551_v6  ;;  %3607 = vmatprep.subr.bf16.mxu1 %v3484_v39  ;;  %v3580_v6 = vunpack.c.h.s8.bf16 %v3454_v53  ;;  %v3421_v39 = vld [vmem:[#allocation11 + $0xa0] sm:$0xff] }
 0xb24   :  { %3648 = vmatprep.subr.bf16.mxu0 %v3548_v28  ;;  %v3453_v28 = vld [vmem:[#allocation11 + $0x1a0] sm:$0xff]  ;;  %v3515_v19 = vunpack.c.h.s8.bf16 %v3421_v39  ;;  %v3511_v18 = vunpack.c.l.s8.bf16 %v3421_v39 }
 0xb25   :  { %v3579_v62 = vunpack.c.h.s8.bf16 %v3453_v28  ;;  %v3575_v50 = vunpack.c.l.s8.bf16 %v3453_v28 }
 0xb26   :  { %3608 = vmatpush1.bf16.msra.mxu1 %v3483_v51  ;;  %v3512_v51 = vunpack.c.l.s8.bf16 %v3422_v43 }
 0xb27   :  { %3649 = vmatpush1.bf16.msra.mxu0 %v3547_v11  ;;  %3609 = vmatprep.subr.bf16.mxu1 %v3480_v12  ;;  %v3576_v11 = vunpack.c.l.s8.bf16 %v3454_v53  ;;  %v3418_v12 = vld [vmem:[#allocation11 + $0x88] sm:$0xff] }
 0xb28   :  { %3650 = vmatprep.subr.bf16.mxu0 %v3544_v33  ;;  %v3450_v33 = vld [vmem:[#allocation11 + $0x188] sm:$0xff] }
 0xb2a   :  { %3610 = vmatpush1.bf16.msra.mxu1 %v3479_v59  ;;  %v3508_v59 = vunpack.c.h.s8.bf16 %v3418_v12 }
 0xb2b   :  { %3651 = vmatpush1.bf16.msra.mxu0 %v3543_v3  ;;  %3611 = vmatprep.subr.bf16.mxu1 %v3476_v44  ;;  %v3572_v3 = vunpack.c.h.s8.bf16 %v3450_v33  ;;  %v3417_v44 = vld [vmem:[#allocation11 + $0x80] sm:$0xff] }
 0xb2c   :  { %3652 = vmatprep.subr.bf16.mxu0 %v3540_v9  ;;  %v3449_v9 = vld [vmem:[#allocation11 + $0x180] sm:$0xff]  ;;  %v3507_v41 = vunpack.c.h.s8.bf16 %v3417_v44  ;;  %v3503_v4 = vunpack.c.l.s8.bf16 %v3417_v44 }
 0xb2d   :  { %v3571_v23 = vunpack.c.h.s8.bf16 %v3449_v9  ;;  %v3567_v36 = vunpack.c.l.s8.bf16 %v3449_v9 }
 0xb2e   :  { %3612 = vmatpush1.bf16.msra.mxu1 %v3475_v35  ;;  %v3504_v35 = vunpack.c.l.s8.bf16 %v3418_v12 }
 0xb2f   :  { %3653 = vmatpush1.bf16.msra.mxu0 %v3539_v15  ;;  %3613 = vmatprep.subr.bf16.mxu1 %v3472_v40  ;;  %v3568_v15 = vunpack.c.l.s8.bf16 %v3450_v33  ;;  %v3416_v40 = vld [vmem:[#allocation11 + $0x78] sm:$0xff] }
 0xb30   :  { %3654 = vmatprep.subr.bf16.mxu0 %v3536_v34  ;;  %v3448_v34 = vld [vmem:[#allocation11 + $0x178] sm:$0xff] }
 0xb32   :  { %3614 = vmatpush1.bf16.msra.mxu1 %v3471_v5  ;;  %v3502_v5 = vunpack.c.h.s8.bf16 %v3416_v40 }
 0xb33   :  { %3655 = vmatpush1.bf16.msra.mxu0 %v3535_v30  ;;  %3615 = vmatprep.subr.bf16.mxu1 %v3532_v31  ;;  %v3566_v30 = vunpack.c.h.s8.bf16 %v3448_v34  ;;  %v3415_v31 = vld [vmem:[#allocation11 + $0x70] sm:$0xff] }
 0xb34   :  { %3656 = vmatprep.subr.bf16.mxu0 %v3596_v21  ;;  %v3447_v21 = vld [vmem:[#allocation11 + $0x170] sm:$0xff]  ;;  %v3497_v17 = vunpack.c.l.s8.bf16 %v3415_v31 }
 0xb36   :  { %3616 = vmatpush2.bf16.msra.mxu1 %v3531_v16  ;;  %v3501_v16 = vunpack.c.h.s8.bf16 %v3415_v31 }
 0xb37   :  { %3657 = vmatpush2.bf16.msra.mxu0 %v3595_v14  ;;  %3617 = vmatprep.subr.bf16.mxu1 %v3528_v25  ;;  %v3565_v14 = vunpack.c.h.s8.bf16 %v3447_v21  ;;  %v3498_v25 = vunpack.c.l.s8.bf16 %v3416_v40 }
 0xb38   :  { %3658 = vmatprep.subr.bf16.mxu0 %v3592_v46  ;;  %v3562_v46 = vunpack.c.l.s8.bf16 %v3448_v34 }
 0xb3a   :  { %3618 = vmatpush2.bf16.msra.mxu1 %v3527_v47  ;;  %v3561_v47 = vunpack.c.l.s8.bf16 %v3447_v21 }
 0xb3b   :  { %3659 = vmatpush2.bf16.msra.mxu0 %v3591_v13  ;;  %3619 = vmatprep.subr.bf16.mxu1 %v3524_v63  ;;  %v3558_v13 = vunpack.c.h.s8.bf16 %v3444_v49  ;;  %v3411_v63 = vld [vmem:[#allocation11 + $0x50] sm:$0xff] }
 0xb3c   :  { %3660 = vmatprep.subr.bf16.mxu0 %v3588_v37  ;;  %v3443_v37 = vld [vmem:[#allocation11 + $0x150] sm:$0xff]  ;;  %v3493_v57 = vunpack.c.h.s8.bf16 %v3411_v63  ;;  %v3489_v43 = vunpack.c.l.s8.bf16 %v3411_v63 }
 0xb3d   :  { %v3557_v24 = vunpack.c.h.s8.bf16 %v3443_v37  ;;  %v3553_v53 = vunpack.c.l.s8.bf16 %v3443_v37 }
 0xb3e   :  { %3620 = vmatpush2.bf16.msra.mxu1 %v3523_v48  ;;  %v3490_v48 = vunpack.c.l.s8.bf16 %v3412_v61 }
 0xb3f   :  { %3661 = vmatpush2.bf16.msra.mxu0 %v3587_v7  ;;  %3621 = vmatprep.subr.bf16.mxu1 %v3520_v27  ;;  %v3554_v7 = vunpack.c.l.s8.bf16 %v3444_v49  ;;  %v3408_v27 = vld [vmem:[#allocation11 + $0x38] sm:$0xff] }
 0xb40   :  { %3662 = vmatprep.subr.bf16.mxu0 %v3584_v20  ;;  %v3440_v20 = vld [vmem:[#allocation11 + $0x138] sm:$0xff]  ;;  %v3482_v39 = vunpack.c.l.s8.bf16 %v3408_v27 }
 0xb41   :  { %v3546_v28 = vunpack.c.l.s8.bf16 %v3440_v20 }
 0xb42   :  { %3622 = vmatpush2.bf16.msra.mxu1 %v3519_v0  ;;  %v3486_v0 = vunpack.c.h.s8.bf16 %v3408_v27 }
 0xb43   :  { %3663 = vmatpush2.bf16.msra.mxu0 %v3583_v42  ;;  %3623 = vmatprep.subr.bf16.mxu1 %v3516_v32  ;;  %v3407_v42 = vld [vmem:[#allocation11 + $0x30] sm:$0xff] }
 0xb44   :  { %3664 = vmatprep.subr.bf16.mxu0 %v3580_v6  ;;  %v3485_v32 = vunpack.c.h.s8.bf16 %v3407_v42 }
 0xb46   :  { %3624 = vmatpush2.bf16.msra.mxu1 %v3515_v19  ;;  %v3404_v19 = vld [vmem:[#allocation11 + $0x18] sm:$0xff] }
 0xb47   :  { %3665 = vmatpush2.bf16.msra.mxu0 %v3579_v62  ;;  %3625 = vmatprep.subr.bf16.mxu1 %v3512_v51  ;;  %v3436_v62 = vld [vmem:[#allocation11 + $0x118] sm:$0xff]  ;;  %v3481_v51 = vunpack.c.l.s8.bf16 %v3407_v42  ;;  %v3478_v12 = vunpack.c.h.s8.bf16 %v3404_v19  ;;  %v3474_v44 = vunpack.c.l.s8.bf16 %v3404_v19 }
 0xb48   :  { %3666 = vmatprep.subr.bf16.mxu0 %v3576_v11  ;;  %v3542_v33 = vunpack.c.h.s8.bf16 %v3436_v62  ;;  %v3538_v9 = vunpack.c.l.s8.bf16 %v3436_v62 }
 0xb4a   :  { %3626 = vmatpush2.bf16.msra.mxu1 %v3511_v18  ;;  %v3403_v18 = vld [vmem:[#allocation11 + $0x10] sm:$0xff] }
 0xb4b   :  { %3667 = vmatpush2.bf16.msra.mxu0 %v3575_v50  ;;  %3627 = vmatprep.subr.bf16.mxu1 %v3508_v59  ;;  %v3435_v50 = vld [vmem:[#allocation11 + $0x110] sm:$0xff]  ;;  %v3477_v59 = vunpack.c.h.s8.bf16 %v3403_v18 }
 0xb4c   :  { %3668 = vmatprep.subr.bf16.mxu0 %v3572_v3  ;;  %v3541_v3 = vunpack.c.h.s8.bf16 %v3435_v50 }
 0xb4e   :  { %3628 = vmatpush2.bf16.msra.mxu1 %v3507_v41  ;;  %v3432_v41 = vld [vmem:[#allocation11 + $0xf8] sm:$0xff] }
 0xb4f   :  { %3669 = vmatpush2.bf16.msra.mxu0 %v3571_v23  ;;  %3629 = vmatprep.subr.bf16.mxu1 %v3504_v35  ;;  %v3464_v23 = vld [vmem:[#allocation11 + $0x1f8] sm:$0xff]  ;;  %v3473_v35 = vunpack.c.l.s8.bf16 %v3403_v18  ;;  %v3534_v40 = vunpack.c.h.s8.bf16 %v3432_v41  ;;  %v3530_v31 = vunpack.c.l.s8.bf16 %v3432_v41 }
 0xb50   :  { %3670 = vmatprep.subr.bf16.mxu0 %v3568_v15  ;;  %v3537_v15 = vunpack.c.l.s8.bf16 %v3435_v50  ;;  %v3598_v34 = vunpack.c.h.s8.bf16 %v3464_v23  ;;  %v3594_v21 = vunpack.c.l.s8.bf16 %v3464_v23 }
 0xb52   :  { %3630 = vmatpush2.bf16.msra.mxu1 %v3503_v4  ;;  %v3431_v4 = vld [vmem:[#allocation11 + $0xf0] sm:$0xff] }
 0xb53   :  { %3671 = vmatpush2.bf16.msra.mxu0 %v3567_v36  ;;  %3681 = vmatprep.subr.bf16.mxu1 %v3502_v5  ;;  %v3463_v36 = vld [vmem:[#allocation11 + $0x1f0] sm:$0xff]  ;;  %v3533_v5 = vunpack.c.h.s8.bf16 %v3431_v4 }
 0xb54   :  { %3722 = vmatprep.subr.bf16.mxu0 %v3566_v30  ;;  %v3597_v30 = vunpack.c.h.s8.bf16 %v3463_v36 }
 0xb55   :  { %3632 = vmatmul.mubr.bf16.vlgmr.msra.gmra.mxu1 %v6463_v58 }
 0xb56   :  { %3673 = vmatmul.mubr.bf16.vlgmr.msra.gmra.mxu0 %v6467_v8  ;;  %3682 = vmatpush1.bf16.msra.mxu1 %v3501_v16  ;;  %v3428_v16 = vld [vmem:[#allocation11 + $0xd8] sm:$0xff] }
 0xb57   :  { %3723 = vmatpush1.bf16.msra.mxu0 %v3565_v14  ;;  %3683 = vmatprep.subr.bf16.mxu1 %v3498_v25  ;;  %v3460_v14 = vld [vmem:[#allocation11 + $0x1d8] sm:$0xff]  ;;  %v3529_v25 = vunpack.c.l.s8.bf16 %v3431_v4  ;;  %v3526_v61 = vunpack.c.h.s8.bf16 %v3428_v16  ;;  %v3522_v63 = vunpack.c.l.s8.bf16 %v3428_v16 }
 0xb58   :  { %3724 = vmatprep.subr.bf16.mxu0 %v3562_v46  ;;  %3713 = vmatprep.mubr.bf16.mxu1 %v6455_v29  ;;  %v3550_v29 = vunpack.c.h.s8.bf16 %v3440_v20  ;;  %v3593_v46 = vunpack.c.l.s8.bf16 %v3463_v36  ;;  %v3590_v49 = vunpack.c.h.s8.bf16 %v3460_v14  ;;  %v3586_v37 = vunpack.c.l.s8.bf16 %v3460_v14 }
 0xb59   :  { %3754 = vmatprep.mubr.bf16.mxu0 %v6457_v38  ;;  %v3439_v38 = vld [vmem:[#allocation11 + $0x130] sm:$0xff] }
 0xb5a   :  { %3684 = vmatpush1.bf16.msra.mxu1 %v3497_v17  ;;  %v3549_v6 = vunpack.c.h.s8.bf16 %v3439_v38  ;;  %v3545_v11 = vunpack.c.l.s8.bf16 %v3439_v38  ;;  %v3427_v17 = vld [vmem:[#allocation11 + $0xd0] sm:$0xff] }
 0xb5b   :  { %3725 = vmatpush1.bf16.msra.mxu0 %v3561_v47  ;;  %3685 = vmatprep.subr.bf16.mxu1 %v3494_v56  ;;  %v3459_v47 = vld [vmem:[#allocation11 + $0x1d0] sm:$0xff]  ;;  %v3525_v56 = vunpack.c.h.s8.bf16 %v3427_v17 }
 0xb5c   :  { %3726 = vmatprep.subr.bf16.mxu0 %v3558_v13  ;;  %v3589_v13 = vunpack.c.h.s8.bf16 %v3459_v47 }
 0xb5e   :  { %3686 = vmatpush1.bf16.msra.mxu1 %v3493_v57  ;;  %v3424_v57 = vld [vmem:[#allocation11 + $0xb8] sm:$0xff] }
 0xb5f   :  { %3727 = vmatpush1.bf16.msra.mxu0 %v3557_v24  ;;  %3687 = vmatprep.subr.bf16.mxu1 %v3490_v48  ;;  %v3456_v24 = vld [vmem:[#allocation11 + $0x1b8] sm:$0xff]  ;;  %v3521_v48 = vunpack.c.l.s8.bf16 %v3427_v17  ;;  %v3518_v27 = vunpack.c.h.s8.bf16 %v3424_v57  ;;  %v3514_v42 = vunpack.c.l.s8.bf16 %v3424_v57 }
 0xb60   :  { %3728 = vmatprep.subr.bf16.mxu0 %v3554_v7  ;;  %v3585_v7 = vunpack.c.l.s8.bf16 %v3459_v47  ;;  %v3582_v20 = vunpack.c.h.s8.bf16 %v3456_v24  ;;  %v3578_v38 = vunpack.c.l.s8.bf16 %v3456_v24 }
 0xb62   :  { %3688 = vmatpush1.bf16.msra.mxu1 %v3489_v43  ;;  %v3423_v43 = vld [vmem:[#allocation11 + $0xb0] sm:$0xff] }
 0xb63   :  { %3729 = vmatpush1.bf16.msra.mxu0 %v3553_v53  ;;  %3689 = vmatprep.subr.bf16.mxu1 %v3486_v0  ;;  %v3455_v53 = vld [vmem:[#allocation11 + $0x1b0] sm:$0xff]  ;;  %v3517_v0 = vunpack.c.h.s8.bf16 %v3423_v43 }
 0xb64   :  { %3730 = vmatprep.subr.bf16.mxu0 %v3550_v29  ;;  %v3581_v29 = vunpack.c.h.s8.bf16 %v3455_v53 }
 0xb66   :  { %3690 = vmatpush1.bf16.msra.mxu1 %v3485_v32  ;;  %v3420_v32 = vld [vmem:[#allocation11 + $0x98] sm:$0xff] }
 0xb67   :  { %3731 = vmatpush1.bf16.msra.mxu0 %v3549_v6  ;;  %3691 = vmatprep.subr.bf16.mxu1 %v3482_v39  ;;  %v3452_v6 = vld [vmem:[#allocation11 + $0x198] sm:$0xff]  ;;  %v3513_v39 = vunpack.c.l.s8.bf16 %v3423_v43  ;;  %v3510_v19 = vunpack.c.h.s8.bf16 %v3420_v32  ;;  %v3506_v18 = vunpack.c.l.s8.bf16 %v3420_v32 }
 0xb68   :  { %3732 = vmatprep.subr.bf16.mxu0 %v3546_v28  ;;  %v3577_v28 = vunpack.c.l.s8.bf16 %v3455_v53  ;;  %v3574_v62 = vunpack.c.h.s8.bf16 %v3452_v6  ;;  %v3570_v50 = vunpack.c.l.s8.bf16 %v3452_v6 }
 0xb6a   :  { %3692 = vmatpush1.bf16.msra.mxu1 %v3481_v51  ;;  %v3419_v51 = vld [vmem:[#allocation11 + $0x90] sm:$0xff] }
 0xb6b   :  { %3733 = vmatpush1.bf16.msra.mxu0 %v3545_v11  ;;  %3693 = vmatprep.subr.bf16.mxu1 %v3478_v12  ;;  %v3451_v11 = vld [vmem:[#allocation11 + $0x190] sm:$0xff]  ;;  %v3509_v12 = vunpack.c.h.s8.bf16 %v3419_v51 }
 0xb6c   :  { %3734 = vmatprep.subr.bf16.mxu0 %v3542_v33  ;;  %v3573_v33 = vunpack.c.h.s8.bf16 %v3451_v11 }
 0xb6e   :  { %3694 = vmatpush1.bf16.msra.mxu1 %v3477_v59  ;;  %v3505_v59 = vunpack.c.l.s8.bf16 %v3419_v51 }
 0xb6f   :  { %3735 = vmatpush1.bf16.msra.mxu0 %v3541_v3  ;;  %3695 = vmatprep.subr.bf16.mxu1 %v3474_v44  ;;  %v3569_v3 = vunpack.c.l.s8.bf16 %v3451_v11  ;;  %v3466_v44 = vld [vmem:[%s6555_s4 + $0x2e] sm:$0xf] }
 0xb70   :  { %3736 = vmatprep.subr.bf16.mxu0 %v3538_v9  ;;  %v3465_v9 = vld [vmem:[%s6555_s4 + $0x2a] sm:$0xf]  ;;  %v3767_v41 = vrot.slane %v3466_v44, %v6683_v2  ;;  %v3779_v24 = vrot.slane %v3466_v44, %v6686_v1 }
 0xb71   :  { %v3800_v57 = vrot.slane %v3465_v9, %v6685_v55  ;;  %v3804_v43 = vrot.slane %v3465_v9, %v6686_v1 }
 0xb72   :  { %3696 = vmatpush1.bf16.msra.mxu1 %v3473_v35 }
 0xb73   :  { %3737 = vmatpush1.bf16.msra.mxu0 %v3537_v15  ;;  %3697 = vmatprep.subr.bf16.mxu1 %v3534_v40  ;;  %v3792_v40 = vrot.slane %v3465_v9, %v6683_v2 }
 0xb74   :  { %3738 = vmatprep.subr.bf16.mxu0 %v3598_v34  ;;  %v3771_v34 = vrot.slane %v3466_v44, %v6684_v26 }
 0xb76   :  { %3698 = vmatpush2.bf16.msra.mxu1 %v3533_v5  ;;  %v3796_v5 = vrot.slane %v3465_v9, %v6684_v26 }
 0xb77   :  { %3739 = vmatpush2.bf16.msra.mxu0 %v3597_v30  ;;  %3699 = vmatprep.subr.bf16.mxu1 %v3530_v31 }
 0xb78   :  { %3740 = vmatprep.subr.bf16.mxu0 %v3594_v21 }
 0xb7a   :  { %3700 = vmatpush2.bf16.msra.mxu1 %v3529_v25 }
 0xb7b   :  { %3741 = vmatpush2.bf16.msra.mxu0 %v3593_v46  ;;  %3701 = vmatprep.subr.bf16.mxu1 %v3526_v61 }
 0xb7c   :  { %3742 = vmatprep.subr.bf16.mxu0 %v3590_v49 }
 0xb7e   :  { %3702 = vmatpush2.bf16.msra.mxu1 %v3525_v56  ;;  %v3775_v56 = vrot.slane %v3466_v44, %v6685_v55 }
 0xb7f   :  { %3743 = vmatpush2.bf16.msra.mxu0 %v3589_v13  ;;  %3703 = vmatprep.subr.bf16.mxu1 %v3522_v63 }
 0xb80   :  { %3744 = vmatprep.subr.bf16.mxu0 %v3586_v37 }
 0xb82   :  { %3704 = vmatpush2.bf16.msra.mxu1 %v3521_v48 }
 0xb83   :  { %3745 = vmatpush2.bf16.msra.mxu0 %v3585_v7  ;;  %3705 = vmatprep.subr.bf16.mxu1 %v3518_v27 }
 0xb84   :  { %3746 = vmatprep.subr.bf16.mxu0 %v3582_v20 }
 0xb86   :  { %3706 = vmatpush2.bf16.msra.mxu1 %v3517_v0 }
 0xb87   :  { %3747 = vmatpush2.bf16.msra.mxu0 %v3581_v29  ;;  %3707 = vmatprep.subr.bf16.mxu1 %v3514_v42 }
 0xb88   :  { %3748 = vmatprep.subr.bf16.mxu0 %v3578_v38 }
 0xb8a   :  { %3708 = vmatpush2.bf16.msra.mxu1 %v3513_v39 }
 0xb8b   :  { %3749 = vmatpush2.bf16.msra.mxu0 %v3577_v28  ;;  %3709 = vmatprep.subr.bf16.mxu1 %v3510_v19 }
 0xb8c   :  { %3750 = vmatprep.subr.bf16.mxu0 %v3574_v62 }
 0xb8e   :  { %3710 = vmatpush2.bf16.msra.mxu1 %v3509_v12 }
 0xb8f   :  { %3751 = vmatpush2.bf16.msra.mxu0 %v3573_v33  ;;  %3711 = vmatprep.subr.bf16.mxu1 %v3506_v18 }
 0xb90   :  { %3752 = vmatprep.subr.bf16.mxu0 %v3570_v50 }
 0xb92   :  { %3712 = vmatpush2.bf16.msra.mxu1 %v3505_v59 }
 0xb93   :  { %3753 = vmatpush2.bf16.msra.mxu0 %v3569_v3 }
 0xb95   :  { %3714 = vmatmul.mubr.bf16.vlgmr.msra.gmra.mxu1 %v6463_v58 }
 0xb96   :  { %3755 = vmatmul.mubr.bf16.vlgmr.msra.gmra.mxu0 %v6467_v8 }
 0xc15   :  { %v3633_v23 = vpop.f32.mrf.mxu1 }
 0xc16   :  { %v3674_v35 = vpop.f32.mrf.mxu0 }
 0xc17   :  { %v3675_v15 = vadd.f32 %v3674_v35, %v3633_v23  ;;  %v3635_v58 = vpop.f32.mrf.mxu1 }
 0xc18   :  { %v3676_v4 = vpop.f32.mrf.mxu0 }
 0xc19   :  { %v3784_v8 = vmul.f32 %v3767_v41, %v3675_v15  ;;  %v3677_v36 = vadd.f32 %v3676_v4, %v3635_v58  ;;  %v3637_v30 = vpop.f32.mrf.mxu1 }
 0xc1a   :  { %v3678_v31 = vpop.f32.mrf.mxu0 }
 0xc1b   :  { %v3809_v21 = vadd.f32 %v3792_v40, %v3784_v8  ;;  %v3785_v16 = vmul.f32 %v3771_v34, %v3677_v36  ;;  %v3638_v14 = vpop.f32.mrf.mxu1 }
 0xc1c   :  { %v3679_v25 = vpop.f32.mrf.mxu0 }
 0xc1d   :  { %vm3813_vm9 = vcmp.gt.f32.partialorder %v3809_v21, 0.0  ;;  %v3817_v46 = vmul.f32 0.01, %v3809_v21  ;;  %v3810_v61 = vadd.f32 %v3796_v5, %v3785_v16 }
 0xc1f   :  { %v6485_v49 = vsel %vm3813_vm9, %v3809_v21, %v3817_v46  ;;  %vm3814_vm10 = vcmp.gt.f32.partialorder %v3810_v61, 0.0  ;;  %v3818_v17 = vmul.f32 0.01, %v3810_v61 }
 0xc21   :  { %v3822_v47 = vsel %vm3814_vm10, %v3810_v61, %v3818_v17 }
 0xc55   :  { %v3715_v13 = vpop.f32.mrf.mxu1 }
 0xc56   :  { %v3756_v63 = vpop.f32.mrf.mxu0 }
 0xc57   :  { %v3757_v37 = vadd.f32 %v3756_v63, %v3715_v13  ;;  %v3717_v48 = vpop.f32.mrf.mxu1 }
 0xc58   :  { %v3758_v7 = vpop.f32.mrf.mxu0 }
 0xc59   :  { %v3786_v27 = vmul.f32 %v3775_v56, %v3757_v37  ;;  %v3759_v20 = vadd.f32 %v3758_v7, %v3717_v48  ;;  %v3719_v53 = vpop.f32.mrf.mxu1 }
 0xc5a   :  { %v3760_v0 = vpop.f32.mrf.mxu0 }
 0xc5b   :  { %v3811_v29 = vadd.f32 %v3800_v57, %v3786_v27  ;;  %v3787_v42 = vmul.f32 %v3779_v24, %v3759_v20  ;;  %v3720_v38 = vpop.f32.mrf.mxu1 }
 0xc5c   :  { %v3761_v32 = vpop.f32.mrf.mxu0 }
 0xc5d   :  { %vm3815_vm11 = vcmp.gt.f32.partialorder %v3811_v29, 0.0  ;;  %v3819_v6 = vmul.f32 0.01, %v3811_v29  ;;  %v3812_v39 = vadd.f32 %v3804_v43, %v3787_v42 }
 0xc5f   :  { %v6491_v28 = vsel %vm3815_vm11, %v3811_v29, %v3819_v6  ;;  %vm3816_vm12 = vcmp.gt.f32.partialorder %v3812_v39, 0.0  ;;  %v3820_v19 = vmul.f32 0.01, %v3812_v39 }
 0xc61   :  { %v3824_v62 = vsel %vm3816_vm12, %v3812_v39, %v3820_v19 }
 0xc62   :  { %5306 = dma.done.wait [#allocation14 + $0xa], 8192 }
 0xc63   :  { %5307 = vsyncadd [#allocation14 + $0xa], 4294959104  ;;  %v6493_v51 = vpack.c.bf16 %v3822_v47, %v3822_v47  ;;  %v6495_v11 = vpack.c.bf16 %v3824_v62, %v3824_v62  ;;  %v3840_v12 = vld [vmem:[#allocation12 + $0x68] sm:$0xff]  ;;  %v3839_v18 = vld [vmem:[#allocation12 + $0x60] sm:$0xff] }
 0xc64   :  { %v3872_v33 = vld [vmem:[#allocation12 + $0x168] sm:$0xff]  ;;  %v3922_v50 = vunpack.c.l.s8.bf16 %v3840_v12  ;;  %v3926_v59 = vunpack.c.h.s8.bf16 %v3840_v12  ;;  %v3871_v9 = vld [vmem:[#allocation12 + $0x160] sm:$0xff]  ;;  %v3925_v41 = vunpack.c.h.s8.bf16 %v3839_v18  ;;  %v3921_v40 = vunpack.c.l.s8.bf16 %v3839_v18 }
 0xc65   :  { %4057 = vmatprep.mubr.bf16.mxu1 %v6493_v51  ;;  %4098 = vmatprep.mubr.bf16.mxu0 %v6495_v11  ;;  %v3986_v3 = vunpack.c.l.s8.bf16 %v3872_v33  ;;  %v3990_v44 = vunpack.c.h.s8.bf16 %v3872_v33  ;;  %v3989_v23 = vunpack.c.h.s8.bf16 %v3871_v9  ;;  %v3836_v35 = vld [vmem:[#allocation12 + $0x48] sm:$0xff]  ;;  %v3985_v34 = vunpack.c.l.s8.bf16 %v3871_v9  ;;  %v3835_v8 = vld [vmem:[#allocation12 + $0x40] sm:$0xff] }
 0xc66   :  { %v3868_v15 = vld [vmem:[#allocation12 + $0x148] sm:$0xff]  ;;  %4025 = vmatprep.subr.bf16.mxu1 %v3926_v59  ;;  %v3918_v58 = vunpack.c.h.s8.bf16 %v3836_v35  ;;  %v3867_v36 = vld [vmem:[#allocation12 + $0x140] sm:$0xff]  ;;  %v3917_v5 = vunpack.c.h.s8.bf16 %v3835_v8  ;;  %v3914_v31 = vunpack.c.l.s8.bf16 %v3836_v35  ;;  %v3913_v25 = vunpack.c.l.s8.bf16 %v3835_v8 }
 0xc67   :  { %4066 = vmatprep.subr.bf16.mxu0 %v3990_v44  ;;  %4026 = vmatpush1.bf16.msra.mxu1 %v3925_v41  ;;  %v3982_v4 = vunpack.c.h.s8.bf16 %v3868_v15  ;;  %v3981_v30 = vunpack.c.h.s8.bf16 %v3867_v36  ;;  %v3978_v21 = vunpack.c.l.s8.bf16 %v3868_v15  ;;  %v3832_v16 = vld [vmem:[#allocation12 + $0x28] sm:$0xff]  ;;  %v3977_v46 = vunpack.c.l.s8.bf16 %v3867_v36  ;;  %v3831_v47 = vld [vmem:[#allocation12 + $0x20] sm:$0xff] }
 0xc68   :  { %4067 = vmatpush1.bf16.msra.mxu0 %v3989_v23  ;;  %4027 = vmatprep.subr.bf16.mxu1 %v3922_v50  ;;  %v3864_v14 = vld [vmem:[#allocation12 + $0x128] sm:$0xff]  ;;  %v3910_v61 = vunpack.c.h.s8.bf16 %v3832_v16  ;;  %v3863_v56 = vld [vmem:[#allocation12 + $0x120] sm:$0xff]  ;;  %v3909_v13 = vunpack.c.h.s8.bf16 %v3831_v47  ;;  %v3906_v37 = vunpack.c.l.s8.bf16 %v3832_v16  ;;  %v3905_v7 = vunpack.c.l.s8.bf16 %v3831_v47 }
 0xc69   :  { %4068 = vmatprep.subr.bf16.mxu0 %v3986_v3  ;;  %v3974_v17 = vunpack.c.h.s8.bf16 %v3864_v14  ;;  %v3973_v63 = vunpack.c.h.s8.bf16 %v3863_v56  ;;  %v3970_v57 = vunpack.c.l.s8.bf16 %v3864_v14  ;;  %v3828_v24 = vld [vmem:[#allocation12 + $0x8] sm:$0xff]  ;;  %v3969_v27 = vunpack.c.l.s8.bf16 %v3863_v56  ;;  %v3827_v53 = vld [vmem:[#allocation12] sm:$0xff] }
 0xc6a   :  { %v3860_v48 = vld [vmem:[#allocation12 + $0x108] sm:$0xff]  ;;  %v3902_v20 = vunpack.c.h.s8.bf16 %v3828_v24  ;;  %v3859_v0 = vld [vmem:[#allocation12 + $0x100] sm:$0xff]  ;;  %v3901_v29 = vunpack.c.h.s8.bf16 %v3827_v53  ;;  %v3898_v38 = vunpack.c.l.s8.bf16 %v3828_v24  ;;  %v3897_v19 = vunpack.c.l.s8.bf16 %v3827_v53 }
 0xc6b   :  { %4028 = vmatpush1.bf16.msra.mxu1 %v3921_v40  ;;  %v3966_v43 = vunpack.c.h.s8.bf16 %v3860_v48  ;;  %v3965_v42 = vunpack.c.h.s8.bf16 %v3859_v0  ;;  %v3962_v32 = vunpack.c.l.s8.bf16 %v3860_v48  ;;  %v3856_v6 = vld [vmem:[#allocation12 + $0xe8] sm:$0xff]  ;;  %v3961_v62 = vunpack.c.l.s8.bf16 %v3859_v0  ;;  %v3855_v18 = vld [vmem:[#allocation12 + $0xe0] sm:$0xff] }
 0xc6c   :  { %4069 = vmatpush1.bf16.msra.mxu0 %v3985_v34  ;;  %4029 = vmatprep.subr.bf16.mxu1 %v3918_v58  ;;  %v3888_v39 = vld [vmem:[#allocation12 + $0x1e8] sm:$0xff]  ;;  %v3958_v12 = vunpack.c.h.s8.bf16 %v3856_v6  ;;  %v3887_v50 = vld [vmem:[#allocation12 + $0x1e0] sm:$0xff]  ;;  %v3957_v59 = vunpack.c.h.s8.bf16 %v3855_v18  ;;  %v3954_v44 = vunpack.c.l.s8.bf16 %v3856_v6  ;;  %v3953_v35 = vunpack.c.l.s8.bf16 %v3855_v18 }
 0xc6d   :  { %4070 = vmatprep.subr.bf16.mxu0 %v3982_v4  ;;  %v4022_v33 = vunpack.c.h.s8.bf16 %v3888_v39  ;;  %v4021_v3 = vunpack.c.h.s8.bf16 %v3887_v50  ;;  %v4018_v9 = vunpack.c.l.s8.bf16 %v3888_v39  ;;  %v3852_v41 = vld [vmem:[#allocation12 + $0xc8] sm:$0xff]  ;;  %v4017_v15 = vunpack.c.l.s8.bf16 %v3887_v50  ;;  %v3851_v58 = vld [vmem:[#allocation12 + $0xc0] sm:$0xff] }
 0xc6e   :  { %v3884_v23 = vld [vmem:[#allocation12 + $0x1c8] sm:$0xff]  ;;  %v3950_v40 = vunpack.c.h.s8.bf16 %v3852_v41  ;;  %v3883_v4 = vld [vmem:[#allocation12 + $0x1c0] sm:$0xff]  ;;  %v3949_v8 = vunpack.c.h.s8.bf16 %v3851_v58  ;;  %v3945_v16 = vunpack.c.l.s8.bf16 %v3851_v58  ;;  %v6501_v18 = vpack.c.bf16 %v6485_v49, %v6485_v49 }
 0xc6f   :  { %4030 = vmatpush1.bf16.msra.mxu1 %v3917_v5  ;;  %v4014_v34 = vunpack.c.h.s8.bf16 %v3884_v23  ;;  %v4013_v36 = vunpack.c.h.s8.bf16 %v3883_v4  ;;  %v3946_v5 = vunpack.c.l.s8.bf16 %v3852_v41  ;;  %v4009_v14 = vunpack.c.l.s8.bf16 %v3883_v4  ;;  %v3838_v41 = vld [vmem:[#allocation12 + $0x58] sm:$0xff] }
 0xc70   :  { %4071 = vmatpush1.bf16.msra.mxu0 %v3981_v30  ;;  %4031 = vmatprep.subr.bf16.mxu1 %v3914_v31  ;;  %v4010_v30 = vunpack.c.l.s8.bf16 %v3884_v23  ;;  %v3848_v31 = vld [vmem:[#allocation12 + $0xa8] sm:$0xff]  ;;  %v6505_v50 = vpack.c.bf16 %v6491_v28, %v6491_v28  ;;  %v3870_v23 = vld [vmem:[#allocation12 + $0x158] sm:$0xff]  ;;  %v3920_v28 = vunpack.c.h.s8.bf16 %v3838_v41 }
 0xc71   :  { %4072 = vmatprep.subr.bf16.mxu0 %v3978_v21  ;;  %v3880_v21 = vld [vmem:[#allocation12 + $0x1a8] sm:$0xff] }
 0xc73   :  { %4032 = vmatpush1.bf16.msra.mxu1 %v3913_v25  ;;  %v3942_v25 = vunpack.c.h.s8.bf16 %v3848_v31 }
 0xc74   :  { %4073 = vmatpush1.bf16.msra.mxu0 %v3977_v46  ;;  %4033 = vmatprep.subr.bf16.mxu1 %v3910_v61  ;;  %v4006_v46 = vunpack.c.h.s8.bf16 %v3880_v21  ;;  %v3847_v61 = vld [vmem:[#allocation12 + $0xa0] sm:$0xff] }
 0xc75   :  { %4074 = vmatprep.subr.bf16.mxu0 %v3974_v17  ;;  %v3879_v17 = vld [vmem:[#allocation12 + $0x1a0] sm:$0xff]  ;;  %v3941_v47 = vunpack.c.h.s8.bf16 %v3847_v61  ;;  %v3937_v24 = vunpack.c.l.s8.bf16 %v3847_v61 }
 0xc76   :  { %v4005_v56 = vunpack.c.h.s8.bf16 %v3879_v17  ;;  %v4001_v48 = vunpack.c.l.s8.bf16 %v3879_v17 }
 0xc77   :  { %4034 = vmatpush1.bf16.msra.mxu1 %v3909_v13  ;;  %v3938_v13 = vunpack.c.l.s8.bf16 %v3848_v31 }
 0xc78   :  { %4075 = vmatpush1.bf16.msra.mxu0 %v3973_v63  ;;  %4035 = vmatprep.subr.bf16.mxu1 %v3906_v37  ;;  %v4002_v63 = vunpack.c.l.s8.bf16 %v3880_v21  ;;  %v3844_v37 = vld [vmem:[#allocation12 + $0x88] sm:$0xff] }
 0xc79   :  { %4076 = vmatprep.subr.bf16.mxu0 %v3970_v57  ;;  %v3876_v57 = vld [vmem:[#allocation12 + $0x188] sm:$0xff] }
 0xc7b   :  { %4036 = vmatpush1.bf16.msra.mxu1 %v3905_v7  ;;  %v3934_v7 = vunpack.c.h.s8.bf16 %v3844_v37 }
 0xc7c   :  { %4077 = vmatpush1.bf16.msra.mxu0 %v3969_v27  ;;  %4037 = vmatprep.subr.bf16.mxu1 %v3902_v20  ;;  %v3998_v27 = vunpack.c.h.s8.bf16 %v3876_v57  ;;  %v3843_v20 = vld [vmem:[#allocation12 + $0x80] sm:$0xff] }
 0xc7d   :  { %4078 = vmatprep.subr.bf16.mxu0 %v3966_v43  ;;  %v3875_v43 = vld [vmem:[#allocation12 + $0x180] sm:$0xff]  ;;  %v3933_v53 = vunpack.c.h.s8.bf16 %v3843_v20  ;;  %v3929_v6 = vunpack.c.l.s8.bf16 %v3843_v20 }
 0xc7e   :  { %v3997_v0 = vunpack.c.h.s8.bf16 %v3875_v43  ;;  %v3993_v39 = vunpack.c.l.s8.bf16 %v3875_v43 }
 0xc7f   :  { %4038 = vmatpush1.bf16.msra.mxu1 %v3901_v29  ;;  %v3930_v29 = vunpack.c.l.s8.bf16 %v3844_v37 }
 0xc80   :  { %4079 = vmatpush1.bf16.msra.mxu0 %v3965_v42  ;;  %4039 = vmatprep.subr.bf16.mxu1 %v3898_v38  ;;  %v3994_v42 = vunpack.c.l.s8.bf16 %v3876_v57  ;;  %v3842_v38 = vld [vmem:[#allocation12 + $0x78] sm:$0xff] }
 0xc81   :  { %4080 = vmatprep.subr.bf16.mxu0 %v3962_v32  ;;  %v3874_v32 = vld [vmem:[#allocation12 + $0x178] sm:$0xff] }
 0xc83   :  { %4040 = vmatpush1.bf16.msra.mxu1 %v3897_v19  ;;  %v3928_v19 = vunpack.c.h.s8.bf16 %v3842_v38 }
 0xc84   :  { %4081 = vmatpush1.bf16.msra.mxu0 %v3961_v62  ;;  %4041 = vmatprep.subr.bf16.mxu1 %v3958_v12  ;;  %v3992_v62 = vunpack.c.h.s8.bf16 %v3874_v32  ;;  %v3841_v12 = vld [vmem:[#allocation12 + $0x70] sm:$0xff] }
 0xc85   :  { %4082 = vmatprep.subr.bf16.mxu0 %v4022_v33  ;;  %v3873_v33 = vld [vmem:[#allocation12 + $0x170] sm:$0xff]  ;;  %v3923_v49 = vunpack.c.l.s8.bf16 %v3841_v12 }
 0xc87   :  { %4042 = vmatpush2.bf16.msra.mxu1 %v3957_v59  ;;  %v3927_v59 = vunpack.c.h.s8.bf16 %v3841_v12 }
 0xc88   :  { %4083 = vmatpush2.bf16.msra.mxu0 %v4021_v3  ;;  %4043 = vmatprep.subr.bf16.mxu1 %v3954_v44  ;;  %v3991_v3 = vunpack.c.h.s8.bf16 %v3873_v33  ;;  %v3924_v44 = vunpack.c.l.s8.bf16 %v3842_v38 }
 0xc89   :  { %4084 = vmatprep.subr.bf16.mxu0 %v4018_v9  ;;  %v3988_v9 = vunpack.c.l.s8.bf16 %v3874_v32 }
 0xc8b   :  { %4044 = vmatpush2.bf16.msra.mxu1 %v3953_v35  ;;  %v3987_v35 = vunpack.c.l.s8.bf16 %v3873_v33 }
 0xc8c   :  { %4085 = vmatpush2.bf16.msra.mxu0 %v4017_v15  ;;  %4045 = vmatprep.subr.bf16.mxu1 %v3950_v40  ;;  %v3984_v15 = vunpack.c.h.s8.bf16 %v3870_v23  ;;  %v3837_v40 = vld [vmem:[#allocation12 + $0x50] sm:$0xff] }
 0xc8d   :  { %4086 = vmatprep.subr.bf16.mxu0 %v4014_v34  ;;  %v3869_v34 = vld [vmem:[#allocation12 + $0x150] sm:$0xff]  ;;  %v3919_v58 = vunpack.c.h.s8.bf16 %v3837_v40  ;;  %v3915_v31 = vunpack.c.l.s8.bf16 %v3837_v40 }
 0xc8e   :  { %v3983_v4 = vunpack.c.h.s8.bf16 %v3869_v34  ;;  %v3979_v21 = vunpack.c.l.s8.bf16 %v3869_v34 }
 0xc8f   :  { %4046 = vmatpush2.bf16.msra.mxu1 %v3949_v8  ;;  %v3916_v8 = vunpack.c.l.s8.bf16 %v3838_v41 }
 0xc90   :  { %4087 = vmatpush2.bf16.msra.mxu0 %v4013_v36  ;;  %4047 = vmatprep.subr.bf16.mxu1 %v3946_v5  ;;  %v3980_v36 = vunpack.c.l.s8.bf16 %v3870_v23  ;;  %v3834_v5 = vld [vmem:[#allocation12 + $0x38] sm:$0xff] }
 0xc91   :  { %4088 = vmatprep.subr.bf16.mxu0 %v4010_v30  ;;  %v3866_v30 = vld [vmem:[#allocation12 + $0x138] sm:$0xff]  ;;  %v3908_v61 = vunpack.c.l.s8.bf16 %v3834_v5 }
 0xc92   :  { %v3972_v17 = vunpack.c.l.s8.bf16 %v3866_v30 }
 0xc93   :  { %4048 = vmatpush2.bf16.msra.mxu1 %v3945_v16  ;;  %v3912_v16 = vunpack.c.h.s8.bf16 %v3834_v5 }
 0xc94   :  { %4089 = vmatpush2.bf16.msra.mxu0 %v4009_v14  ;;  %4049 = vmatprep.subr.bf16.mxu1 %v3942_v25  ;;  %v3833_v14 = vld [vmem:[#allocation12 + $0x30] sm:$0xff] }
 0xc95   :  { %4090 = vmatprep.subr.bf16.mxu0 %v4006_v46  ;;  %v3911_v25 = vunpack.c.h.s8.bf16 %v3833_v14 }
 0xc97   :  { %4050 = vmatpush2.bf16.msra.mxu1 %v3941_v47  ;;  %v3830_v47 = vld [vmem:[#allocation12 + $0x18] sm:$0xff] }
 0xc98   :  { %4091 = vmatpush2.bf16.msra.mxu0 %v4005_v56  ;;  %4051 = vmatprep.subr.bf16.mxu1 %v3938_v13  ;;  %v3862_v56 = vld [vmem:[#allocation12 + $0x118] sm:$0xff]  ;;  %v3907_v13 = vunpack.c.l.s8.bf16 %v3833_v14  ;;  %v3904_v37 = vunpack.c.h.s8.bf16 %v3830_v47  ;;  %v3900_v20 = vunpack.c.l.s8.bf16 %v3830_v47 }
 0xc99   :  { %4092 = vmatprep.subr.bf16.mxu0 %v4002_v63  ;;  %v3968_v57 = vunpack.c.h.s8.bf16 %v3862_v56  ;;  %v3964_v43 = vunpack.c.l.s8.bf16 %v3862_v56 }
 0xc9b   :  { %4052 = vmatpush2.bf16.msra.mxu1 %v3937_v24  ;;  %v3829_v24 = vld [vmem:[#allocation12 + $0x10] sm:$0xff] }
 0xc9c   :  { %4093 = vmatpush2.bf16.msra.mxu0 %v4001_v48  ;;  %4053 = vmatprep.subr.bf16.mxu1 %v3934_v7  ;;  %v3861_v48 = vld [vmem:[#allocation12 + $0x110] sm:$0xff]  ;;  %v3903_v7 = vunpack.c.h.s8.bf16 %v3829_v24 }
 0xc9d   :  { %4094 = vmatprep.subr.bf16.mxu0 %v3998_v27  ;;  %v3967_v27 = vunpack.c.h.s8.bf16 %v3861_v48 }
 0xc9f   :  { %4054 = vmatpush2.bf16.msra.mxu1 %v3933_v53  ;;  %v3858_v53 = vld [vmem:[#allocation12 + $0xf8] sm:$0xff] }
 0xca0   :  { %4095 = vmatpush2.bf16.msra.mxu0 %v3997_v0  ;;  %4055 = vmatprep.subr.bf16.mxu1 %v3930_v29  ;;  %v3890_v0 = vld [vmem:[#allocation12 + $0x1f8] sm:$0xff]  ;;  %v3899_v29 = vunpack.c.l.s8.bf16 %v3829_v24  ;;  %v3960_v38 = vunpack.c.h.s8.bf16 %v3858_v53  ;;  %v3956_v12 = vunpack.c.l.s8.bf16 %v3858_v53 }
 0xca1   :  { %4096 = vmatprep.subr.bf16.mxu0 %v3994_v42  ;;  %v3963_v42 = vunpack.c.l.s8.bf16 %v3861_v48  ;;  %v4024_v32 = vunpack.c.h.s8.bf16 %v3890_v0  ;;  %v4020_v33 = vunpack.c.l.s8.bf16 %v3890_v0 }
 0xca3   :  { %4056 = vmatpush2.bf16.msra.mxu1 %v3929_v6  ;;  %v3857_v6 = vld [vmem:[#allocation12 + $0xf0] sm:$0xff] }
 0xca4   :  { %4097 = vmatpush2.bf16.msra.mxu0 %v3993_v39  ;;  %4107 = vmatprep.subr.bf16.mxu1 %v3928_v19  ;;  %v3889_v39 = vld [vmem:[#allocation12 + $0x1f0] sm:$0xff]  ;;  %v3959_v19 = vunpack.c.h.s8.bf16 %v3857_v6 }
 0xca5   :  { %4148 = vmatprep.subr.bf16.mxu0 %v3992_v62  ;;  %v4023_v62 = vunpack.c.h.s8.bf16 %v3889_v39 }
 0xca6   :  { %4058 = vmatmul.mubr.bf16.vlgmr.msra.gmra.mxu1 %v6501_v18 }
 0xca7   :  { %4099 = vmatmul.mubr.bf16.vlgmr.msra.gmra.mxu0 %v6505_v50  ;;  %4108 = vmatpush1.bf16.msra.mxu1 %v3927_v59  ;;  %v3854_v59 = vld [vmem:[#allocation12 + $0xd8] sm:$0xff] }
 0xca8   :  { %4149 = vmatpush1.bf16.msra.mxu0 %v3991_v3  ;;  %4109 = vmatprep.subr.bf16.mxu1 %v3924_v44  ;;  %v3886_v3 = vld [vmem:[#allocation12 + $0x1d8] sm:$0xff]  ;;  %v3955_v44 = vunpack.c.l.s8.bf16 %v3857_v6  ;;  %v3952_v41 = vunpack.c.h.s8.bf16 %v3854_v59  ;;  %v3948_v40 = vunpack.c.l.s8.bf16 %v3854_v59 }
 0xca9   :  { %4150 = vmatprep.subr.bf16.mxu0 %v3988_v9  ;;  %4139 = vmatprep.mubr.bf16.mxu1 %v6493_v51  ;;  %v3976_v51 = vunpack.c.h.s8.bf16 %v3866_v30  ;;  %v4019_v9 = vunpack.c.l.s8.bf16 %v3889_v39  ;;  %v4016_v23 = vunpack.c.h.s8.bf16 %v3886_v3  ;;  %v4012_v34 = vunpack.c.l.s8.bf16 %v3886_v3 }
 0xcaa   :  { %4180 = vmatprep.mubr.bf16.mxu0 %v6495_v11  ;;  %v3865_v11 = vld [vmem:[#allocation12 + $0x130] sm:$0xff] }
 0xcab   :  { %4110 = vmatpush1.bf16.msra.mxu1 %v3923_v49  ;;  %v3975_v46 = vunpack.c.h.s8.bf16 %v3865_v11  ;;  %v3971_v63 = vunpack.c.l.s8.bf16 %v3865_v11  ;;  %v3853_v49 = vld [vmem:[#allocation12 + $0xd0] sm:$0xff] }
 0xcac   :  { %4151 = vmatpush1.bf16.msra.mxu0 %v3987_v35  ;;  %4111 = vmatprep.subr.bf16.mxu1 %v3920_v28  ;;  %v3885_v35 = vld [vmem:[#allocation12 + $0x1d0] sm:$0xff]  ;;  %v3951_v28 = vunpack.c.h.s8.bf16 %v3853_v49 }
 0xcad   :  { %4152 = vmatprep.subr.bf16.mxu0 %v3984_v15  ;;  %v4015_v15 = vunpack.c.h.s8.bf16 %v3885_v35 }
 0xcaf   :  { %4112 = vmatpush1.bf16.msra.mxu1 %v3919_v58  ;;  %v3850_v58 = vld [vmem:[#allocation12 + $0xb8] sm:$0xff] }
 0xcb0   :  { %4153 = vmatpush1.bf16.msra.mxu0 %v3983_v4  ;;  %4113 = vmatprep.subr.bf16.mxu1 %v3916_v8  ;;  %v3882_v4 = vld [vmem:[#allocation12 + $0x1b8] sm:$0xff]  ;;  %v3947_v8 = vunpack.c.l.s8.bf16 %v3853_v49  ;;  %v3944_v5 = vunpack.c.h.s8.bf16 %v3850_v58  ;;  %v3940_v14 = vunpack.c.l.s8.bf16 %v3850_v58 }
 0xcb1   :  { %4154 = vmatprep.subr.bf16.mxu0 %v3980_v36  ;;  %v4011_v36 = vunpack.c.l.s8.bf16 %v3885_v35  ;;  %v4008_v30 = vunpack.c.h.s8.bf16 %v3882_v4  ;;  %v4004_v11 = vunpack.c.l.s8.bf16 %v3882_v4 }
 0xcb3   :  { %4114 = vmatpush1.bf16.msra.mxu1 %v3915_v31  ;;  %v3849_v31 = vld [vmem:[#allocation12 + $0xb0] sm:$0xff] }
 0xcb4   :  { %4155 = vmatpush1.bf16.msra.mxu0 %v3979_v21  ;;  %4115 = vmatprep.subr.bf16.mxu1 %v3912_v16  ;;  %v3881_v21 = vld [vmem:[#allocation12 + $0x1b0] sm:$0xff]  ;;  %v3943_v16 = vunpack.c.h.s8.bf16 %v3849_v31 }
 0xcb5   :  { %4156 = vmatprep.subr.bf16.mxu0 %v3976_v51  ;;  %v4007_v51 = vunpack.c.h.s8.bf16 %v3881_v21 }
 0xcb7   :  { %4116 = vmatpush1.bf16.msra.mxu1 %v3911_v25  ;;  %v3846_v25 = vld [vmem:[#allocation12 + $0x98] sm:$0xff] }
 0xcb8   :  { %4157 = vmatpush1.bf16.msra.mxu0 %v3975_v46  ;;  %4117 = vmatprep.subr.bf16.mxu1 %v3908_v61  ;;  %v3878_v46 = vld [vmem:[#allocation12 + $0x198] sm:$0xff]  ;;  %v3939_v61 = vunpack.c.l.s8.bf16 %v3849_v31  ;;  %v3936_v47 = vunpack.c.h.s8.bf16 %v3846_v25  ;;  %v3932_v24 = vunpack.c.l.s8.bf16 %v3846_v25 }
 0xcb9   :  { %4158 = vmatprep.subr.bf16.mxu0 %v3972_v17  ;;  %v4003_v17 = vunpack.c.l.s8.bf16 %v3881_v21  ;;  %v4000_v56 = vunpack.c.h.s8.bf16 %v3878_v46  ;;  %v3996_v48 = vunpack.c.l.s8.bf16 %v3878_v46 }
 0xcbb   :  { %4118 = vmatpush1.bf16.msra.mxu1 %v3907_v13  ;;  %v3845_v13 = vld [vmem:[#allocation12 + $0x90] sm:$0xff] }
 0xcbc   :  { %4159 = vmatpush1.bf16.msra.mxu0 %v3971_v63  ;;  %4119 = vmatprep.subr.bf16.mxu1 %v3904_v37  ;;  %v3877_v63 = vld [vmem:[#allocation12 + $0x190] sm:$0xff]  ;;  %v3935_v37 = vunpack.c.h.s8.bf16 %v3845_v13 }
 0xcbd   :  { %4160 = vmatprep.subr.bf16.mxu0 %v3968_v57  ;;  %v3999_v57 = vunpack.c.h.s8.bf16 %v3877_v63 }
 0xcbf   :  { %4120 = vmatpush1.bf16.msra.mxu1 %v3903_v7  ;;  %v3931_v7 = vunpack.c.l.s8.bf16 %v3845_v13 }
 0xcc0   :  { %4161 = vmatpush1.bf16.msra.mxu0 %v3967_v27  ;;  %4121 = vmatprep.subr.bf16.mxu1 %v3900_v20  ;;  %v3995_v27 = vunpack.c.l.s8.bf16 %v3877_v63  ;;  %v3892_v20 = vld [vmem:[%s6555_s4 + $0x36] sm:$0xf] }
 0xcc1   :  { %4162 = vmatprep.subr.bf16.mxu0 %v3964_v43  ;;  %v3891_v43 = vld [vmem:[%s6555_s4 + $0x32] sm:$0xf]  ;;  %v4193_v53 = vrot.slane %v3892_v20, %v6683_v2  ;;  %v4201_v35 = vrot.slane %v3892_v20, %v6685_v55 }
 0xcc3   :  { %4122 = vmatpush1.bf16.msra.mxu1 %v3899_v29 }
 0xcc4   :  { %4163 = vmatpush1.bf16.msra.mxu0 %v3963_v42  ;;  %4123 = vmatprep.subr.bf16.mxu1 %v3960_v38  ;;  %v4218_v38 = vrot.slane %v3891_v43, %v6683_v2 }
 0xcc5   :  { %4164 = vmatprep.subr.bf16.mxu0 %v4024_v32  ;;  %v4197_v32 = vrot.slane %v3892_v20, %v6684_v26 }
 0xcc7   :  { %4124 = vmatpush2.bf16.msra.mxu1 %v3959_v19  ;;  %v4222_v19 = vrot.slane %v3891_v43, %v6684_v26  ;;  %v4226_v26 = vrot.slane %v3891_v43, %v6685_v55 }
 0xcc8   :  { %4165 = vmatpush2.bf16.msra.mxu0 %v4023_v62  ;;  %4125 = vmatprep.subr.bf16.mxu1 %v3956_v12 }
 0xcc9   :  { %4166 = vmatprep.subr.bf16.mxu0 %v4020_v33 }
 0xccb   :  { %4126 = vmatpush2.bf16.msra.mxu1 %v3955_v44 }
 0xccc   :  { %4167 = vmatpush2.bf16.msra.mxu0 %v4019_v9  ;;  %4127 = vmatprep.subr.bf16.mxu1 %v3952_v41 }
 0xccd   :  { %4168 = vmatprep.subr.bf16.mxu0 %v4016_v23 }
 0xccf   :  { %4128 = vmatpush2.bf16.msra.mxu1 %v3951_v28 }
 0xcd0   :  { %4169 = vmatpush2.bf16.msra.mxu0 %v4015_v15  ;;  %4129 = vmatprep.subr.bf16.mxu1 %v3948_v40 }
 0xcd1   :  { %4170 = vmatprep.subr.bf16.mxu0 %v4012_v34  ;;  %v4205_v34 = vrot.slane %v3892_v20, %v6686_v1 }
 0xcd3   :  { %4130 = vmatpush2.bf16.msra.mxu1 %v3947_v8 }
 0xcd4   :  { %4171 = vmatpush2.bf16.msra.mxu0 %v4011_v36  ;;  %4131 = vmatprep.subr.bf16.mxu1 %v3944_v5  ;;  %v4230_v5 = vrot.slane %v3891_v43, %v6686_v1 }
 0xcd5   :  { %4172 = vmatprep.subr.bf16.mxu0 %v4008_v30 }
 0xcd7   :  { %4132 = vmatpush2.bf16.msra.mxu1 %v3943_v16 }
 0xcd8   :  { %4173 = vmatpush2.bf16.msra.mxu0 %v4007_v51  ;;  %4133 = vmatprep.subr.bf16.mxu1 %v3940_v14 }
 0xcd9   :  { %4174 = vmatprep.subr.bf16.mxu0 %v4004_v11 }
 0xcdb   :  { %4134 = vmatpush2.bf16.msra.mxu1 %v3939_v61 }
 0xcdc   :  { %4175 = vmatpush2.bf16.msra.mxu0 %v4003_v17  ;;  %4135 = vmatprep.subr.bf16.mxu1 %v3936_v47 }
 0xcdd   :  { %4176 = vmatprep.subr.bf16.mxu0 %v4000_v56 }
 0xcdf   :  { %4136 = vmatpush2.bf16.msra.mxu1 %v3935_v37 }
 0xce0   :  { %4177 = vmatpush2.bf16.msra.mxu0 %v3999_v57  ;;  %4137 = vmatprep.subr.bf16.mxu1 %v3932_v24 }
 0xce1   :  { %4178 = vmatprep.subr.bf16.mxu0 %v3996_v48 }
 0xce3   :  { %4138 = vmatpush2.bf16.msra.mxu1 %v3931_v7 }
 0xce4   :  { %4179 = vmatpush2.bf16.msra.mxu0 %v3995_v27 }
 0xce6   :  { %4140 = vmatmul.mubr.bf16.vlgmr.msra.gmra.mxu1 %v6501_v18 }
 0xce7   :  { %4181 = vmatmul.mubr.bf16.vlgmr.msra.gmra.mxu0 %v6505_v50 }
 0xd66   :  { %v4059_v0 = vpop.f32.mrf.mxu1 }
 0xd67   :  { %v4100_v29 = vpop.f32.mrf.mxu0 }
 0xd68   :  { %v4101_v42 = vadd.f32 %v4100_v29, %v4059_v0  ;;  %v4061_v18 = vpop.f32.mrf.mxu1 }
 0xd69   :  { %v4102_v6 = vpop.f32.mrf.mxu0 }
 0xd6a   :  { %v4210_v50 = vmul.f32 %v4193_v53, %v4101_v42  ;;  %v4103_v39 = vadd.f32 %v4102_v6, %v4061_v18  ;;  %v4063_v62 = vpop.f32.mrf.mxu1 }
 0xd6b   :  { %v4104_v12 = vpop.f32.mrf.mxu0 }
 0xd6c   :  { %v4235_v33 = vadd.f32 %v4218_v38, %v4210_v50  ;;  %v4211_v59 = vmul.f32 %v4197_v32, %v4103_v39  ;;  %v4064_v3 = vpop.f32.mrf.mxu1 }
 0xd6d   :  { %v4105_v44 = vpop.f32.mrf.mxu0 }
 0xd6e   :  { %vm4239_vm13 = vcmp.gt.f32.partialorder %v4235_v33, 0.0  ;;  %v4243_v9 = vmul.f32 0.01, %v4235_v33  ;;  %v4236_v41 = vadd.f32 %v4222_v19, %v4211_v59 }
 0xd70   :  { %v6523_v23 = vsel %vm4239_vm13, %v4235_v33, %v4243_v9  ;;  %vm4240_vm14 = vcmp.gt.f32.partialorder %v4236_v41, 0.0  ;;  %v4244_v2 = vmul.f32 0.01, %v4236_v41 }
 0xd72   :  { %v4248_v49 = vsel %vm4240_vm14, %v4236_v41, %v4244_v2 }
 0xda6   :  { %v4141_v28 = vpop.f32.mrf.mxu1 }
 0xda7   :  { %v4182_v15 = vpop.f32.mrf.mxu0 }
 0xda8   :  { %v4183_v40 = vadd.f32 %v4182_v15, %v4141_v28  ;;  %v4143_v58 = vpop.f32.mrf.mxu1 }
 0xda9   :  { %v4184_v4 = vpop.f32.mrf.mxu0 }
 0xdaa   :  { %v4212_v8 = vmul.f32 %v4201_v35, %v4183_v40  ;;  %v4185_v36 = vadd.f32 %v4184_v4, %v4143_v58  ;;  %v4145_v30 = vpop.f32.mrf.mxu1 }
 0xdab   :  { %v4186_v31 = vpop.f32.mrf.mxu0 }
 0xdac   :  { %v4237_v21 = vadd.f32 %v4226_v26, %v4212_v8  ;;  %v4213_v16 = vmul.f32 %v4205_v34, %v4185_v36  ;;  %v4146_v51 = vpop.f32.mrf.mxu1 }
 0xdad   :  { %v4187_v14 = vpop.f32.mrf.mxu0 }
 0xdae   :  { %vm4241_vm15 = vcmp.gt.f32.partialorder %v4237_v21, 0.0  ;;  %v4245_v11 = vmul.f32 0.01, %v4237_v21  ;;  %v4238_v25 = vadd.f32 %v4230_v5, %v4213_v16 }
 0xdb0   :  { %v6529_v46 = vsel %vm4241_vm15, %v4237_v21, %v4245_v11  ;;  %vm4242_vm0 = vcmp.gt.f32.partialorder %v4238_v25, 0.0  ;;  %v4246_v55 = vmul.f32 0.01, %v4238_v25 }
 0xdb2   :  { %v4250_v61 = vsel %vm4242_vm0, %v4238_v25, %v4246_v55 }
 0xdb3   :  { %5308 = dma.done.wait [#allocation14 + $0xb], 4096 }
 0xdb4   :  { %5309 = vsyncadd [#allocation14 + $0xb], 4294963200  ;;  %v4319_v17 = vpack.c.bf16 %v4248_v49, %v4248_v49  ;;  %v4321_v47 = vpack.c.bf16 %v4250_v61, %v4250_v61  ;;  %v5150_v1 = vld [vmem:[#allocation13 + $0x78] sm:$0xff]   ;;  %v5154_v37 = vld [vmem:[#allocation13 + $0x70] sm:$0xff]   ;;  %v4318_v49 = vpack.c.bf16 %v6523_v23, %v6523_v23  ;;  %v4320_v35 = vpack.c.bf16 %v6529_v46, %v6529_v46 }
 0xdb5   :  { %v5151_v56 = vld [vmem:[#allocation13 + $0xf8] sm:$0xff]   ;;  %5020 = vmatprep.subr.bf16.mxu1 %v5150_v1  ;;  %v5155_v57 = vld [vmem:[#allocation13 + $0xf0] sm:$0xff]   ;;  %v5158_v7 = vld [vmem:[#allocation13 + $0x68] sm:$0xff]   ;;  %v4608_v14 = vstv %s6042_s15  ;;  %v4683_v46 = vadd.f32 %v6283_v22, %v6424_v10 }
 0xdb6   :  { %4552 = vmatprep.mubr.bf16.mxu1 %v4319_v17  ;;  %4592 = vmatprep.mubr.bf16.mxu0 %v4321_v47  ;;  %v5152_v13 = vld [vmem:[#allocation13 + $0x38] sm:$0xff]   ;;  %v5156_v24 = vld [vmem:[#allocation13 + $0x30] sm:$0xff]   ;;  %v5159_v27 = vld [vmem:[#allocation13 + $0xe8] sm:$0xff]  }
 0xdb7   :  { %5042 = vmatprep.subr.bf16.mxu0 %v5151_v56  ;;  %v5153_v63 = vld [vmem:[#allocation13 + $0xb8] sm:$0xff]   ;;  %5021 = vmatpush3.bf16.msra.mxu1 %v5152_v13  ;;  %v5157_v48 = vld [vmem:[#allocation13 + $0xb0] sm:$0xff]   ;;  %v5160_v20 = vld [vmem:[#allocation13 + $0x28] sm:$0xff]  }
 0xdb8   :  { %5043 = vmatpush3.bf16.msra.mxu0 %v5153_v63  ;;  %5022 = vmatprep.subr.bf16.mxu1 %v5154_v37  ;;  %v5161_v43 = vld [vmem:[#allocation13 + $0xa8] sm:$0xff]   ;;  %v5162_v53 = vld [vmem:[#allocation13 + $0x60] sm:$0xff]   ;;  %v5166_v38 = vld [vmem:[#allocation13 + $0x58] sm:$0xff]  }
 0xdb9   :  { %5044 = vmatprep.subr.bf16.mxu0 %v5155_v57  ;;  %v5163_v0 = vld [vmem:[#allocation13 + $0xe0] sm:$0xff]   ;;  %v5167_v32 = vld [vmem:[#allocation13 + $0xd8] sm:$0xff]   ;;  %v5170_v50 = vld [vmem:[#allocation13 + $0x50] sm:$0xff]  }
 0xdba   :  { %v5164_v29 = vld [vmem:[#allocation13 + $0x20] sm:$0xff]   ;;  %v5168_v18 = vld [vmem:[#allocation13 + $0x18] sm:$0xff]   ;;  %v5171_v39 = vld [vmem:[#allocation13 + $0xd0] sm:$0xff]  }
 0xdbb   :  { %5023 = vmatpush3.bf16.msra.mxu1 %v5156_v24  ;;  %v5165_v42 = vld [vmem:[#allocation13 + $0xa0] sm:$0xff]   ;;  %v5169_v6 = vld [vmem:[#allocation13 + $0x98] sm:$0xff]   ;;  %v5172_v19 = vld [vmem:[#allocation13 + $0x10] sm:$0xff]  }
 0xdbc   :  { %5045 = vmatpush3.bf16.msra.mxu0 %v5157_v48  ;;  %5024 = vmatprep.subr.bf16.mxu1 %v5158_v7  ;;  %v5173_v62 = vld [vmem:[#allocation13 + $0x90] sm:$0xff]   ;;  %v5174_v12 = vld [vmem:[#allocation13 + $0x48] sm:$0xff]   ;;  %v5178_v44 = vld [vmem:[#allocation13 + $0x40] sm:$0xff]  }
 0xdbd   :  { %5046 = vmatprep.subr.bf16.mxu0 %v5159_v27  ;;  %v5175_v33 = vld [vmem:[#allocation13 + $0xc8] sm:$0xff]   ;;  %v5179_v9 = vld [vmem:[#allocation13 + $0xc0] sm:$0xff]   ;;  %v4905_v23 = vld [vmem:[%s6555_s4 + $0x3a] ss:$0 sm:$0xff] }
 0xdbe   :  { %v5176_v59 = vld [vmem:[#allocation13 + $0x8] sm:$0xff]   ;;  %v5180_v41 = vld [vmem:[#allocation13] sm:$0xff]  }
 0xdbf   :  { %5025 = vmatpush3.bf16.msra.mxu1 %v5160_v20  ;;  %v5177_v3 = vld [vmem:[#allocation13 + $0x88] sm:$0xff]   ;;  %v5181_v2 = vld [vmem:[#allocation13 + $0x80] sm:$0xff]  }
 0xdc0   :  { %5047 = vmatpush3.bf16.msra.mxu0 %v5161_v43  ;;  %5026 = vmatprep.subr.bf16.mxu1 %v5162_v53 }
 0xdc1   :  { %5048 = vmatprep.subr.bf16.mxu0 %v5163_v0 }
 0xdc3   :  { %5027 = vmatpush3.bf16.msra.mxu1 %v5164_v29 }
 0xdc4   :  { %5049 = vmatpush3.bf16.msra.mxu0 %v5165_v42  ;;  %5028 = vmatprep.subr.bf16.mxu1 %v5166_v38 }
 0xdc5   :  { %5050 = vmatprep.subr.bf16.mxu0 %v5167_v32 }
 0xdc7   :  { %5029 = vmatpush3.bf16.msra.mxu1 %v5168_v18 }
 0xdc8   :  { %5051 = vmatpush3.bf16.msra.mxu0 %v5169_v6  ;;  %5030 = vmatprep.subr.bf16.mxu1 %v5170_v50 }
 0xdc9   :  { %5052 = vmatprep.subr.bf16.mxu0 %v5171_v39 }
 0xdcb   :  { %5031 = vmatpush3.bf16.msra.mxu1 %v5172_v19 }
 0xdcc   :  { %5053 = vmatpush3.bf16.msra.mxu0 %v5173_v62  ;;  %5032 = vmatprep.subr.bf16.mxu1 %v5174_v12 }
 0xdcd   :  { %5054 = vmatprep.subr.bf16.mxu0 %v5175_v33 }
 0xdcf   :  { %5033 = vmatpush3.bf16.msra.mxu1 %v5176_v59 }
 0xdd0   :  { %5055 = vmatpush3.bf16.msra.mxu0 %v5177_v3  ;;  %5034 = vmatprep.subr.bf16.mxu1 %v5178_v44 }
 0xdd1   :  { %5056 = vmatprep.subr.bf16.mxu0 %v5179_v9 }
 0xdd3   :  { %5035 = vmatpush3.bf16.msra.mxu1 %v5180_v41 }
 0xdd4   :  { %5057 = vmatpush3.bf16.msra.mxu0 %v5181_v2  ;;  %5072 = vmatprep.subr.mxu1 %v5317_v45 }
 0xdd6   :  { %4553 = vmatmul.mubr.bf16.vlgmr.msra.gmra.mxu1 %v4318_v49 }
 0xdd7   :  { %4593 = vmatmul.mubr.bf16.vlgmr.msra.gmra.mxu0 %v4320_v35  ;;  %5073 = vmatpush3.msra.mxu1 %v6422_v52 }
 0xdd8   :  { %5074 = vmatprep.mubr.msk.f32.mxu1 %vm5318_vm6, %v5317_v45  ;;  %vm4685_vm6 = vcmask 7168  }
 0xe96   :  { %v5036_v28 = vpop.f32.mrf.mxu1 }
 0xe97   :  { %v5058_v15 = vpop.f32.mrf.mxu0 }
 0xe98   :  { %v5037_v40 = vpop.f32.mrf.mxu1 }
 0xe99   :  { %v5038_v26 = vadd.f32 %v5037_v40, %v5036_v28  ;;  %v5059_v34 = vpop.f32.mrf.mxu0 }
 0xe9a   :  { %v5039_v58 = vpop.f32.mrf.mxu1  ;;  %v5060_v8 = vadd.f32 %v5059_v34, %v5058_v15 }
 0xe9b   :  { %v4555_v4 = vadd.f32 %v5038_v26, %v4905_v23  ;;  %v5061_v36 = vpop.f32.mrf.mxu0 }
 0xe9c   :  { %v5040_v5 = vpop.f32.mrf.mxu1 }
 0xe9d   :  { %v4595_v30 = vadd.f32 %v5060_v8, %v4555_v4  ;;  %v5062_v52 = vpop.f32.mrf.mxu0 }
 0xe9f   :  { %v4938_v31 = vmul.f32 -1.442695, %v4595_v30 }
 0xea1   :  { %5182 = vpow2.f32 %v4938_v31 }
 0xeae   :  { %v5183_v45 = vpop.eup %5182 }
 0xeaf   :  { %v4603_v21 = vadd.f32 1.0, %v5183_v45 }
 0xeb1   :  { %5184 = vrcp.f32 %v4603_v21 }
 0xebe   :  { %v5185_v16 = vpop.eup %5184 }
 0xebf   :  { %v4606_v51 = vmul.f32 %v5185_v16, %v6691_v60 }
 0xec1   :  { %v4607_v11 = vmul.f32 %v4606_v51, %v6287_v54 }
 0xec3   :  { %v4609_v25 = vmul.f32 %v4608_v14, %v4607_v11 }
 0xec5   :  { %5075 = vmatmul.mubr.msk.f32.vlgmr.msra.gmra.mxu1 %vm1752_vm5, %v4609_v25 }
 0xf85   :  { %v4679_v55 = vpop.f32.mrf.mxu1 }
 0xf86   :  { %v4684_v61 = vadd.f32 %v4683_v46, %v4679_v55 }
 0xf87   :  { %v5076_v17 = vpop.f32.mrf.mxu1 }
 0xf88   :  { %4686 = vst.msk [vmem:[%s6569_s18] sm:$0xff] %vm4685_vm6, %v4684_v61 }
 0xf89   :  { %4691 = vsyncmov [#allocation14] }
 0xf8c   :  { %s4692_s29 = vpop.sfrf %4691 }
 0xf8d   :  { %p4940_p11 = scmp.ne.s32.totalorder %s4692_s29, 0 }
 0xf8f   :  { %4696 = shalt.err (%p4940_p11)  }
 0xf90   :  { %4698 = vsyncmov [#allocation14 + $0x1] }
 0xf93   :  { %s4699_s15 = vpop.sfrf %4698 }
 0xf94   :  { %p4941_p12 = scmp.ne.s32.totalorder %s4699_s15, 0 }
 0xf96   :  { %4703 = shalt.err (%p4941_p12)  }
 0xf97   :  { %4705 = vsyncmov [#allocation14 + $0x2] }
 0xf9a   :  { %s4706_s1 = vpop.sfrf %4705 }
 0xf9b   :  { %p4942_p13 = scmp.ne.s32.totalorder %s4706_s1, 0 }
 0xf9d   :  { %4710 = shalt.err (%p4942_p13)  }
 0xf9e   :  { %4712 = vsyncmov [#allocation14 + $0x3] }
 0xfa1   :  { %s4713_s20 = vpop.sfrf %4712 }
 0xfa2   :  { %p4943_p0 = scmp.ne.s32.totalorder %s4713_s20, 0 }
 0xfa4   :  { %4717 = shalt.err (%p4943_p0)  }
 0xfa5   :  { %4719 = vsyncmov [#allocation14 + $0x4] }
 0xfa8   :  { %s4720_s21 = vpop.sfrf %4719 }
 0xfa9   :  { %p4944_p1 = scmp.ne.s32.totalorder %s4720_s21, 0 }
 0xfab   :  { %4724 = shalt.err (%p4944_p1)  }
 0xfac   :  { %4726 = vsyncmov [#allocation14 + $0x5] }
 0xfaf   :  { %s4727_s18 = vpop.sfrf %4726 }
 0xfb0   :  { %p4945_p2 = scmp.ne.s32.totalorder %s4727_s18, 0 }
 0xfb2   :  { %4731 = shalt.err (%p4945_p2)  }
 0xfb3   :  { %4733 = vsyncmov [#allocation14 + $0x6] }
 0xfb6   :  { %s4734_s22 = vpop.sfrf %4733 }
 0xfb7   :  { %p4946_p3 = scmp.ne.s32.totalorder %s4734_s22, 0 }
 0xfb9   :  { %4738 = shalt.err (%p4946_p3)  }
 0xfba   :  { %4740 = vsyncmov [#allocation14 + $0x7] }
 0xfbd   :  { %s4741_s13 = vpop.sfrf %4740 }
 0xfbe   :  { %p4947_p4 = scmp.ne.s32.totalorder %s4741_s13, 0 }
 0xfc0   :  { %4745 = shalt.err (%p4947_p4)  }
 0xfc1   :  { %4747 = vsyncmov [#allocation14 + $0x8] }
 0xfc4   :  { %s4748_s2 = vpop.sfrf %4747 }
 0xfc5   :  { %p4948_p5 = scmp.ne.s32.totalorder %s4748_s2, 0 }
 0xfc7   :  { %4752 = shalt.err (%p4948_p5)  }
 0xfc8   :  { %4754 = vsyncmov [#allocation14 + $0x9] }
 0xfcb   :  { %s4755_s23 = vpop.sfrf %4754 }
 0xfcc   :  { %p4949_p6 = scmp.ne.s32.totalorder %s4755_s23, 0 }
 0xfce   :  { %4759 = shalt.err (%p4949_p6)  }
 0xfcf   :  { %4761 = vsyncmov [#allocation14 + $0xa] }
 0xfd2   :  { %s4762_s12 = vpop.sfrf %4761 }
 0xfd3   :  { %p4950_p7 = scmp.ne.s32.totalorder %s4762_s12, 0 }
 0xfd5   :  { %4766 = shalt.err (%p4950_p7)  }
 0xfd6   :  { %4768 = vsyncmov [#allocation14 + $0xb] }
 0xfd9   :  { %s4769_s17 = vpop.sfrf %4768 }
 0xfda   :  { %p4951_p8 = scmp.ne.s32.totalorder %s4769_s17, 0 }
 0xfdc   :  { %4773 = shalt.err (%p4951_p8)  }

</bundles_post_ra>
